<compile_context>
chip_gen: v6e
topology: v6e:2x2x1
jax: 0.10.0
libtpu: 0.0.40
codegen_flags: <defaults>
</compile_context>

<pallas_src>
import math

import numpy as np

import jax
import jax.numpy as jnp
from jax import lax
from jax.experimental import pallas as pl
from jax.experimental.pallas import tpu as pltpu

C1 = 0.01 ** 2
C2 = 0.03 ** 2
LANE = 128


def _gauss_1d(window_size: int, sigma: float = 1.5):
    """Normalized 1-D Gaussian as plain Python floats (baked into the kernel)."""
    c = window_size // 2
    g = [math.exp(-((i - c) ** 2) / (2.0 * sigma * sigma)) for i in range(window_size)]
    s = sum(g)
    return [v / s for v in g]


def _tree_sum(terms):
    """Balanced add tree -> one fused expression, accumulators stay in vregs."""
    terms = list(terms)
    while len(terms) > 1:
        nxt = [terms[i] + terms[i + 1] for i in range(0, len(terms) - 1, 2)]
        if len(terms) % 2:
            nxt.append(terms[-1])
        terms = nxt
    return terms[0]


def _pick_vmem_limit():
    """Per-generation VMEM budget (v7x: 64 MiB physical, v5e/v6e: 128 MiB)."""
    try:
        phys = int(pltpu.get_tpu_info().vmem_capacity_bytes)
    except Exception:
        phys = 64 * 1024 * 1024  # assume the smallest (v7x per-TC)
    return max(16 * 1024 * 1024, min(int(phys * 0.6), 100 * 1024 * 1024))


def _choose_layout(NC, H, W, pad, vmem_limit):
    """Pick (r strips folded onto lanes, strip height sh, #strips S, #groups G, lane tiles)."""
    # Fold r strips onto the lane axis when NC < 128 so all 128 lanes stay live.
    r = max(1, min(LANE // max(NC, 1), H))
    lane_tiles = int(pl.cdiv(r * NC, LANE))
    Wp = W + 2 * pad
    # ~20 live (row, Wp, LANE) f32 slabs per block: 2 double-buffered inputs,
    # 3 hoisted products, 5 horizontal sums, vertical results + epilogue temps.
    bytes_per_row = Wp * LANE * 4
    rows_budget = max(2 * pad + 1, vmem_limit // (20 * bytes_per_row))
    sh = int(min(max(1, rows_budget - 2 * pad), pl.cdiv(H, r), H))
    S = int(pl.cdiv(H, sh))
    G = int(pl.cdiv(S, r))
    # Give the grid >= 2 steps when the image is big enough (pipelining, v7x 2 TCs).
    if G * lane_tiles == 1 and r == 1 and sh >= 8 * max(pad, 1):
        sh = int(pl.cdiv(H, 2))
        S = int(pl.cdiv(H, sh))
        G = int(pl.cdiv(S, r))
    return r, sh, S, G, lane_tiles


def _make_ssim_kernel(sh, W, ws, g):
    """Kernel over one strip x lane-tile: (sh+2p, W+2p, LANE) -> (8, LANE) partial sums."""
    half = ws // 2
    odd = (ws % 2) == 1

    def _shift(a, axis, start, length):
        if axis == 0:
            return a[start:start + length]
        return a[:, start:start + length, :]

    def _blur(a, axis, out_len):
        # Symmetric Gaussian: pair taps d and ws-1-d -> one multiply per pair.
        terms = [g[d] * (_shift(a, axis, d, out_len) + _shift(a, axis, ws - 1 - d, out_len))
                 for d in range(half)]
        if odd:
            terms.append(g[half] * _shift(a, axis, half, out_len))
        return _tree_sum(terms)

    def kernel(x_ref, y_ref, m_ref, o_ref):
        # x_ref, y_ref : (sh + 2*pad, W + 2*pad, LANE) zero-padded input strips (VMEM)
        # m_ref        : (sh, LANE) f32 validity mask (0 for padded lanes / rows)
        # o_ref        : (8, LANE)  lane-dense partial-sum block (8 identical rows)
        xp = x_ref[...]
        yp = y_ref[...]

        # Hoisted elementwise products (computed once, sliced per tap).
        xx = xp * xp
        yy = yp * yp
        xy = xp * yp

        def blur2(a):
            # separable Gaussian: horizontal (sublane/W) pass then vertical (major/H) pass
            return _blur(_blur(a, 1, W), 0, sh)

        mu1 = blur2(xp)
        mu2 = blur2(yp)
        e11 = blur2(xx)
        e22 = blur2(yy)
        e12 = blur2(xy)

        mu1_sq = mu1 * mu1
        mu2_sq = mu2 * mu2
        mu12 = mu1 * mu2
        s11 = e11 - mu1_sq
        s22 = e22 - mu2_sq
        s12 = e12 - mu12

        num = (2.0 * mu12 + C1) * (2.0 * s12 + C2)
        den = (mu1_sq + mu2_sq + C1) * (s11 + s22 + C2)

        # EUP approximate reciprocal + one Newton step (~f32 accurate; den >= C1*C2 > 0).
        rcp = pl.reciprocal(den, approx=True)
        rcp = rcp * (2.0 - den * rcp)
        ssim = num * rcp                                   # (sh, W, LANE)

        # In-kernel reduction; padded lanes/rows would evaluate to SSIM == 1, so mask first.
        masked = ssim * m_ref[...][:, None, :]
        part = jnp.sum(masked, axis=(0, 1), keepdims=True)  # (1, 1, LANE)
        o_ref[...] = jnp.broadcast_to(part[0], (8, LANE))   # host divides the grand sum by 8

    return kernel


def negative_ssim_loss(out_feature, gt_feature, window_size: int = 7):
    """loss = -mean(SSIM_map(out_feature, gt_feature)) with a Gaussian window."""
    N, C, H, W = out_feature.shape
    pad = window_size // 2
    NC = N * C
    Wp = W + 2 * pad

    g = _gauss_1d(window_size)
    vmem_limit = _pick_vmem_limit()
    r, sh, S, G, lane_tiles = _choose_layout(NC, H, W, pad, vmem_limit)
    sh_p = sh + 2 * pad
    lane_total = lane_tiles * LANE
    live = r * NC                      # live lanes per group (before LANE padding)

    def prep(a):
        # channels-last, lane-dense; spatial zero pad + halo'd H-strips folded
        # onto (group, lane) in a single XLA gather/reshape prep pass.
        a = a.astype(jnp.float32).reshape(NC, H, W)
        a = jnp.transpose(a, (1, 2, 0))                                # (H, W, NC)
        a = jnp.pad(a, ((pad, S * sh + pad - H), (pad, pad), (0, 0)))  # (S*sh+2p, Wp, NC)
        row_idx = jnp.arange(S)[:, None] * sh + jnp.arange(sh_p)[None, :]
        a = jnp.take(a, row_idx, axis=0)                               # (S, sh_p, Wp, NC)
        a = jnp.pad(a, ((0, G * r - S), (0, 0), (0, 0), (0, 0)))       # (G*r, sh_p, Wp, NC)
        a = a.reshape(G, r, sh_p, Wp, NC)
        a = jnp.transpose(a, (0, 2, 3, 1, 4))                          # (G, sh_p, Wp, r, NC)
        a = a.reshape(G, sh_p, Wp, live)
        return jnp.pad(a, ((0, 0), (0, 0), (0, 0), (0, lane_total - live)))

    xs = prep(out_feature)
    ys = prep(gt_feature)

    # Validity mask (precomputed on host): 1 where (group, row, lane) maps to a
    # real (n, c, h) output position, else 0.  Lane layout: lane = si*NC + c.
    lane = np.arange(lane_total)
    si = lane // NC
    s_glob = np.arange(G)[:, None, None] * r + si[None, None, :]       # (G, 1, lanes)
    h_glob = s_glob * sh + np.arange(sh)[None, :, None]                # (G, sh, lanes)
    mask = ((lane[None, None, :] < live) & (h_glob < H)).astype(np.float32)
    mask = jnp.asarray(mask)

    kernel = _make_ssim_kernel(sh, W, window_size, g)

    partials = pl.pallas_call(
        kernel,
        out_shape=jax.ShapeDtypeStruct((G, lane_tiles, 8, LANE), jnp.float32),
        grid_spec=pltpu.PrefetchScalarGridSpec(
            num_scalar_prefetch=0,
            grid=(G, lane_tiles),                            # (strip group, lane tile)
            in_specs=[
                pl.BlockSpec((None, sh_p, Wp, LANE), lambda i, t: (i, 0, 0, t)),
                pl.BlockSpec((None, sh_p, Wp, LANE), lambda i, t: (i, 0, 0, t)),
                pl.BlockSpec((None, sh, LANE), lambda i, t: (i, 0, t)),
            ],
            out_specs=pl.BlockSpec((None, None, 8, LANE), lambda i, t: (i, t, 0, 0)),
        ),
        compiler_params=pltpu.CompilerParams(
            dimension_semantics=("parallel", "parallel"),   # independent blocks; v7x 2-TC split
            vmem_limit_bytes=vmem_limit,
        ),
    )(xs, ys, mask)

    # Tiny glue: each block wrote its partial sum replicated over 8 sublanes.
    total = jnp.sum(partials) / 8.0
    return -(total / (NC * H * W))


def _ref_negative_ssim_loss(x, y, window_size):
    """Pure-JAX reference (depthwise conv with lax.conv_general_dilated)."""
    N, C, H, W = x.shape
    pad = window_size // 2
    g = _gauss_1d(window_size)
    win = jnp.asarray([[a * b for b in g] for a in g], dtype=jnp.float32)
    k = jnp.tile(win[None, None], (C, 1, 1, 1))               # (C, 1, ws, ws)

    def conv(img):
        return lax.conv_general_dilated(
            img.astype(jnp.float32), k, (1, 1), [(pad, pad), (pad, pad)],
            dimension_numbers=("NCHW", "OIHW", "NCHW"), feature_group_count=C)

    xf = x.astype(jnp.float32)
    yf = y.astype(jnp.float32)
    mu1, mu2 = conv(xf), conv(yf)
    s11 = conv(xf * xf) - mu1 ** 2
    s22 = conv(yf * yf) - mu2 ** 2
    s12 = conv(xf * yf) - mu1 * mu2
    num = (2.0 * mu1 * mu2 + C1) * (2.0 * s12 + C2)
    den = (mu1 ** 2 + mu2 ** 2 + C1) * (s11 + s22 + C2)
    return -jnp.mean(num / den)


if __name__ == "__main__":
    key = jax.random.PRNGKey(0)
    k1, k2 = jax.random.split(key)
    out_feature = jax.random.uniform(k1, (2, 4, 16, 16), dtype=jnp.float32)
    gt_feature = jax.random.uniform(k2, (2, 4, 16, 16), dtype=jnp.float32)

    loss_fn = jax.jit(lambda a, b: negative_ssim_loss(a, b, window_size=7))
    loss = jax.block_until_ready(loss_fn(out_feature, gt_feature))

    ref = jax.block_until_ready(_ref_negative_ssim_loss(out_feature, gt_feature, 7))
    assert jnp.allclose(loss, ref, atol=1e-5, rtol=1e-4), (loss, ref)

    print("KERNEL_OK")
</pallas_src>

<mosaic_0001>
module attributes {stable_mosaic.version = 11 : i64} {
  func.func @kernel(%arg0: i32, %arg1: i32, %arg2: memref<1x7x22x128xf32, #tpu.memory_space<vmem>>, %arg3: memref<1x7x22x128xf32, #tpu.memory_space<vmem>>, %arg4: memref<1x1x128xf32, #tpu.memory_space<vmem>>, %arg5: memref<1x1x8x128xf32, #tpu.memory_space<vmem>>) attributes {dimension_semantics = [#tpu.dimension_semantics<parallel>, #tpu.dimension_semantics<parallel>], iteration_bounds = array<i64: 1, 1>, scalar_prefetch = 0 : i64, scratch_operands = 0 : i64, tpu.core_type = #tpu.core_type<tc>, window_params = [{transform_indices = @transform_0, window_bounds = array<i64: 1, 7, 22, 128>}, {transform_indices = @transform_1, window_bounds = array<i64: 1, 7, 22, 128>}, {transform_indices = @transform_2, window_bounds = array<i64: 1, 1, 128>}, {transform_indices = @transform_3, window_bounds = array<i64: 1, 1, 8, 128>}]} {
    %c0 = arith.constant 0 : index
    %c0_0 = arith.constant 0 : index
    %c0_1 = arith.constant 0 : index
    %c0_2 = arith.constant 0 : index
    %0 = vector.load %arg2[%c0, %c0_0, %c0_1, %c0_2] : memref<1x7x22x128xf32, #tpu.memory_space<vmem>>, vector<1x7x22x128xf32>
    %1 = vector.shape_cast %0 : vector<1x7x22x128xf32> to vector<7x22x128xf32>
    %c0_3 = arith.constant 0 : index
    %c0_4 = arith.constant 0 : index
    %c0_5 = arith.constant 0 : index
    %c0_6 = arith.constant 0 : index
    %2 = vector.load %arg3[%c0_3, %c0_4, %c0_5, %c0_6] : memref<1x7x22x128xf32, #tpu.memory_space<vmem>>, vector<1x7x22x128xf32>
    %3 = vector.shape_cast %2 : vector<1x7x22x128xf32> to vector<7x22x128xf32>
    %4 = arith.mulf %1, %1 : vector<7x22x128xf32>
    %5 = arith.mulf %3, %3 : vector<7x22x128xf32>
    %6 = arith.mulf %1, %3 : vector<7x22x128xf32>
    %7 = vector.extract_strided_slice %1 {offsets = [0, 0, 0], sizes = [7, 16, 128], strides = [1, 1, 1]} : vector<7x22x128xf32> to vector<7x16x128xf32>
    %8 = vector.extract_strided_slice %1 {offsets = [0, 6, 0], sizes = [7, 16, 128], strides = [1, 1, 1]} : vector<7x22x128xf32> to vector<7x16x128xf32>
    %9 = arith.addf %7, %8 : vector<7x16x128xf32>
    %cst = arith.constant 0.036632847 : f32
    %10 = vector.broadcast %cst : f32 to vector<7x16x128xf32>
    %11 = arith.mulf %10, %9 : vector<7x16x128xf32>
    %12 = vector.extract_strided_slice %1 {offsets = [0, 1, 0], sizes = [7, 16, 128], strides = [1, 1, 1]} : vector<7x22x128xf32> to vector<7x16x128xf32>
    %13 = vector.extract_strided_slice %1 {offsets = [0, 5, 0], sizes = [7, 16, 128], strides = [1, 1, 1]} : vector<7x22x128xf32> to vector<7x16x128xf32>
    %14 = arith.addf %12, %13 : vector<7x16x128xf32>
    %cst_7 = arith.constant 0.111280762 : f32
    %15 = vector.broadcast %cst_7 : f32 to vector<7x16x128xf32>
    %16 = arith.mulf %15, %14 : vector<7x16x128xf32>
    %17 = vector.extract_strided_slice %1 {offsets = [0, 2, 0], sizes = [7, 16, 128], strides = [1, 1, 1]} : vector<7x22x128xf32> to vector<7x16x128xf32>
    %18 = vector.extract_strided_slice %1 {offsets = [0, 4, 0], sizes = [7, 16, 128], strides = [1, 1, 1]} : vector<7x22x128xf32> to vector<7x16x128xf32>
    %19 = arith.addf %17, %18 : vector<7x16x128xf32>
    %cst_8 = arith.constant 0.216745317 : f32
    %20 = vector.broadcast %cst_8 : f32 to vector<7x16x128xf32>
    %21 = arith.mulf %20, %19 : vector<7x16x128xf32>
    %22 = vector.extract_strided_slice %1 {offsets = [0, 3, 0], sizes = [7, 16, 128], strides = [1, 1, 1]} : vector<7x22x128xf32> to vector<7x16x128xf32>
    %cst_9 = arith.constant 0.270682156 : f32
    %23 = vector.broadcast %cst_9 : f32 to vector<7x16x128xf32>
    %24 = arith.mulf %23, %22 : vector<7x16x128xf32>
    %25 = arith.addf %11, %16 : vector<7x16x128xf32>
    %26 = arith.addf %21, %24 : vector<7x16x128xf32>
    %27 = arith.addf %25, %26 : vector<7x16x128xf32>
    %28 = vector.extract_strided_slice %27 {offsets = [0, 0, 0], sizes = [1, 16, 128], strides = [1, 1, 1]} : vector<7x16x128xf32> to vector<1x16x128xf32>
    %29 = vector.extract_strided_slice %27 {offsets = [6, 0, 0], sizes = [1, 16, 128], strides = [1, 1, 1]} : vector<7x16x128xf32> to vector<1x16x128xf32>
    %30 = arith.addf %28, %29 : vector<1x16x128xf32>
    %cst_10 = arith.constant 0.036632847 : f32
    %31 = vector.broadcast %cst_10 : f32 to vector<1x16x128xf32>
    %32 = arith.mulf %31, %30 : vector<1x16x128xf32>
    %33 = vector.extract_strided_slice %27 {offsets = [1, 0, 0], sizes = [1, 16, 128], strides = [1, 1, 1]} : vector<7x16x128xf32> to vector<1x16x128xf32>
    %34 = vector.extract_strided_slice %27 {offsets = [5, 0, 0], sizes = [1, 16, 128], strides = [1, 1, 1]} : vector<7x16x128xf32> to vector<1x16x128xf32>
    %35 = arith.addf %33, %34 : vector<1x16x128xf32>
    %cst_11 = arith.constant 0.111280762 : f32
    %36 = vector.broadcast %cst_11 : f32 to vector<1x16x128xf32>
    %37 = arith.mulf %36, %35 : vector<1x16x128xf32>
    %38 = vector.extract_strided_slice %27 {offsets = [2, 0, 0], sizes = [1, 16, 128], strides = [1, 1, 1]} : vector<7x16x128xf32> to vector<1x16x128xf32>
    %39 = vector.extract_strided_slice %27 {offsets = [4, 0, 0], sizes = [1, 16, 128], strides = [1, 1, 1]} : vector<7x16x128xf32> to vector<1x16x128xf32>
    %40 = arith.addf %38, %39 : vector<1x16x128xf32>
    %cst_12 = arith.constant 0.216745317 : f32
    %41 = vector.broadcast %cst_12 : f32 to vector<1x16x128xf32>
    %42 = arith.mulf %41, %40 : vector<1x16x128xf32>
    %43 = vector.extract_strided_slice %27 {offsets = [3, 0, 0], sizes = [1, 16, 128], strides = [1, 1, 1]} : vector<7x16x128xf32> to vector<1x16x128xf32>
    %cst_13 = arith.constant 0.270682156 : f32
    %44 = vector.broadcast %cst_13 : f32 to vector<1x16x128xf32>
    %45 = arith.mulf %44, %43 : vector<1x16x128xf32>
    %46 = arith.addf %32, %37 : vector<1x16x128xf32>
    %47 = arith.addf %42, %45 : vector<1x16x128xf32>
    %48 = arith.addf %46, %47 : vector<1x16x128xf32>
    %49 = vector.extract_strided_slice %3 {offsets = [0, 0, 0], sizes = [7, 16, 128], strides = [1, 1, 1]} : vector<7x22x128xf32> to vector<7x16x128xf32>
    %50 = vector.extract_strided_slice %3 {offsets = [0, 6, 0], sizes = [7, 16, 128], strides = [1, 1, 1]} : vector<7x22x128xf32> to vector<7x16x128xf32>
    %51 = arith.addf %49, %50 : vector<7x16x128xf32>
    %cst_14 = arith.constant 0.036632847 : f32
    %52 = vector.broadcast %cst_14 : f32 to vector<7x16x128xf32>
    %53 = arith.mulf %52, %51 : vector<7x16x128xf32>
    %54 = vector.extract_strided_slice %3 {offsets = [0, 1, 0], sizes = [7, 16, 128], strides = [1, 1, 1]} : vector<7x22x128xf32> to vector<7x16x128xf32>
    %55 = vector.extract_strided_slice %3 {offsets = [0, 5, 0], sizes = [7, 16, 128], strides = [1, 1, 1]} : vector<7x22x128xf32> to vector<7x16x128xf32>
    %56 = arith.addf %54, %55 : vector<7x16x128xf32>
    %cst_15 = arith.constant 0.111280762 : f32
    %57 = vector.broadcast %cst_15 : f32 to vector<7x16x128xf32>
    %58 = arith.mulf %57, %56 : vector<7x16x128xf32>
    %59 = vector.extract_strided_slice %3 {offsets = [0, 2, 0], sizes = [7, 16, 128], strides = [1, 1, 1]} : vector<7x22x128xf32> to vector<7x16x128xf32>
    %60 = vector.extract_strided_slice %3 {offsets = [0, 4, 0], sizes = [7, 16, 128], strides = [1, 1, 1]} : vector<7x22x128xf32> to vector<7x16x128xf32>
    %61 = arith.addf %59, %60 : vector<7x16x128xf32>
    %cst_16 = arith.constant 0.216745317 : f32
    %62 = vector.broadcast %cst_16 : f32 to vector<7x16x128xf32>
    %63 = arith.mulf %62, %61 : vector<7x16x128xf32>
    %64 = vector.extract_strided_slice %3 {offsets = [0, 3, 0], sizes = [7, 16, 128], strides = [1, 1, 1]} : vector<7x22x128xf32> to vector<7x16x128xf32>
    %cst_17 = arith.constant 0.270682156 : f32
    %65 = vector.broadcast %cst_17 : f32 to vector<7x16x128xf32>
    %66 = arith.mulf %65, %64 : vector<7x16x128xf32>
    %67 = arith.addf %53, %58 : vector<7x16x128xf32>
    %68 = arith.addf %63, %66 : vector<7x16x128xf32>
    %69 = arith.addf %67, %68 : vector<7x16x128xf32>
    %70 = vector.extract_strided_slice %69 {offsets = [0, 0, 0], sizes = [1, 16, 128], strides = [1, 1, 1]} : vector<7x16x128xf32> to vector<1x16x128xf32>
    %71 = vector.extract_strided_slice %69 {offsets = [6, 0, 0], sizes = [1, 16, 128], strides = [1, 1, 1]} : vector<7x16x128xf32> to vector<1x16x128xf32>
    %72 = arith.addf %70, %71 : vector<1x16x128xf32>
    %cst_18 = arith.constant 0.036632847 : f32
    %73 = vector.broadcast %cst_18 : f32 to vector<1x16x128xf32>
    %74 = arith.mulf %73, %72 : vector<1x16x128xf32>
    %75 = vector.extract_strided_slice %69 {offsets = [1, 0, 0], sizes = [1, 16, 128], strides = [1, 1, 1]} : vector<7x16x128xf32> to vector<1x16x128xf32>
    %76 = vector.extract_strided_slice %69 {offsets = [5, 0, 0], sizes = [1, 16, 128], strides = [1, 1, 1]} : vector<7x16x128xf32> to vector<1x16x128xf32>
    %77 = arith.addf %75, %76 : vector<1x16x128xf32>
    %cst_19 = arith.constant 0.111280762 : f32
    %78 = vector.broadcast %cst_19 : f32 to vector<1x16x128xf32>
    %79 = arith.mulf %78, %77 : vector<1x16x128xf32>
    %80 = vector.extract_strided_slice %69 {offsets = [2, 0, 0], sizes = [1, 16, 128], strides = [1, 1, 1]} : vector<7x16x128xf32> to vector<1x16x128xf32>
    %81 = vector.extract_strided_slice %69 {offsets = [4, 0, 0], sizes = [1, 16, 128], strides = [1, 1, 1]} : vector<7x16x128xf32> to vector<1x16x128xf32>
    %82 = arith.addf %80, %81 : vector<1x16x128xf32>
    %cst_20 = arith.constant 0.216745317 : f32
    %83 = vector.broadcast %cst_20 : f32 to vector<1x16x128xf32>
    %84 = arith.mulf %83, %82 : vector<1x16x128xf32>
    %85 = vector.extract_strided_slice %69 {offsets = [3, 0, 0], sizes = [1, 16, 128], strides = [1, 1, 1]} : vector<7x16x128xf32> to vector<1x16x128xf32>
    %cst_21 = arith.constant 0.270682156 : f32
    %86 = vector.broadcast %cst_21 : f32 to vector<1x16x128xf32>
    %87 = arith.mulf %86, %85 : vector<1x16x128xf32>
    %88 = arith.addf %74, %79 : vector<1x16x128xf32>
    %89 = arith.addf %84, %87 : vector<1x16x128xf32>
    %90 = arith.addf %88, %89 : vector<1x16x128xf32>
    %91 = vector.extract_strided_slice %4 {offsets = [0, 0, 0], sizes = [7, 16, 128], strides = [1, 1, 1]} : vector<7x22x128xf32> to vector<7x16x128xf32>
    %92 = vector.extract_strided_slice %4 {offsets = [0, 6, 0], sizes = [7, 16, 128], strides = [1, 1, 1]} : vector<7x22x128xf32> to vector<7x16x128xf32>
    %93 = arith.addf %91, %92 : vector<7x16x128xf32>
    %cst_22 = arith.constant 0.036632847 : f32
    %94 = vector.broadcast %cst_22 : f32 to vector<7x16x128xf32>
    %95 = arith.mulf %94, %93 : vector<7x16x128xf32>
    %96 = vector.extract_strided_slice %4 {offsets = [0, 1, 0], sizes = [7, 16, 128], strides = [1, 1, 1]} : vector<7x22x128xf32> to vector<7x16x128xf32>
    %97 = vector.extract_strided_slice %4 {offsets = [0, 5, 0], sizes = [7, 16, 128], strides = [1, 1, 1]} : vector<7x22x128xf32> to vector<7x16x128xf32>
    %98 = arith.addf %96, %97 : vector<7x16x128xf32>
    %cst_23 = arith.constant 0.111280762 : f32
    %99 = vector.broadcast %cst_23 : f32 to vector<7x16x128xf32>
    %100 = arith.mulf %99, %98 : vector<7x16x128xf32>
    %101 = vector.extract_strided_slice %4 {offsets = [0, 2, 0], sizes = [7, 16, 128], strides = [1, 1, 1]} : vector<7x22x128xf32> to vector<7x16x128xf32>
    %102 = vector.extract_strided_slice %4 {offsets = [0, 4, 0], sizes = [7, 16, 128], strides = [1, 1, 1]} : vector<7x22x128xf32> to vector<7x16x128xf32>
    %103 = arith.addf %101, %102 : vector<7x16x128xf32>
    %cst_24 = arith.constant 0.216745317 : f32
    %104 = vector.broadcast %cst_24 : f32 to vector<7x16x128xf32>
    %105 = arith.mulf %104, %103 : vector<7x16x128xf32>
    %106 = vector.extract_strided_slice %4 {offsets = [0, 3, 0], sizes = [7, 16, 128], strides = [1, 1, 1]} : vector<7x22x128xf32> to vector<7x16x128xf32>
    %cst_25 = arith.constant 0.270682156 : f32
    %107 = vector.broadcast %cst_25 : f32 to vector<7x16x128xf32>
    %108 = arith.mulf %107, %106 : vector<7x16x128xf32>
    %109 = arith.addf %95, %100 : vector<7x16x128xf32>
    %110 = arith.addf %105, %108 : vector<7x16x128xf32>
    %111 = arith.addf %109, %110 : vector<7x16x128xf32>
    %112 = vector.extract_strided_slice %111 {offsets = [0, 0, 0], sizes = [1, 16, 128], strides = [1, 1, 1]} : vector<7x16x128xf32> to vector<1x16x128xf32>
    %113 = vector.extract_strided_slice %111 {offsets = [6, 0, 0], sizes = [1, 16, 128], strides = [1, 1, 1]} : vector<7x16x128xf32> to vector<1x16x128xf32>
    %114 = arith.addf %112, %113 : vector<1x16x128xf32>
    %cst_26 = arith.constant 0.036632847 : f32
    %115 = vector.broadcast %cst_26 : f32 to vector<1x16x128xf32>
    %116 = arith.mulf %115, %114 : vector<1x16x128xf32>
    %117 = vector.extract_strided_slice %111 {offsets = [1, 0, 0], sizes = [1, 16, 128], strides = [1, 1, 1]} : vector<7x16x128xf32> to vector<1x16x128xf32>
    %118 = vector.extract_strided_slice %111 {offsets = [5, 0, 0], sizes = [1, 16, 128], strides = [1, 1, 1]} : vector<7x16x128xf32> to vector<1x16x128xf32>
    %119 = arith.addf %117, %118 : vector<1x16x128xf32>
    %cst_27 = arith.constant 0.111280762 : f32
    %120 = vector.broadcast %cst_27 : f32 to vector<1x16x128xf32>
    %121 = arith.mulf %120, %119 : vector<1x16x128xf32>
    %122 = vector.extract_strided_slice %111 {offsets = [2, 0, 0], sizes = [1, 16, 128], strides = [1, 1, 1]} : vector<7x16x128xf32> to vector<1x16x128xf32>
    %123 = vector.extract_strided_slice %111 {offsets = [4, 0, 0], sizes = [1, 16, 128], strides = [1, 1, 1]} : vector<7x16x128xf32> to vector<1x16x128xf32>
    %124 = arith.addf %122, %123 : vector<1x16x128xf32>
    %cst_28 = arith.constant 0.216745317 : f32
    %125 = vector.broadcast %cst_28 : f32 to vector<1x16x128xf32>
    %126 = arith.mulf %125, %124 : vector<1x16x128xf32>
    %127 = vector.extract_strided_slice %111 {offsets = [3, 0, 0], sizes = [1, 16, 128], strides = [1, 1, 1]} : vector<7x16x128xf32> to vector<1x16x128xf32>
    %cst_29 = arith.constant 0.270682156 : f32
    %128 = vector.broadcast %cst_29 : f32 to vector<1x16x128xf32>
    %129 = arith.mulf %128, %127 : vector<1x16x128xf32>
    %130 = arith.addf %116, %121 : vector<1x16x128xf32>
    %131 = arith.addf %126, %129 : vector<1x16x128xf32>
    %132 = arith.addf %130, %131 : vector<1x16x128xf32>
    %133 = vector.extract_strided_slice %5 {offsets = [0, 0, 0], sizes = [7, 16, 128], strides = [1, 1, 1]} : vector<7x22x128xf32> to vector<7x16x128xf32>
    %134 = vector.extract_strided_slice %5 {offsets = [0, 6, 0], sizes = [7, 16, 128], strides = [1, 1, 1]} : vector<7x22x128xf32> to vector<7x16x128xf32>
    %135 = arith.addf %133, %134 : vector<7x16x128xf32>
    %cst_30 = arith.constant 0.036632847 : f32
    %136 = vector.broadcast %cst_30 : f32 to vector<7x16x128xf32>
    %137 = arith.mulf %136, %135 : vector<7x16x128xf32>
    %138 = vector.extract_strided_slice %5 {offsets = [0, 1, 0], sizes = [7, 16, 128], strides = [1, 1, 1]} : vector<7x22x128xf32> to vector<7x16x128xf32>
    %139 = vector.extract_strided_slice %5 {offsets = [0, 5, 0], sizes = [7, 16, 128], strides = [1, 1, 1]} : vector<7x22x128xf32> to vector<7x16x128xf32>
    %140 = arith.addf %138, %139 : vector<7x16x128xf32>
    %cst_31 = arith.constant 0.111280762 : f32
    %141 = vector.broadcast %cst_31 : f32 to vector<7x16x128xf32>
    %142 = arith.mulf %141, %140 : vector<7x16x128xf32>
    %143 = vector.extract_strided_slice %5 {offsets = [0, 2, 0], sizes = [7, 16, 128], strides = [1, 1, 1]} : vector<7x22x128xf32> to vector<7x16x128xf32>
    %144 = vector.extract_strided_slice %5 {offsets = [0, 4, 0], sizes = [7, 16, 128], strides = [1, 1, 1]} : vector<7x22x128xf32> to vector<7x16x128xf32>
    %145 = arith.addf %143, %144 : vector<7x16x128xf32>
    %cst_32 = arith.constant 0.216745317 : f32
    %146 = vector.broadcast %cst_32 : f32 to vector<7x16x128xf32>
    %147 = arith.mulf %146, %145 : vector<7x16x128xf32>
    %148 = vector.extract_strided_slice %5 {offsets = [0, 3, 0], sizes = [7, 16, 128], strides = [1, 1, 1]} : vector<7x22x128xf32> to vector<7x16x128xf32>
    %cst_33 = arith.constant 0.270682156 : f32
    %149 = vector.broadcast %cst_33 : f32 to vector<7x16x128xf32>
    %150 = arith.mulf %149, %148 : vector<7x16x128xf32>
    %151 = arith.addf %137, %142 : vector<7x16x128xf32>
    %152 = arith.addf %147, %150 : vector<7x16x128xf32>
    %153 = arith.addf %151, %152 : vector<7x16x128xf32>
    %154 = vector.extract_strided_slice %153 {offsets = [0, 0, 0], sizes = [1, 16, 128], strides = [1, 1, 1]} : vector<7x16x128xf32> to vector<1x16x128xf32>
    %155 = vector.extract_strided_slice %153 {offsets = [6, 0, 0], sizes = [1, 16, 128], strides = [1, 1, 1]} : vector<7x16x128xf32> to vector<1x16x128xf32>
    %156 = arith.addf %154, %155 : vector<1x16x128xf32>
    %cst_34 = arith.constant 0.036632847 : f32
    %157 = vector.broadcast %cst_34 : f32 to vector<1x16x128xf32>
    %158 = arith.mulf %157, %156 : vector<1x16x128xf32>
    %159 = vector.extract_strided_slice %153 {offsets = [1, 0, 0], sizes = [1, 16, 128], strides = [1, 1, 1]} : vector<7x16x128xf32> to vector<1x16x128xf32>
    %160 = vector.extract_strided_slice %153 {offsets = [5, 0, 0], sizes = [1, 16, 128], strides = [1, 1, 1]} : vector<7x16x128xf32> to vector<1x16x128xf32>
    %161 = arith.addf %159, %160 : vector<1x16x128xf32>
    %cst_35 = arith.constant 0.111280762 : f32
    %162 = vector.broadcast %cst_35 : f32 to vector<1x16x128xf32>
    %163 = arith.mulf %162, %161 : vector<1x16x128xf32>
    %164 = vector.extract_strided_slice %153 {offsets = [2, 0, 0], sizes = [1, 16, 128], strides = [1, 1, 1]} : vector<7x16x128xf32> to vector<1x16x128xf32>
    %165 = vector.extract_strided_slice %153 {offsets = [4, 0, 0], sizes = [1, 16, 128], strides = [1, 1, 1]} : vector<7x16x128xf32> to vector<1x16x128xf32>
    %166 = arith.addf %164, %165 : vector<1x16x128xf32>
    %cst_36 = arith.constant 0.216745317 : f32
    %167 = vector.broadcast %cst_36 : f32 to vector<1x16x128xf32>
    %168 = arith.mulf %167, %166 : vector<1x16x128xf32>
    %169 = vector.extract_strided_slice %153 {offsets = [3, 0, 0], sizes = [1, 16, 128], strides = [1, 1, 1]} : vector<7x16x128xf32> to vector<1x16x128xf32>
    %cst_37 = arith.constant 0.270682156 : f32
    %170 = vector.broadcast %cst_37 : f32 to vector<1x16x128xf32>
    %171 = arith.mulf %170, %169 : vector<1x16x128xf32>
    %172 = arith.addf %158, %163 : vector<1x16x128xf32>
    %173 = arith.addf %168, %171 : vector<1x16x128xf32>
    %174 = arith.addf %172, %173 : vector<1x16x128xf32>
    %175 = vector.extract_strided_slice %6 {offsets = [0, 0, 0], sizes = [7, 16, 128], strides = [1, 1, 1]} : vector<7x22x128xf32> to vector<7x16x128xf32>
    %176 = vector.extract_strided_slice %6 {offsets = [0, 6, 0], sizes = [7, 16, 128], strides = [1, 1, 1]} : vector<7x22x128xf32> to vector<7x16x128xf32>
    %177 = arith.addf %175, %176 : vector<7x16x128xf32>
    %cst_38 = arith.constant 0.036632847 : f32
    %178 = vector.broadcast %cst_38 : f32 to vector<7x16x128xf32>
    %179 = arith.mulf %178, %177 : vector<7x16x128xf32>
    %180 = vector.extract_strided_slice %6 {offsets = [0, 1, 0], sizes = [7, 16, 128], strides = [1, 1, 1]} : vector<7x22x128xf32> to vector<7x16x128xf32>
    %181 = vector.extract_strided_slice %6 {offsets = [0, 5, 0], sizes = [7, 16, 128], strides = [1, 1, 1]} : vector<7x22x128xf32> to vector<7x16x128xf32>
    %182 = arith.addf %180, %181 : vector<7x16x128xf32>
    %cst_39 = arith.constant 0.111280762 : f32
    %183 = vector.broadcast %cst_39 : f32 to vector<7x16x128xf32>
    %184 = arith.mulf %183, %182 : vector<7x16x128xf32>
    %185 = vector.extract_strided_slice %6 {offsets = [0, 2, 0], sizes = [7, 16, 128], strides = [1, 1, 1]} : vector<7x22x128xf32> to vector<7x16x128xf32>
    %186 = vector.extract_strided_slice %6 {offsets = [0, 4, 0], sizes = [7, 16, 128], strides = [1, 1, 1]} : vector<7x22x128xf32> to vector<7x16x128xf32>
    %187 = arith.addf %185, %186 : vector<7x16x128xf32>
    %cst_40 = arith.constant 0.216745317 : f32
    %188 = vector.broadcast %cst_40 : f32 to vector<7x16x128xf32>
    %189 = arith.mulf %188, %187 : vector<7x16x128xf32>
    %190 = vector.extract_strided_slice %6 {offsets = [0, 3, 0], sizes = [7, 16, 128], strides = [1, 1, 1]} : vector<7x22x128xf32> to vector<7x16x128xf32>
    %cst_41 = arith.constant 0.270682156 : f32
    %191 = vector.broadcast %cst_41 : f32 to vector<7x16x128xf32>
    %192 = arith.mulf %191, %190 : vector<7x16x128xf32>
    %193 = arith.addf %179, %184 : vector<7x16x128xf32>
    %194 = arith.addf %189, %192 : vector<7x16x128xf32>
    %195 = arith.addf %193, %194 : vector<7x16x128xf32>
    %196 = vector.extract_strided_slice %195 {offsets = [0, 0, 0], sizes = [1, 16, 128], strides = [1, 1, 1]} : vector<7x16x128xf32> to vector<1x16x128xf32>
    %197 = vector.extract_strided_slice %195 {offsets = [6, 0, 0], sizes = [1, 16, 128], strides = [1, 1, 1]} : vector<7x16x128xf32> to vector<1x16x128xf32>
    %198 = arith.addf %196, %197 : vector<1x16x128xf32>
    %cst_42 = arith.constant 0.036632847 : f32
    %199 = vector.broadcast %cst_42 : f32 to vector<1x16x128xf32>
    %200 = arith.mulf %199, %198 : vector<1x16x128xf32>
    %201 = vector.extract_strided_slice %195 {offsets = [1, 0, 0], sizes = [1, 16, 128], strides = [1, 1, 1]} : vector<7x16x128xf32> to vector<1x16x128xf32>
    %202 = vector.extract_strided_slice %195 {offsets = [5, 0, 0], sizes = [1, 16, 128], strides = [1, 1, 1]} : vector<7x16x128xf32> to vector<1x16x128xf32>
    %203 = arith.addf %201, %202 : vector<1x16x128xf32>
    %cst_43 = arith.constant 0.111280762 : f32
    %204 = vector.broadcast %cst_43 : f32 to vector<1x16x128xf32>
    %205 = arith.mulf %204, %203 : vector<1x16x128xf32>
    %206 = vector.extract_strided_slice %195 {offsets = [2, 0, 0], sizes = [1, 16, 128], strides = [1, 1, 1]} : vector<7x16x128xf32> to vector<1x16x128xf32>
    %207 = vector.extract_strided_slice %195 {offsets = [4, 0, 0], sizes = [1, 16, 128], strides = [1, 1, 1]} : vector<7x16x128xf32> to vector<1x16x128xf32>
    %208 = arith.addf %206, %207 : vector<1x16x128xf32>
    %cst_44 = arith.constant 0.216745317 : f32
    %209 = vector.broadcast %cst_44 : f32 to vector<1x16x128xf32>
    %210 = arith.mulf %209, %208 : vector<1x16x128xf32>
    %211 = vector.extract_strided_slice %195 {offsets = [3, 0, 0], sizes = [1, 16, 128], strides = [1, 1, 1]} : vector<7x16x128xf32> to vector<1x16x128xf32>
    %cst_45 = arith.constant 0.270682156 : f32
    %212 = vector.broadcast %cst_45 : f32 to vector<1x16x128xf32>
    %213 = arith.mulf %212, %211 : vector<1x16x128xf32>
    %214 = arith.addf %200, %205 : vector<1x16x128xf32>
    %215 = arith.addf %210, %213 : vector<1x16x128xf32>
    %216 = arith.addf %214, %215 : vector<1x16x128xf32>
    %217 = arith.mulf %48, %48 : vector<1x16x128xf32>
    %218 = arith.mulf %90, %90 : vector<1x16x128xf32>
    %219 = arith.mulf %48, %90 : vector<1x16x128xf32>
    %220 = arith.subf %132, %217 : vector<1x16x128xf32>
    %221 = arith.subf %174, %218 : vector<1x16x128xf32>
    %222 = arith.subf %216, %219 : vector<1x16x128xf32>
    %cst_46 = arith.constant 2.000000e+00 : f32
    %223 = vector.broadcast %cst_46 : f32 to vector<1x16x128xf32>
    %224 = arith.mulf %223, %219 : vector<1x16x128xf32>
    %cst_47 = arith.constant 9.99999974E-5 : f32
    %225 = vector.broadcast %cst_47 : f32 to vector<1x16x128xf32>
    %226 = arith.addf %224, %225 : vector<1x16x128xf32>
    %cst_48 = arith.constant 2.000000e+00 : f32
    %227 = vector.broadcast %cst_48 : f32 to vector<1x16x128xf32>
    %228 = arith.mulf %227, %222 : vector<1x16x128xf32>
    %cst_49 = arith.constant 8.99999984E-4 : f32
    %229 = vector.broadcast %cst_49 : f32 to vector<1x16x128xf32>
    %230 = arith.addf %228, %229 : vector<1x16x128xf32>
    %231 = arith.mulf %226, %230 : vector<1x16x128xf32>
    %232 = arith.addf %217, %218 : vector<1x16x128xf32>
    %cst_50 = arith.constant 9.99999974E-5 : f32
    %233 = vector.broadcast %cst_50 : f32 to vector<1x16x128xf32>
    %234 = arith.addf %232, %233 : vector<1x16x128xf32>
    %235 = arith.addf %220, %221 : vector<1x16x128xf32>
    %cst_51 = arith.constant 8.99999984E-4 : f32
    %236 = vector.broadcast %cst_51 : f32 to vector<1x16x128xf32>
    %237 = arith.addf %235, %236 : vector<1x16x128xf32>
    %238 = arith.mulf %234, %237 : vector<1x16x128xf32>
    %239 = tpu.reciprocal %238 {approx = true} : vector<1x16x128xf32> -> vector<1x16x128xf32>
    %240 = arith.mulf %238, %239 : vector<1x16x128xf32>
    %cst_52 = arith.constant 2.000000e+00 : f32
    %241 = vector.broadcast %cst_52 : f32 to vector<1x16x128xf32>
    %242 = arith.subf %241, %240 : vector<1x16x128xf32>
    %243 = arith.mulf %239, %242 : vector<1x16x128xf32>
    %244 = arith.mulf %231, %243 : vector<1x16x128xf32>
    %c0_53 = arith.constant 0 : index
    %c0_54 = arith.constant 0 : index
    %c0_55 = arith.constant 0 : index
    %245 = vector.load %arg4[%c0_53, %c0_54, %c0_55] : memref<1x1x128xf32, #tpu.memory_space<vmem>>, vector<1x1x128xf32>
    %246 = vector.shape_cast %245 : vector<1x1x128xf32> to vector<1x128xf32>
    %247 = vector.shape_cast %246 : vector<1x128xf32> to vector<1x1x128xf32>
    %248 = vector.broadcast %247 : vector<1x1x128xf32> to vector<1x16x128xf32>
    %249 = arith.mulf %244, %248 : vector<1x16x128xf32>
    %cst_56 = arith.constant dense<0.000000e+00> : vector<128xf32>
    %250 = vector.multi_reduction <add>, %249, %cst_56 [0, 1] : vector<1x16x128xf32> to vector<128xf32>
    %251 = vector.shape_cast %250 : vector<128xf32> to vector<1x1x128xf32>
    %252 = vector.shape_cast %251 : vector<1x1x128xf32> to vector<1x128xf32>
    %253 = vector.shape_cast %252 : vector<1x128xf32> to vector<1x128xf32>
    %254 = vector.broadcast %253 : vector<1x128xf32> to vector<8x128xf32>
    %c0_57 = arith.constant 0 : index
    %c0_58 = arith.constant 0 : index
    %c0_59 = arith.constant 0 : index
    %c0_60 = arith.constant 0 : index
    %255 = vector.load %arg5[%c0_57, %c0_58, %c0_59, %c0_60] : memref<1x1x8x128xf32, #tpu.memory_space<vmem>>, vector<1x1x8x128xf32>
    %256 = vector.shape_cast %255 : vector<1x1x8x128xf32> to vector<8x128xf32>
    %257 = vector.shape_cast %254 : vector<8x128xf32> to vector<1x1x8x128xf32>
    tpu.vector_store %arg5[%c0_57, %c0_58, %c0_59, %c0_60], %257 {strides = array<i32>} : memref<1x1x8x128xf32, #tpu.memory_space<vmem>>, vector<1x1x8x128xf32>,
    return
  }
  func.func @transform_0(%arg0: i32, %arg1: i32) -> (i32, i32, i32, i32) {
    %c0_i32 = arith.constant 0 : i32
    %c0_i32_0 = arith.constant 0 : i32
    %c0_i32_1 = arith.constant 0 : i32
    return %arg0, %c0_i32, %c0_i32_0, %arg1 : i32, i32, i32, i32
  }
  func.func @transform_1(%arg0: i32, %arg1: i32) -> (i32, i32, i32, i32) {
    %c0_i32 = arith.constant 0 : i32
    %c0_i32_0 = arith.constant 0 : i32
    %c0_i32_1 = arith.constant 0 : i32
    return %arg0, %c0_i32, %c0_i32_0, %arg1 : i32, i32, i32, i32
  }
  func.func @transform_2(%arg0: i32, %arg1: i32) -> (i32, i32, i32) {
    %c0_i32 = arith.constant 0 : i32
    %c0_i32_0 = arith.constant 0 : i32
    return %arg0, %c0_i32, %arg1 : i32, i32, i32
  }
  func.func @transform_3(%arg0: i32, %arg1: i32) -> (i32, i32, i32, i32) {
    %c0_i32 = arith.constant 0 : i32
    %c0_i32_0 = arith.constant 0 : i32
    %c0_i32_1 = arith.constant 0 : i32
    return %arg0, %arg1, %c0_i32, %c0_i32_0 : i32, i32, i32, i32
  }
}

</mosaic_0001>

<bundles_post_ra>
// kernel: _lambda_.1
= control target key start
LH: loop header
LB: loop body
LE: loop exit
PB: predicated region body
PF: predicated region fallthrough
CT: control target
= control target key end

     0   :  { %vm140_vm0 = vcmask 1041408   ;;  %vm218_vm1 = vcmask 1043456   ;;  %vm317_vm2 = vcmask 1045504   ;;  %vm458_vm3 = vcmask 1046528   ;;  %s6522_s0 = inlined_call_operand.vmem [shape: f32[1,7,22,128], index: 0, kind: input, shape index: {}]   ;;  %s6523_s1 = inlined_call_operand.vmem [shape: f32[1,7,22,128], index: 1, kind: input, shape index: {}]   ;;  %s6524_s2 = inlined_call_operand.vmem [shape: f32[1,1,128], index: 2, kind: input, shape index: {}]   ;;  %s6525_s3 = inlined_call_operand.vmem [shape: f32[1,1,8,128], index: 3, kind: output, shape index: {}]  }
   0x1   :  { %v3244_v0 = vld [vmem:[%s6522_s0] sm:$0xff]  ;;  %v3249_v1 = vld [vmem:[%s6522_s0 + $0x8] sm:$0xff]  ;;  %v3254_v2 = vld [vmem:[%s6522_s0 + $0x10] sm:$0x3f] }
   0x2   :  { %6618 = vst [vmem:[#allocation2_spill] sm:$0xff] %v3254_v2  ;;  %v3259_v3 = vld [vmem:[%s6522_s0 + $0x18] sm:$0xff]  ;;  %v3264_v4 = vld [vmem:[%s6522_s0 + $0x20] sm:$0xff]  ;;  %v3269_v5 = vld [vmem:[%s6522_s0 + $0x28] sm:$0x3f]  ;;  %v141_v11 = vrot.slane %v3244_v0, 6  ;;  %v3305_v14 = vmul.f32 %v3244_v0, %v3244_v0  ;;  %v3309_v15 = vmul.f32 %v3249_v1, %v3249_v1  ;;  %v3313_v16 = vmul.f32 %v3254_v2, %v3254_v2 }
   0x3   :  { %6619 = vst [vmem:[#allocation3_spill] sm:$0xff] %v3259_v3  ;;  %v3274_v6 = vld [vmem:[%s6522_s0 + $0x30] sm:$0xff]  ;;  %v3279_v7 = vld [vmem:[%s6522_s0 + $0x38] sm:$0xff]  ;;  %v3284_v8 = vld [vmem:[%s6522_s0 + $0x40] sm:$0x3f]  ;;  %v142_v12 = vrot.slane %v3249_v1, 6  ;;  %v3317_v17 = vmul.f32 %v3259_v3, %v3259_v3  ;;  %v3321_v18 = vmul.f32 %v3264_v4, %v3264_v4  ;;  %v3325_v19 = vmul.f32 %v3269_v5, %v3269_v5 }
   0x4   :  { %v3289_v9 = vld [vmem:[%s6522_s0 + $0x48] sm:$0xff]  ;;  %v3294_v10 = vld [vmem:[%s6522_s0 + $0x50] sm:$0xff]  ;;  %v3301_v13 = vld [vmem:[%s6522_s0 + $0x58] sm:$0x3f]  ;;  %6620 = vst [vmem:[#allocation4_spill] sm:$0xff] %v3305_v14  ;;  %v3329_v20 = vmul.f32 %v3274_v6, %v3274_v6  ;;  %v3333_v21 = vmul.f32 %v3279_v7, %v3279_v7  ;;  %v3337_v22 = vmul.f32 %v3284_v8, %v3284_v8  ;;  %v144_v25 = vrot.slane %v3254_v2, 6 }
   0x5   :  { %6621 = vst [vmem:[#allocation5_spill] sm:$0xff] %v3309_v15  ;;  %6622 = vst [vmem:[#allocation6_spill] sm:$0xff] %v3313_v16  ;;  %v3341_v23 = vmul.f32 %v3289_v9, %v3289_v9  ;;  %v3345_v24 = vmul.f32 %v3294_v10, %v3294_v10  ;;  %v3351_v26 = vld [vmem:[%s6522_s0 + $0x60] sm:$0xff]  ;;  %v3356_v27 = vld [vmem:[%s6522_s0 + $0x68] sm:$0xff]  ;;  %v3365_v29 = vmul.f32 %v3301_v13, %v3301_v13  ;;  %v146_v31 = vrot.slane %v3259_v3, 6 }
   0x6   :  { %6623 = vst [vmem:[#allocation7_spill] sm:$0xff] %v3317_v17  ;;  %6624 = vst [vmem:[#allocation8_spill] sm:$0xff] %v3321_v18  ;;  %v3361_v28 = vld [vmem:[%s6522_s0 + $0x70] sm:$0x3f]  ;;  %v143_v30 = vsel %vm140_vm0, %v141_v11, %v142_v12  ;;  %v147_v32 = vrot.slane %v3264_v4, 6  ;;  %v3373_v33 = vld [vmem:[%s6522_s0 + $0x78] sm:$0xff]  ;;  %v3414_v51 = vmul.f32 %v3351_v26, %v3351_v26  ;;  %v145_v55 = vsel %vm140_vm0, %v142_v12, %v144_v25 }
   0x7   :  { %6625 = vst [vmem:[#allocation9_spill] sm:$0xff] %v3325_v19  ;;  %6626 = vst [vmem:[#allocation10_spill] sm:$0xff] %v3329_v20  ;;  %v3378_v34 = vld [vmem:[%s6522_s0 + $0x80] sm:$0xff]  ;;  %v149_v35 = vrot.slane %v3269_v5, 6  ;;  %v151_v36 = vrot.slane %v3274_v6, 6  ;;  %v152_v37 = vrot.slane %v3279_v7, 6  ;;  %v190_v25 = vadd.f32 %v143_v30, %v3244_v0 }
   0x8   :  { %6627 = vst [vmem:[#allocation11_spill] sm:$0xff] %v3333_v21  ;;  %6628 = vst [vmem:[#allocation12_spill] sm:$0xff] %v3337_v22  ;;  %v154_v38 = vrot.slane %v3284_v8, 6  ;;  %v3387_v39 = vld [vmem:[%s6522_s0 + $0x88] sm:$0x3f]  ;;  %v156_v40 = vrot.slane %v3289_v9, 6  ;;  %v148_v56 = vsel %vm140_vm0, %v146_v31, %v147_v32 }
   0x9   :  { %6629 = vst [vmem:[#allocation13_spill] sm:$0xff] %v3341_v23  ;;  %6630 = vst [vmem:[#allocation14_spill] sm:$0xff] %v3345_v24  ;;  %v157_v41 = vrot.slane %v3294_v10, 6  ;;  %v159_v42 = vrot.slane %v3301_v13, 6  ;;  %v161_v43 = vrot.slane %v3351_v26, 6  ;;  %v3396_v44 = vld [vmem:[%s6522_s0 + $0x90] sm:$0xff]  ;;  %v150_v57 = vsel %vm140_vm0, %v147_v32, %v149_v35 }
   0xa   :  { %6631 = vst [vmem:[#allocation15_spill] sm:$0xff] %v3365_v29  ;;  %v3401_v45 = vld [vmem:[%s6522_s0 + $0x98] sm:$0xff]  ;;  %v162_v46 = vrot.slane %v3356_v27, 6  ;;  %v164_v47 = vrot.slane %v3361_v28, 6  ;;  %v166_v48 = vrot.slane %v3373_v33, 6  ;;  %v167_v49 = vrot.slane %v3378_v34, 6 }
   0xb   :  { %v3410_v50 = vld [vmem:[%s6522_s0 + $0xa0] sm:$0x3f]  ;;  %6632 = vst [vmem:[#allocation16_spill] sm:$0xff] %v3414_v51  ;;  %v169_v52 = vrot.slane %v3387_v39, 6  ;;  %v171_v53 = vrot.slane %v3396_v44, 6  ;;  %v172_v54 = vrot.slane %v3401_v45, 6  ;;  %v153_v59 = vsel %vm140_vm0, %v151_v36, %v152_v37 }
   0xc   :  { %v174_v58 = vrot.slane %v3410_v50, 6  ;;  %v155_v60 = vsel %vm140_vm0, %v152_v37, %v154_v38  ;;  %v158_v61 = vsel %vm140_vm0, %v156_v40, %v157_v41  ;;  %v160_v62 = vsel %vm140_vm0, %v157_v41, %v159_v42 }
   0xd   :  { %v163_v63 = vsel %vm140_vm0, %v161_v43, %v162_v46  ;;  %v165_v11 = vsel %vm140_vm0, %v162_v46, %v164_v47  ;;  %v168_v12 = vsel %vm140_vm0, %v166_v48, %v167_v49  ;;  %v170_v31 = vsel %vm140_vm0, %v167_v49, %v169_v52 }
   0xe   :  { %v173_v32 = vsel %vm140_vm0, %v171_v53, %v172_v54  ;;  %v191_v35 = vadd.f32 %v145_v55, %v3249_v1  ;;  %v192_v36 = vadd.f32 %v148_v56, %v3259_v3  ;;  %v175_v37 = vsel %vm140_vm0, %v172_v54, %v174_v58 }
   0xf   :  { %v193_v38 = vadd.f32 %v150_v57, %v3264_v4  ;;  %v194_v40 = vadd.f32 %v153_v59, %v3274_v6  ;;  %v195_v41 = vadd.f32 %v155_v60, %v3279_v7  ;;  %v3441_v42 = vmul.f32 %v3356_v27, %v3356_v27 }
  0x10   :  { %v196_v30 = vadd.f32 %v158_v61, %v3289_v9  ;;  %v197_v43 = vadd.f32 %v160_v62, %v3294_v10  ;;  %v198_v46 = vadd.f32 %v163_v63, %v3351_v26  ;;  %v199_v47 = vadd.f32 %v165_v11, %v3356_v27 }
  0x11   :  { %6633 = vst [vmem:[#allocation17_spill] sm:$0xff] %v3441_v42  ;;  %v200_v48 = vadd.f32 %v168_v12, %v3373_v33  ;;  %v201_v49 = vadd.f32 %v170_v31, %v3378_v34  ;;  %v202_v52 = vadd.f32 %v173_v32, %v3396_v44  ;;  %v203_v53 = vadd.f32 %v175_v37, %v3401_v45 }
  0x12   :  { %v3451_v54 = vmul.f32 0.036632847, %v190_v25  ;;  %v3453_v55 = vmul.f32 0.036632847, %v191_v35  ;;  %v3455_v56 = vmul.f32 0.036632847, %v192_v36  ;;  %v3459_v57 = vmul.f32 %v3361_v28, %v3361_v28 }
  0x13   :  { %v3461_v58 = vmul.f32 0.036632847, %v193_v38  ;;  %v3463_v59 = vmul.f32 0.036632847, %v194_v40  ;;  %v3465_v60 = vmul.f32 0.036632847, %v195_v41  ;;  %v3469_v61 = vmul.f32 %v3373_v33, %v3373_v33 }
  0x14   :  { %6634 = vst [vmem:[#allocation18_spill] sm:$0xff] %v3451_v54  ;;  %6635 = vst [vmem:[#allocation19_spill] sm:$0xff] %v3453_v55  ;;  %v3471_v62 = vmul.f32 0.036632847, %v196_v30  ;;  %v3473_v63 = vmul.f32 0.036632847, %v197_v43  ;;  %v3479_v12 = vmul.f32 %v3378_v34, %v3378_v34 }
  0x15   :  { %6636 = vst [vmem:[#allocation20_spill] sm:$0xff] %v3455_v56  ;;  %6637 = vst [vmem:[#allocation21_spill] sm:$0xff] %v3459_v57  ;;  %v3475_v11 = vmul.f32 0.036632847, %v198_v46  ;;  %v3481_v25 = vmul.f32 0.036632847, %v199_v47 }
  0x16   :  { %6638 = vst [vmem:[#allocation22_spill] sm:$0xff] %v3461_v58  ;;  %6639 = vst [vmem:[#allocation23_spill] sm:$0xff] %v3463_v59  ;;  %v3483_v31 = vmul.f32 0.036632847, %v200_v48  ;;  %v3485_v32 = vmul.f32 0.036632847, %v201_v49 }
  0x17   :  { %6640 = vst [vmem:[#allocation24_spill] sm:$0xff] %v3465_v60  ;;  %6641 = vst [vmem:[#allocation25_spill] sm:$0xff] %v3469_v61  ;;  %v3487_v35 = vmul.f32 0.036632847, %v202_v52  ;;  %v3489_v36 = vmul.f32 0.036632847, %v203_v53 }
  0x18   :  { %6642 = vst [vmem:[#allocation26_spill] sm:$0xff] %v3471_v62  ;;  %6643 = vst [vmem:[#allocation27_spill] sm:$0xff] %v3473_v63  ;;  %v219_v37 = vrot.slane %v3244_v0, 4  ;;  %v220_v38 = vrot.slane %v3249_v1, 4  ;;  %v222_v40 = vrot.slane %v3254_v2, 4  ;;  %v224_v41 = vrot.slane %v3259_v3, 4 }
  0x19   :  { %6644 = vst [vmem:[#allocation28_spill] sm:$0xff] %v3475_v11  ;;  %6645 = vst [vmem:[#allocation29_spill] sm:$0xff] %v3479_v12  ;;  %v225_v30 = vrot.slane %v3264_v4, 4  ;;  %v227_v43 = vrot.slane %v3269_v5, 4  ;;  %v229_v46 = vrot.slane %v3274_v6, 4  ;;  %v230_v47 = vrot.slane %v3279_v7, 4 }
  0x1a   :  { %6646 = vst [vmem:[#allocation30_spill] sm:$0xff] %v3481_v25  ;;  %6647 = vst [vmem:[#allocation31_spill] sm:$0xff] %v3483_v31  ;;  %v232_v48 = vrot.slane %v3284_v8, 4  ;;  %v234_v49 = vrot.slane %v3289_v9, 4  ;;  %v235_v52 = vrot.slane %v3294_v10, 4  ;;  %v237_v53 = vrot.slane %v3301_v13, 4 }
  0x1b   :  { %6648 = vst [vmem:[#allocation32_spill] sm:$0xff] %v3485_v32  ;;  %6649 = vst [vmem:[#allocation33_spill] sm:$0xff] %v3487_v35  ;;  %v239_v12 = vrot.slane %v3351_v26, 4  ;;  %v240_v61 = vrot.slane %v3356_v27, 4  ;;  %v242_v57 = vrot.slane %v3361_v28, 4  ;;  %v244_v42 = vrot.slane %v3373_v33, 4 }
  0x1c   :  { %6650 = vst [vmem:[#allocation34_spill] sm:$0xff] %v3489_v36  ;;  %v245_v51 = vrot.slane %v3378_v34, 4  ;;  %v247_v29 = vrot.slane %v3387_v39, 4  ;;  %v221_v24 = vsel %vm218_vm1, %v219_v37, %v220_v38  ;;  %v223_v23 = vsel %vm218_vm1, %v220_v38, %v222_v40 }
  0x1d   :  { %v249_v22 = vrot.slane %v3396_v44, 4  ;;  %v250_v21 = vrot.slane %v3401_v45, 4  ;;  %v226_v20 = vsel %vm218_vm1, %v224_v41, %v225_v30  ;;  %v228_v19 = vsel %vm218_vm1, %v225_v30, %v227_v43 }
  0x1e   :  { %v231_v18 = vsel %vm218_vm1, %v229_v46, %v230_v47  ;;  %v252_v17 = vrot.slane %v3410_v50, 4  ;;  %v233_v16 = vsel %vm218_vm1, %v230_v47, %v232_v48  ;;  %v236_v15 = vsel %vm218_vm1, %v234_v49, %v235_v52 }
  0x1f   :  { %v238_v37 = vsel %vm218_vm1, %v235_v52, %v237_v53  ;;  %v241_v38 = vsel %vm218_vm1, %v239_v12, %v240_v61  ;;  %v243_v14 = vsel %vm218_vm1, %v240_v61, %v242_v57  ;;  %v246_v36 = vsel %vm218_vm1, %v244_v42, %v245_v51 }
  0x20   :  { %v248_v41 = vsel %vm218_vm1, %v245_v51, %v247_v29  ;;  %v275_v30 = vadd.f32 %v221_v24, %v3244_v0  ;;  %v251_v46 = vsel %vm218_vm1, %v249_v22, %v250_v21  ;;  %v276_v35 = vadd.f32 %v223_v23, %v3249_v1 }
  0x21   :  { %v277_v47 = vadd.f32 %v222_v40, %v3254_v2  ;;  %v278_v49 = vadd.f32 %v226_v20, %v3259_v3  ;;  %v253_v52 = vsel %vm218_vm1, %v250_v21, %v252_v17  ;;  %v279_v12 = vadd.f32 %v228_v19, %v3264_v4 }
  0x22   :  { %v280_v61 = vadd.f32 %v227_v43, %v3269_v5  ;;  %v281_v42 = vadd.f32 %v231_v18, %v3274_v6  ;;  %v282_v51 = vadd.f32 %v233_v16, %v3279_v7  ;;  %v283_v24 = vadd.f32 %v232_v48, %v3284_v8 }
  0x23   :  { %v284_v22 = vadd.f32 %v236_v15, %v3289_v9  ;;  %v285_v23 = vadd.f32 %v238_v37, %v3294_v10  ;;  %v286_v40 = vadd.f32 %v237_v53, %v3301_v13  ;;  %v287_v20 = vadd.f32 %v241_v38, %v3351_v26 }
  0x24   :  { %v288_v21 = vadd.f32 %v243_v14, %v3356_v27  ;;  %v289_v19 = vadd.f32 %v242_v57, %v3361_v28  ;;  %v290_v43 = vadd.f32 %v246_v36, %v3373_v33  ;;  %v291_v18 = vadd.f32 %v248_v41, %v3378_v34 }
  0x25   :  { %v292_v16 = vadd.f32 %v247_v29, %v3387_v39  ;;  %v3544_v32 = vmul.f32 0.11128076, %v275_v30  ;;  %v293_v15 = vadd.f32 %v251_v46, %v3396_v44  ;;  %v3547_v48 = vmul.f32 0.11128076, %v276_v35 }
  0x26   :  { %v3549_v37 = vmul.f32 0.11128076, %v277_v47  ;;  %v3551_v53 = vmul.f32 0.11128076, %v278_v49  ;;  %v294_v14 = vadd.f32 %v253_v52, %v3401_v45  ;;  %v3554_v57 = vmul.f32 0.11128076, %v279_v12 }
  0x27   :  { %v3556_v36 = vmul.f32 0.11128076, %v280_v61  ;;  %v3558_v38 = vmul.f32 0.11128076, %v281_v42  ;;  %v295_v29 = vadd.f32 %v252_v17, %v3410_v50  ;;  %v3561_v41 = vmul.f32 0.11128076, %v282_v51 }
  0x28   :  { %v3563_v30 = vmul.f32 0.11128076, %v283_v24  ;;  %v3565_v35 = vmul.f32 0.11128076, %v284_v22  ;;  %v3569_v46 = vmul.f32 %v3387_v39, %v3387_v39  ;;  %v3571_v47 = vmul.f32 0.11128076, %v285_v23 }
  0x29   :  { %v3573_v49 = vmul.f32 0.11128076, %v286_v40  ;;  %v3575_v52 = vmul.f32 0.11128076, %v287_v20  ;;  %v3579_v12 = vmul.f32 %v3396_v44, %v3396_v44  ;;  %v3581_v17 = vmul.f32 0.11128076, %v288_v21 }
  0x2a   :  { %6651 = vst [vmem:[#allocation35_spill] sm:$0xff] %v3569_v46  ;;  %v3583_v61 = vmul.f32 0.11128076, %v289_v19  ;;  %v3585_v42 = vmul.f32 0.11128076, %v290_v43  ;;  %v3589_v51 = vmul.f32 %v3401_v45, %v3401_v45  ;;  %v318_v21 = vrot.slane %v3244_v0, 2 }
  0x2b   :  { %6652 = vst [vmem:[#allocation36_spill] sm:$0xff] %v3575_v52  ;;  %6653 = vst [vmem:[#allocation37_spill] sm:$0xff] %v3579_v12  ;;  %v3591_v24 = vmul.f32 0.11128076, %v291_v18  ;;  %v3593_v22 = vmul.f32 0.11128076, %v292_v16 }
  0x2c   :  { %6654 = vst [vmem:[#allocation38_spill] sm:$0xff] %v3581_v17  ;;  %6655 = vst [vmem:[#allocation39_spill] sm:$0xff] %v3583_v61  ;;  %v3595_v23 = vmul.f32 0.11128076, %v293_v15  ;;  %v3597_v40 = vmul.f32 0.11128076, %v294_v14 }
  0x2d   :  { %6656 = vst [vmem:[#allocation40_spill] sm:$0xff] %v3585_v42  ;;  %6657 = vst [vmem:[#allocation41_spill] sm:$0xff] %v3589_v51  ;;  %v3599_v20 = vmul.f32 0.11128076, %v295_v29  ;;  %v319_v19 = vrot.slane %v3249_v1, 2  ;;  %v321_v43 = vrot.slane %v3254_v2, 2 }
  0x2e   :  { %6658 = vst [vmem:[#allocation42_spill] sm:$0xff] %v3591_v24  ;;  %6659 = vst [vmem:[#allocation43_spill] sm:$0xff] %v3593_v22  ;;  %v323_v12 = vrot.slane %v3259_v3, 2  ;;  %v324_v51 = vrot.slane %v3264_v4, 2  ;;  %v326_v18 = vrot.slane %v3269_v5, 2  ;;  %v328_v16 = vrot.slane %v3274_v6, 2 }
  0x2f   :  { %6660 = vst [vmem:[#allocation44_spill] sm:$0xff] %v3595_v23  ;;  %6661 = vst [vmem:[#allocation45_spill] sm:$0xff] %v3597_v40  ;;  %v329_v15 = vrot.slane %v3279_v7, 2  ;;  %v331_v14 = vrot.slane %v3284_v8, 2  ;;  %v333_v29 = vrot.slane %v3289_v9, 2  ;;  %v334_v46 = vrot.slane %v3294_v10, 2 }
  0x30   :  { %6662 = vst [vmem:[#allocation46_spill] sm:$0xff] %v3599_v20  ;;  %v336_v31 = vrot.slane %v3301_v13, 2  ;;  %v338_v25 = vrot.slane %v3351_v26, 2  ;;  %v339_v11 = vrot.slane %v3356_v27, 2  ;;  %v341_v63 = vrot.slane %v3361_v28, 2 }
  0x31   :  { %v343_v62 = vrot.slane %v3373_v33, 2  ;;  %v344_v60 = vrot.slane %v3378_v34, 2  ;;  %v346_v59 = vrot.slane %v3387_v39, 2  ;;  %v320_v58 = vsel %vm317_vm2, %v318_v21, %v319_v19 }
  0x32   :  { %v348_v56 = vrot.slane %v3396_v44, 2  ;;  %v349_v55 = vrot.slane %v3401_v45, 2  ;;  %v351_v54 = vrot.slane %v3410_v50, 2  ;;  %v322_v20 = vsel %vm317_vm2, %v319_v19, %v321_v43 }
  0x33   :  { %v325_v40 = vsel %vm317_vm2, %v323_v12, %v324_v51  ;;  %v327_v23 = vsel %vm317_vm2, %v324_v51, %v326_v18  ;;  %v330_v22 = vsel %vm317_vm2, %v328_v16, %v329_v15  ;;  %v332_v24 = vsel %vm317_vm2, %v329_v15, %v331_v14 }
  0x34   :  { %v335_v42 = vsel %vm317_vm2, %v333_v29, %v334_v46  ;;  %v337_v21 = vsel %vm317_vm2, %v334_v46, %v336_v31  ;;  %v340_v61 = vsel %vm317_vm2, %v338_v25, %v339_v11  ;;  %v342_v17 = vsel %vm317_vm2, %v339_v11, %v341_v63 }
  0x35   :  { %v345_v52 = vsel %vm317_vm2, %v343_v62, %v344_v60  ;;  %v347_v19 = vsel %vm317_vm2, %v344_v60, %v346_v59  ;;  %v374_v12 = vadd.f32 %v320_v58, %v3244_v0  ;;  %v350_v51 = vsel %vm317_vm2, %v348_v56, %v349_v55 }
  0x36   :  { %v352_v16 = vsel %vm317_vm2, %v349_v55, %v351_v54  ;;  %v375_v15 = vadd.f32 %v322_v20, %v3249_v1  ;;  %v376_v29 = vadd.f32 %v321_v43, %v3254_v2  ;;  %v377_v46 = vadd.f32 %v325_v40, %v3259_v3 }
  0x37   :  { %v378_v25 = vadd.f32 %v327_v23, %v3264_v4  ;;  %v379_v11 = vadd.f32 %v326_v18, %v3269_v5  ;;  %v380_v62 = vadd.f32 %v330_v22, %v3274_v6  ;;  %v381_v60 = vadd.f32 %v332_v24, %v3279_v7  ;;  %v3654_v22 = vld [vmem:[%s6523_s1] sm:$0xff] }
  0x38   :  { %v382_v58 = vadd.f32 %v331_v14, %v3284_v8  ;;  %v383_v56 = vadd.f32 %v335_v42, %v3289_v9  ;;  %v384_v55 = vadd.f32 %v337_v21, %v3294_v10  ;;  %v385_v20 = vadd.f32 %v336_v31, %v3301_v13  ;;  %6663 = vst [vmem:[#allocation47_spill] sm:$0xff] %v3654_v22  ;;  %v3664_v31 = vld [vmem:[%s6523_s1 + $0x8] sm:$0xff] }
  0x39   :  { %v386_v43 = vadd.f32 %v340_v61, %v3351_v26  ;;  %v387_v40 = vadd.f32 %v342_v17, %v3356_v27  ;;  %v388_v23 = vadd.f32 %v341_v63, %v3361_v28  ;;  %v389_v24 = vadd.f32 %v345_v52, %v3373_v33  ;;  %6665 = vst [vmem:[#allocation49_spill] sm:$0xff] %v3664_v31  ;;  %v3676_v52 = vld [vmem:[%s6523_s1 + $0x10] sm:$0x3f] }
  0x3a   :  { %v390_v18 = vadd.f32 %v347_v19, %v3378_v34  ;;  %v391_v42 = vadd.f32 %v346_v59, %v3387_v39  ;;  %v3659_v14 = vmul.f32 0.21674532, %v374_v12  ;;  %v392_v63 = vadd.f32 %v350_v51, %v3396_v44  ;;  %6667 = vst [vmem:[#allocation51_spill] sm:$0xff] %v3676_v52 }
  0x3b   :  { %v3667_v17 = vmul.f32 0.21674532, %v375_v15  ;;  %v3669_v61 = vmul.f32 0.21674532, %v376_v29  ;;  %v3671_v21 = vmul.f32 0.21674532, %v377_v46  ;;  %v393_v59 = vadd.f32 %v352_v16, %v3401_v45 }
  0x3c   :  { %6664 = vst [vmem:[#allocation48_spill] sm:$0xff] %v3659_v14  ;;  %v3679_v19 = vmul.f32 0.21674532, %v378_v25  ;;  %v3681_v12 = vmul.f32 0.21674532, %v379_v11  ;;  %v394_v51 = vadd.f32 %v351_v54, %v3410_v50  ;;  %v3699_v16 = vmul.f32 %v3410_v50, %v3410_v50 }
  0x3d   :  { %6666 = vst [vmem:[#allocation50_spill] sm:$0xff] %v3671_v21  ;;  %v3683_v14 = vmul.f32 0.21674532, %v380_v62  ;;  %v3686_v15 = vmul.f32 0.21674532, %v381_v60  ;;  %v3695_v21 = vld [vmem:[%s6523_s1 + $0x18] sm:$0xff]  ;;  %v3714_v60 = vmul.f32 %v3654_v22, %v3654_v22 }
  0x3e   :  { %v3688_v29 = vmul.f32 0.21674532, %v382_v58  ;;  %v3690_v46 = vmul.f32 0.21674532, %v383_v56  ;;  %6668 = vst [vmem:[#allocation52_spill] sm:$0xff] %v3695_v21  ;;  %6669 = vst [vmem:[#allocation53_spill] sm:$0xff] %v3699_v16 }
  0x3f   :  { %v3701_v25 = vmul.f32 0.21674532, %v384_v55  ;;  %v3703_v11 = vmul.f32 0.21674532, %v385_v20  ;;  %v3705_v54 = vmul.f32 0.21674532, %v386_v43  ;;  %v3729_v20 = vmul.f32 %v3664_v31, %v3664_v31 }
  0x40   :  { %v3710_v62 = vld [vmem:[%s6523_s1 + $0x20] sm:$0xff]  ;;  %6672 = vst [vmem:[#allocation56_spill] sm:$0xff] %v3714_v60  ;;  %v3716_v58 = vmul.f32 0.21674532, %v387_v40  ;;  %v3718_v56 = vmul.f32 0.21674532, %v388_v23  ;;  %v3739_v40 = vmul.f32 %v3676_v52, %v3676_v52 }
  0x41   :  { %6670 = vst [vmem:[#allocation54_spill] sm:$0xff] %v3705_v54  ;;  %6671 = vst [vmem:[#allocation55_spill] sm:$0xff] %v3710_v62  ;;  %v3720_v16 = vmul.f32 0.21674532, %v389_v24  ;;  %v3725_v55 = vld [vmem:[%s6523_s1 + $0x28] sm:$0x3f] }
  0x42   :  { %6673 = vst [vmem:[#allocation57_spill] sm:$0xff] %v3716_v58  ;;  %6674 = vst [vmem:[#allocation58_spill] sm:$0xff] %v3718_v56  ;;  %v3731_v43 = vmul.f32 0.21674532, %v390_v18  ;;  %v3733_v54 = vmul.f32 0.21674532, %v391_v42  ;;  %v3755_v42 = vmul.f32 %v3654_v22, %v3244_v0 }
  0x43   :  { %6675 = vst [vmem:[#allocation59_spill] sm:$0xff] %v3725_v55  ;;  %6676 = vst [vmem:[#allocation60_spill] sm:$0xff] %v3729_v20  ;;  %v3735_v60 = vmul.f32 0.21674532, %v392_v63  ;;  %v3741_v23 = vmul.f32 0.21674532, %v393_v59 }
  0x44   :  { %6677 = vst [vmem:[#allocation61_spill] sm:$0xff] %v3733_v54  ;;  %6679 = vst [vmem:[#allocation63_spill] sm:$0xff] %v3739_v40  ;;  %v3743_v24 = vmul.f32 0.21674532, %v394_v51  ;;  %v3746_v56 = vmul.f32 0.27068216, %v3244_v0  ;;  %v3768_v40 = vmul.f32 %v3695_v21, %v3695_v21 }
  0x45   :  { %6678 = vst [vmem:[#allocation62_spill] sm:$0xff] %v3735_v60  ;;  %6680 = vst [vmem:[#allocation64_spill] sm:$0xff] %v3741_v23  ;;  %v3751_v18 = vld [vmem:[%s6523_s1 + $0x30] sm:$0xff]  ;;  %v3758_v63 = vmul.f32 0.27068216, %v3249_v1  ;;  %v6691_v21 = vld [vmem:[#allocation39_spill] sm:$0xff] }
  0x46   :  { %6681 = vst [vmem:[#allocation65_spill] sm:$0xff] %v3743_v24  ;;  %6682 = vst [vmem:[#allocation66_spill] sm:$0xff] %v3751_v18  ;;  %v3761_v59 = vmul.f32 0.27068216, %v3254_v2  ;;  %v3764_v51 = vmul.f32 0.27068216, %v3259_v3 }
  0x47   :  { %6683 = vst [vmem:[#allocation67_spill] sm:$0xff] %v3755_v42  ;;  %6684 = vst [vmem:[#allocation68_spill] sm:$0xff] %v3768_v40  ;;  %v3771_v20 = vmul.f32 0.27068216, %v3264_v4  ;;  %v3774_v52 = vmul.f32 0.27068216, %v3269_v5  ;;  %v3781_v42 = vmul.f32 %v3710_v62, %v3710_v62  ;;  %v3794_v4 = vmul.f32 %v3725_v55, %v3725_v55 }
  0x48   :  { %v3777_v0 = vmul.f32 0.27068216, %v3274_v6  ;;  %v3784_v22 = vmul.f32 0.27068216, %v3279_v7  ;;  %v3787_v3 = vmul.f32 0.27068216, %v3284_v8  ;;  %v3807_v8 = vmul.f32 %v3664_v31, %v3249_v1 }
  0x49   :  { %6685 = vst [vmem:[#allocation69_spill] sm:$0xff] %v3781_v42  ;;  %v3790_v40 = vmul.f32 0.27068216, %v3289_v9  ;;  %6686 = vst [vmem:[#allocation70_spill] sm:$0xff] %v3794_v4  ;;  %v3797_v5 = vmul.f32 0.27068216, %v3294_v10  ;;  %v3820_v10 = vmul.f32 %v3751_v18, %v3751_v18 }
  0x4a   :  { %v3800_v6 = vmul.f32 0.27068216, %v3301_v13  ;;  %v3803_v7 = vmul.f32 0.27068216, %v3351_v26  ;;  %6687 = vst [vmem:[#allocation71_spill] sm:$0xff] %v3807_v8  ;;  %v460_v8 = vrot.slane %v3547_v48, 1 }
  0x4b   :  { %v3810_v9 = vmul.f32 0.27068216, %v3356_v27  ;;  %v3813_v42 = vmul.f32 0.27068216, %v3361_v28  ;;  %v3816_v4 = vmul.f32 0.27068216, %v3373_v33 }
  0x4c   :  { %6688 = vst [vmem:[#allocation72_spill] sm:$0xff] %v3820_v10  ;;  %v3823_v13 = vmul.f32 0.27068216, %v3378_v34  ;;  %v3826_v26 = vmul.f32 0.27068216, %v3387_v39  ;;  %v459_v33 = vrot.slane %v3544_v32, 1 }
  0x4d   :  { %v3829_v1 = vmul.f32 0.27068216, %v3396_v44  ;;  %v3832_v27 = vmul.f32 0.27068216, %v3401_v45  ;;  %v3835_v28 = vmul.f32 0.27068216, %v3410_v50 }
  0x4e   :  { %v462_v10 = vrot.slane %v3549_v37, 1  ;;  %v464_v34 = vrot.slane %v3551_v53, 1  ;;  %v465_v39 = vrot.slane %v3554_v57, 1  ;;  %v467_v18 = vrot.slane %v3556_v36, 1  ;;  %v6689_v62 = vld [vmem:[#allocation36_spill] sm:$0xff]  ;;  %v6690_v31 = vld [vmem:[#allocation38_spill] sm:$0xff] }
  0x4f   :  { %v469_v44 = vrot.slane %v3558_v38, 1  ;;  %v470_v45 = vrot.slane %v3561_v41, 1  ;;  %v472_v55 = vrot.slane %v3563_v30, 1  ;;  %v474_v50 = vrot.slane %v3565_v35, 1  ;;  %v6692_v2 = vld [vmem:[#allocation40_spill] sm:$0xff]  ;;  %v6693_v24 = vld [vmem:[#allocation42_spill] sm:$0xff] }
  0x50   :  { %v475_v32 = vrot.slane %v3571_v47, 1  ;;  %v477_v48 = vrot.slane %v3573_v49, 1  ;;  %v479_v37 = vrot.slane %v6689_v62, 1  ;;  %v480_v53 = vrot.slane %v6690_v31, 1  ;;  %v6694_v23 = vld [vmem:[#allocation43_spill] sm:$0xff]  ;;  %v6695_v60 = vld [vmem:[#allocation44_spill] sm:$0xff] }
  0x51   :  { %v482_v57 = vrot.slane %v6691_v21, 1  ;;  %v484_v36 = vrot.slane %v6692_v2, 1  ;;  %v485_v38 = vrot.slane %v6693_v24, 1  ;;  %v487_v41 = vrot.slane %v6694_v23, 1  ;;  %v6696_v54 = vld [vmem:[#allocation45_spill] sm:$0xff]  ;;  %v6697_v58 = vld [vmem:[#allocation46_spill] sm:$0xff] }
  0x52   :  { %v461_v30 = vsel %vm458_vm3, %v459_v33, %v460_v8  ;;  %v489_v35 = vrot.slane %v6695_v60, 1  ;;  %v490_v47 = vrot.slane %v6696_v54, 1  ;;  %v492_v49 = vrot.slane %v6697_v58, 1 }
  0x53   :  { %v463_v62 = vsel %vm458_vm3, %v460_v8, %v462_v10  ;;  %v466_v31 = vsel %vm458_vm3, %v464_v34, %v465_v39  ;;  %v468_v21 = vsel %vm458_vm3, %v465_v39, %v467_v18  ;;  %v471_v2 = vsel %vm458_vm3, %v469_v44, %v470_v45  ;;  %v6698_v10 = vld [vmem:[#allocation18_spill] sm:$0xff] }
  0x54   :  { %v473_v24 = vsel %vm458_vm3, %v470_v45, %v472_v55  ;;  %v476_v23 = vsel %vm458_vm3, %v474_v50, %v475_v32  ;;  %v478_v33 = vsel %vm458_vm3, %v475_v32, %v477_v48  ;;  %v481_v60 = vsel %vm458_vm3, %v479_v37, %v480_v53  ;;  %v6699_v55 = vld [vmem:[#allocation19_spill] sm:$0xff]  ;;  %v6700_v45 = vld [vmem:[#allocation20_spill] sm:$0xff]  ;;  %v6701_v32 = vld [vmem:[#allocation22_spill] sm:$0xff] }
  0x55   :  { %v483_v54 = vsel %vm458_vm3, %v480_v53, %v482_v57  ;;  %v486_v58 = vsel %vm458_vm3, %v484_v36, %v485_v38  ;;  %v488_v8 = vsel %vm458_vm3, %v485_v38, %v487_v41  ;;  %v3871_v34 = vadd.f32 %v461_v30, %v6698_v10  ;;  %v6702_v37 = vld [vmem:[#allocation23_spill] sm:$0xff]  ;;  %v6703_v57 = vld [vmem:[#allocation24_spill] sm:$0xff]  ;;  %v6704_v38 = vld [vmem:[#allocation26_spill] sm:$0xff] }
  0x56   :  { %v491_v18 = vsel %vm458_vm3, %v489_v35, %v490_v47  ;;  %v3875_v39 = vsel %vm458_vm3, %v490_v47, %v492_v49  ;;  %v3878_v44 = vadd.f32 %v463_v62, %v6699_v55  ;;  %v3881_v50 = vadd.f32 %v466_v31, %v6700_v45  ;;  %v6705_v30 = vld [vmem:[#allocation27_spill] sm:$0xff]  ;;  %v6706_v47 = vld [vmem:[#allocation28_spill] sm:$0xff]  ;;  %v6707_v62 = vld [vmem:[#allocation30_spill] sm:$0xff] }
  0x57   :  { %v3884_v48 = vadd.f32 %v468_v21, %v6701_v32  ;;  %v3887_v53 = vadd.f32 %v471_v2, %v6702_v37  ;;  %v3890_v36 = vadd.f32 %v473_v24, %v6703_v57  ;;  %v3893_v41 = vadd.f32 %v476_v23, %v6704_v38  ;;  %v6708_v21 = vld [vmem:[#allocation31_spill] sm:$0xff]  ;;  %v6709_v2 = vld [vmem:[#allocation32_spill] sm:$0xff]  ;;  %v6710_v24 = vld [vmem:[#allocation33_spill] sm:$0xff] }
  0x58   :  { %v3896_v35 = vadd.f32 %v478_v33, %v6705_v30  ;;  %v3899_v49 = vadd.f32 %v481_v60, %v6706_v47  ;;  %v3902_v31 = vadd.f32 %v483_v54, %v6707_v62  ;;  %v3905_v10 = vadd.f32 %v486_v58, %v6708_v21  ;;  %v6711_v47 = vld [vmem:[#allocation48_spill] sm:$0xff] }
  0x59   :  { %v3908_v55 = vadd.f32 %v488_v8, %v6709_v2  ;;  %v3911_v45 = vadd.f32 %v491_v18, %v6710_v24  ;;  %v543_v23 = vrot.slane %v3746_v56, 1  ;;  %v544_v33 = vrot.slane %v3758_v63, 1 }
  0x5a   :  { %v546_v32 = vrot.slane %v3761_v59, 1  ;;  %v548_v60 = vrot.slane %v3764_v51, 1  ;;  %v549_v54 = vrot.slane %v3771_v20, 1  ;;  %v551_v37 = vrot.slane %v3774_v52, 1 }
  0x5b   :  { %v553_v58 = vrot.slane %v3777_v0, 1  ;;  %v554_v8 = vrot.slane %v3784_v22, 1  ;;  %v556_v57 = vrot.slane %v3787_v3, 1  ;;  %v558_v18 = vrot.slane %v3790_v40, 1 }
  0x5c   :  { %v559_v56 = vrot.slane %v3797_v5, 1  ;;  %v561_v63 = vrot.slane %v3800_v6, 1  ;;  %v563_v59 = vrot.slane %v3803_v7, 1  ;;  %v564_v51 = vrot.slane %v3810_v9, 1 }
  0x5d   :  { %v566_v20 = vrot.slane %v3813_v42, 1  ;;  %v568_v52 = vrot.slane %v3816_v4, 1  ;;  %v569_v0 = vrot.slane %v3823_v13, 1  ;;  %v571_v22 = vrot.slane %v3826_v26, 1 }
  0x5e   :  { %v545_v3 = vsel %vm458_vm3, %v543_v23, %v544_v33  ;;  %v573_v40 = vrot.slane %v3829_v1, 1  ;;  %v574_v5 = vrot.slane %v3832_v27, 1  ;;  %v576_v6 = vrot.slane %v3835_v28, 1 }
  0x5f   :  { %v547_v7 = vsel %vm458_vm3, %v544_v33, %v546_v32  ;;  %v550_v9 = vsel %vm458_vm3, %v548_v60, %v549_v54  ;;  %v552_v42 = vsel %vm458_vm3, %v549_v54, %v551_v37  ;;  %v555_v4 = vsel %vm458_vm3, %v553_v58, %v554_v8  ;;  %v6712_v33 = vld [vmem:[#allocation50_spill] sm:$0xff] }
  0x60   :  { %v557_v13 = vsel %vm458_vm3, %v554_v8, %v556_v57  ;;  %v560_v26 = vsel %vm458_vm3, %v558_v18, %v559_v56  ;;  %v562_v38 = vsel %vm458_vm3, %v559_v56, %v561_v63  ;;  %v565_v1 = vsel %vm458_vm3, %v563_v59, %v564_v51 }
  0x61   :  { %v567_v27 = vsel %vm458_vm3, %v564_v51, %v566_v20  ;;  %v570_v28 = vsel %vm458_vm3, %v568_v52, %v569_v0  ;;  %v572_v30 = vsel %vm458_vm3, %v569_v0, %v571_v22  ;;  %v599_v62 = vadd.f32 %v545_v3, %v6711_v47  ;;  %v6713_v52 = vld [vmem:[#allocation54_spill] sm:$0xff]  ;;  %v6714_v0 = vld [vmem:[#allocation57_spill] sm:$0xff] }
  0x62   :  { %v575_v21 = vsel %vm458_vm3, %v573_v40, %v574_v5  ;;  %v577_v2 = vsel %vm458_vm3, %v574_v5, %v576_v6  ;;  %v600_v24 = vadd.f32 %v547_v7, %v3667_v17  ;;  %v601_v23 = vadd.f32 %v546_v32, %v3669_v61  ;;  %v6716_v3 = vld [vmem:[#allocation61_spill] sm:$0xff]  ;;  %v6717_v40 = vld [vmem:[#allocation62_spill] sm:$0xff] }
  0x63   :  { %v602_v60 = vadd.f32 %v550_v9, %v6712_v33  ;;  %v603_v54 = vadd.f32 %v552_v42, %v3679_v19  ;;  %v604_v58 = vadd.f32 %v551_v37, %v3681_v12  ;;  %v605_v8 = vadd.f32 %v555_v4, %v3683_v14  ;;  %v6715_v37 = vld [vmem:[#allocation58_spill] sm:$0xff]  ;;  %v6719_v5 = vld [vmem:[#allocation65_spill] sm:$0xff] }
  0x64   :  { %v606_v18 = vadd.f32 %v557_v13, %v3686_v15  ;;  %v607_v56 = vadd.f32 %v556_v57, %v3688_v29  ;;  %v608_v59 = vadd.f32 %v560_v26, %v3690_v46  ;;  %v609_v51 = vadd.f32 %v562_v38, %v3701_v25  ;;  %v6718_v57 = vld [vmem:[#allocation64_spill] sm:$0xff] }
  0x65   :  { %v610_v17 = vadd.f32 %v561_v63, %v3703_v11  ;;  %v611_v61 = vadd.f32 %v565_v1, %v6713_v52  ;;  %v614_v32 = vadd.f32 %v570_v28, %v3720_v16  ;;  %v615_v19 = vadd.f32 %v572_v30, %v3731_v43 }
  0x66   :  { %v612_v12 = vadd.f32 %v567_v27, %v6714_v0  ;;  %v613_v14 = vadd.f32 %v566_v20, %v6715_v37  ;;  %v616_v15 = vadd.f32 %v571_v22, %v6716_v3  ;;  %v617_v29 = vadd.f32 %v575_v21, %v6717_v40  ;;  %v6720_v21 = vld [vmem:[#allocation34_spill] sm:$0xff]  ;;  %v4004_v40 = vld [vmem:[%s6523_s1 + $0x48] sm:$0xff] }
  0x67   :  { %v618_v46 = vadd.f32 %v577_v2, %v6718_v57  ;;  %v619_v25 = vadd.f32 %v576_v6, %v6719_v5  ;;  %v641_v7 = vrot.slane %v599_v62, 2  ;;  %v642_v11 = vrot.slane %v600_v24, 2  ;;  %v4027_v57 = vld [vmem:[%s6523_s1 + $0x58] sm:$0x3f]  ;;  %v4037_v5 = vld [vmem:[%s6523_s1 + $0x68] sm:$0xff] }
  0x68   :  { %v644_v63 = vrot.slane %v601_v23, 2  ;;  %v646_v9 = vrot.slane %v602_v60, 2  ;;  %v647_v42 = vrot.slane %v603_v54, 2  ;;  %v649_v16 = vrot.slane %v604_v58, 2 }
  0x69   :  { %v651_v4 = vrot.slane %v605_v8, 2  ;;  %v652_v43 = vrot.slane %v606_v18, 2  ;;  %v666_v13 = vrot.slane %v614_v32, 2  ;;  %v667_v26 = vrot.slane %v615_v19, 2 }
  0x6a   :  { %v654_v38 = vrot.slane %v607_v56, 2  ;;  %v661_v20 = vrot.slane %v611_v61, 2  ;;  %v662_v1 = vrot.slane %v612_v12, 2  ;;  %v669_v22 = vrot.slane %v616_v15, 2 }
  0x6b   :  { %v656_v27 = vrot.slane %v608_v59, 2  ;;  %v657_v28 = vrot.slane %v609_v51, 2  ;;  %v659_v30 = vrot.slane %v610_v17, 2  ;;  %v664_v47 = vrot.slane %v613_v14, 2  ;;  %v3987_v59 = vld [vmem:[%s6523_s1 + $0x40] sm:$0x3f] }
  0x6c   :  { %v521_v6 = vadd.f32 %v3875_v39, %v6720_v21  ;;  %v671_v62 = vrot.slane %v617_v29, 2  ;;  %v672_v2 = vrot.slane %v618_v46, 2  ;;  %v674_v24 = vrot.slane %v619_v25, 2  ;;  %v3982_v39 = vld [vmem:[%s6523_s1 + $0x38] sm:$0xff]  ;;  %v4009_v29 = vld [vmem:[%s6523_s1 + $0x50] sm:$0xff]  ;;  %v4032_v46 = vld [vmem:[%s6523_s1 + $0x60] sm:$0xff] }
  0x6d   :  { %v643_v23 = vsel %vm317_vm2, %v641_v7, %v642_v11  ;;  %v645_v33 = vsel %vm317_vm2, %v642_v11, %v644_v63  ;;  %v648_v60 = vsel %vm317_vm2, %v646_v9, %v647_v42  ;;  %v668_v54 = vsel %vm317_vm2, %v666_v13, %v667_v26  ;;  %v4046_v63 = vld [vmem:[%s6523_s1 + $0x70] sm:$0x3f]  ;;  %v6731_v13 = vld [vmem:[#allocation3_spill] sm:$0xff] }
  0x6e   :  { %v650_v58 = vsel %vm317_vm2, %v647_v42, %v649_v16  ;;  %v653_v8 = vsel %vm317_vm2, %v651_v4, %v652_v43  ;;  %v663_v18 = vsel %vm317_vm2, %v661_v20, %v662_v1  ;;  %v670_v56 = vsel %vm317_vm2, %v667_v26, %v669_v22  ;;  %v6732_v26 = vld [vmem:[#allocation52_spill] sm:$0xff]  ;;  %v6738_v21 = vld [vmem:[#allocation47_spill] sm:$0xff] }
  0x6f   :  { %v655_v51 = vsel %vm317_vm2, %v652_v43, %v654_v38  ;;  %v658_v17 = vsel %vm317_vm2, %v656_v27, %v657_v28  ;;  %v660_v52 = vsel %vm317_vm2, %v657_v28, %v659_v30  ;;  %v665_v61 = vsel %vm317_vm2, %v662_v1, %v664_v47 }
  0x70   :  { %v673_v32 = vsel %vm317_vm2, %v671_v62, %v672_v2  ;;  %v675_v19 = vsel %vm317_vm2, %v672_v2, %v674_v24  ;;  %v692_v0 = vadd.f32 %v648_v60, %v3881_v50  ;;  %v700_v12 = vadd.f32 %v668_v54, %v3905_v10  ;;  %v6741_v24 = vld [vmem:[#allocation49_spill] sm:$0xff] }
  0x71   :  { %v693_v37 = vadd.f32 %v650_v58, %v3884_v48  ;;  %v694_v14 = vadd.f32 %v653_v8, %v3887_v53  ;;  %v698_v3 = vadd.f32 %v663_v18, %v3899_v49  ;;  %v701_v15 = vadd.f32 %v670_v56, %v3908_v55  ;;  %v6723_v53 = vld [vmem:[#allocation2_spill] sm:$0xff]  ;;  %v6724_v49 = vld [vmem:[#allocation51_spill] sm:$0xff]  ;;  %v4094_v60 = vld [vmem:[%s6523_s1 + $0x78] sm:$0xff] }
  0x72   :  { %v4013_v50 = vmul.f32 %v3982_v39, %v3982_v39  ;;  %v4017_v48 = vmul.f32 %v3987_v59, %v3987_v59  ;;  %v4021_v10 = vmul.f32 %v6724_v49, %v6723_v53  ;;  %v690_v55 = vadd.f32 %v643_v23, %v3871_v34  ;;  %v6742_v58 = vld [vmem:[#allocation55_spill] sm:$0xff] }
  0x73   :  { %v695_v25 = vadd.f32 %v655_v51, %v3890_v36  ;;  %v696_v7 = vadd.f32 %v658_v17, %v3893_v41  ;;  %v697_v34 = vadd.f32 %v660_v52, %v3896_v35  ;;  %v699_v11 = vadd.f32 %v665_v61, %v3902_v31  ;;  %v6743_v18 = vld [vmem:[#allocation59_spill] sm:$0xff]  ;;  %v6744_v51 = vld [vmem:[#allocation66_spill] sm:$0xff] }
  0x74   :  { %6721 = vst [vmem:[#allocation36_spill] sm:$0xff] %v4013_v50  ;;  %6722 = vst [vmem:[#allocation38_spill] sm:$0xff] %v4017_v48  ;;  %v691_v9 = vadd.f32 %v645_v33, %v3878_v44  ;;  %v702_v42 = vadd.f32 %v673_v32, %v3911_v45  ;;  %v703_v16 = vadd.f32 %v675_v19, %v521_v6  ;;  %v745_v6 = vrot.slane %v6738_v21, 6  ;;  %v4103_v52 = vld [vmem:[%s6523_s1 + $0x88] sm:$0x3f] }
  0x75   :  { %6725 = vst [vmem:[#allocation39_spill] sm:$0xff] %v4021_v10  ;;  %v708_v4 = vadd.f32 %v700_v12, %v692_v0  ;;  %v4052_v36 = vmul.f32 %v4004_v40, %v4004_v40  ;;  %v4056_v41 = vmul.f32 %v4009_v29, %v4009_v29  ;;  %v709_v35 = vadd.f32 %v701_v15, %v693_v37  ;;  %v4112_v12 = vld [vmem:[%s6523_s1 + $0x80] sm:$0xff]  ;;  %v4117_v37 = vld [vmem:[%s6523_s1 + $0x90] sm:$0xff] }
  0x76   :  { %v712_v31 = vadd.f32 %v698_v3, %v694_v14  ;;  %v4060_v43 = vmul.f32 %v4027_v57, %v4027_v57  ;;  %v4064_v44 = vmul.f32 %v4032_v46, %v4032_v46  ;;  %v4068_v45 = vmul.f32 %v4037_v5, %v4037_v5 }
  0x77   :  { %6726 = vst [vmem:[#allocation40_spill] sm:$0xff] %v4052_v36  ;;  %6727 = vst [vmem:[#allocation42_spill] sm:$0xff] %v4056_v41  ;;  %v4072_v38 = vmul.f32 %v6732_v26, %v6731_v13  ;;  %v4076_v20 = vmul.f32 %v4046_v63, %v4046_v63  ;;  %v713_v1 = vadd.f32 %v699_v11, %v695_v25  ;;  %v4078_v22 = vmul.f32 0.27068216, %v696_v7 }
  0x78   :  { %6728 = vst [vmem:[#allocation43_spill] sm:$0xff] %v4060_v43  ;;  %6729 = vst [vmem:[#allocation44_spill] sm:$0xff] %v4064_v44  ;;  %v4080_v27 = vmul.f32 0.27068216, %v697_v34  ;;  %v704_v28 = vadd.f32 %v702_v42, %v690_v55  ;;  %v705_v30 = vadd.f32 %v703_v16, %v691_v9  ;;  %v4082_v47 = vmul.f32 0.11128076, %v708_v4 }
  0x79   :  { %6730 = vst [vmem:[#allocation45_spill] sm:$0xff] %v4068_v45  ;;  %6733 = vst [vmem:[#allocation46_spill] sm:$0xff] %v4072_v38  ;;  %v4085_v62 = vmul.f32 0.11128076, %v709_v35  ;;  %v4087_v2 = vmul.f32 0.21674532, %v712_v31 }
  0x7a   :  { %6734 = vst [vmem:[#allocation18_spill] sm:$0xff] %v4076_v20  ;;  %6735 = vst [vmem:[#allocation19_spill] sm:$0xff] %v4078_v22  ;;  %v746_v23 = vrot.slane %v6741_v24, 6  ;;  %v748_v33 = vrot.slane %v6724_v49, 6  ;;  %v750_v54 = vrot.slane %v6732_v26, 6  ;;  %v751_v8 = vrot.slane %v6742_v58, 6 }
  0x7b   :  { %6736 = vst [vmem:[#allocation20_spill] sm:$0xff] %v4080_v27  ;;  %6737 = vst [vmem:[#allocation22_spill] sm:$0xff] %v4082_v47  ;;  %v753_v56 = vrot.slane %v6743_v18, 6  ;;  %v755_v17 = vrot.slane %v6744_v51, 6  ;;  %v756_v61 = vrot.slane %v3982_v39, 6  ;;  %v758_v32 = vrot.slane %v3987_v59, 6 }
  0x7c   :  { %6739 = vst [vmem:[#allocation23_spill] sm:$0xff] %v4085_v62  ;;  %6740 = vst [vmem:[#allocation24_spill] sm:$0xff] %v4087_v2  ;;  %v760_v19 = vrot.slane %v4004_v40, 6  ;;  %v761_v0 = vrot.slane %v4009_v29, 6  ;;  %v763_v14 = vrot.slane %v4027_v57, 6  ;;  %v765_v3 = vrot.slane %v4032_v46, 6 }
  0x7d   :  { %v766_v15 = vrot.slane %v4037_v5, 6  ;;  %v768_v53 = vrot.slane %v4046_v63, 6  ;;  %v4126_v55 = vld [vmem:[%s6523_s1 + $0x98] sm:$0xff]  ;;  %v4128_v25 = vmul.f32 0.036632847, %v704_v28  ;;  %v770_v7 = vrot.slane %v4094_v60, 6 }
  0x7e   :  { %v771_v34 = vrot.slane %v4112_v12, 6  ;;  %v773_v11 = vrot.slane %v4103_v52, 6  ;;  %v747_v9 = vsel %vm140_vm0, %v745_v6, %v746_v23  ;;  %v749_v42 = vsel %vm140_vm0, %v746_v23, %v748_v33  ;;  %v4144_v38 = vld [vmem:[%s6523_s1 + $0xa0] sm:$0x3f] }
  0x7f   :  { %6745 = vst [vmem:[#allocation26_spill] sm:$0xff] %v4128_v25  ;;  %v775_v16 = vrot.slane %v4117_v37, 6  ;;  %v776_v4 = vrot.slane %v4126_v55, 6  ;;  %v752_v35 = vsel %vm140_vm0, %v750_v54, %v751_v8  ;;  %v754_v31 = vsel %vm140_vm0, %v751_v8, %v753_v56 }
  0x80   :  { %v757_v13 = vsel %vm140_vm0, %v755_v17, %v756_v61  ;;  %v759_v28 = vsel %vm140_vm0, %v756_v61, %v758_v32  ;;  %v762_v6 = vsel %vm140_vm0, %v760_v19, %v761_v0  ;;  %v764_v23 = vsel %vm140_vm0, %v761_v0, %v763_v14 }
  0x81   :  { %v767_v33 = vsel %vm140_vm0, %v765_v3, %v766_v15  ;;  %v769_v10 = vsel %vm140_vm0, %v766_v15, %v768_v53  ;;  %v772_v54 = vsel %vm140_vm0, %v770_v7, %v771_v34  ;;  %v774_v8 = vsel %vm140_vm0, %v771_v34, %v773_v11 }
  0x82   :  { %v778_v56 = vrot.slane %v4144_v38, 6  ;;  %v794_v17 = vadd.f32 %v747_v9, %v6738_v21  ;;  %v777_v61 = vsel %vm140_vm0, %v775_v16, %v776_v4  ;;  %v795_v32 = vadd.f32 %v749_v42, %v6741_v24 }
  0x83   :  { %v796_v19 = vadd.f32 %v752_v35, %v6732_v26  ;;  %v797_v0 = vadd.f32 %v754_v31, %v6742_v58  ;;  %v4158_v14 = vmul.f32 0.036632847, %v705_v30  ;;  %v798_v3 = vadd.f32 %v757_v13, %v6744_v51 }
  0x84   :  { %v799_v15 = vadd.f32 %v759_v28, %v3982_v39  ;;  %v800_v53 = vadd.f32 %v762_v6, %v4004_v40  ;;  %v4163_v7 = vmul.f32 0.21674532, %v713_v1  ;;  %v801_v34 = vadd.f32 %v764_v23, %v4009_v29 }
  0x85   :  { %6746 = vst [vmem:[#allocation27_spill] sm:$0xff] %v4158_v14  ;;  %v802_v11 = vadd.f32 %v767_v33, %v4032_v46  ;;  %v803_v9 = vadd.f32 %v769_v10, %v4037_v5  ;;  %v804_v42 = vadd.f32 %v772_v54, %v4094_v60  ;;  %v805_v16 = vadd.f32 %v774_v8, %v4112_v12  ;;  %v3196_v10 = vld [vmem:[%s6522_s0 + $0x20] sm:$0xff] }
  0x86   :  { %6747 = vst [vmem:[#allocation28_spill] sm:$0xff] %v4163_v7  ;;  %v806_v30 = vadd.f32 %v777_v61, %v4117_v37  ;;  %v4171_v35 = vmul.f32 0.036632847, %v794_v17  ;;  %v779_v31 = vsel %vm140_vm0, %v776_v4, %v778_v56  ;;  %v4174_v13 = vmul.f32 0.036632847, %v795_v32 }
  0x87   :  { %v4176_v1 = vmul.f32 0.036632847, %v796_v19  ;;  %v4178_v28 = vmul.f32 0.036632847, %v797_v0  ;;  %v4184_v6 = vmul.f32 %v3196_v10, %v6742_v58  ;;  %v4186_v23 = vmul.f32 0.036632847, %v798_v3 }
  0x88   :  { %6748 = vst [vmem:[#allocation30_spill] sm:$0xff] %v4171_v35  ;;  %6749 = vst [vmem:[#allocation31_spill] sm:$0xff] %v4174_v13  ;;  %v4188_v33 = vmul.f32 0.036632847, %v799_v15  ;;  %v4190_v54 = vmul.f32 0.036632847, %v800_v53  ;;  %v4194_v4 = vmul.f32 %v4094_v60, %v4094_v60  ;;  %v807_v61 = vadd.f32 %v779_v31, %v4126_v55 }
  0x89   :  { %6750 = vst [vmem:[#allocation32_spill] sm:$0xff] %v4176_v1  ;;  %6751 = vst [vmem:[#allocation33_spill] sm:$0xff] %v4178_v28  ;;  %v4196_v8 = vmul.f32 0.036632847, %v801_v34  ;;  %v4198_v56 = vmul.f32 0.036632847, %v802_v11 }
  0x8a   :  { %6752 = vst [vmem:[#allocation48_spill] sm:$0xff] %v4184_v6  ;;  %6753 = vst [vmem:[#allocation50_spill] sm:$0xff] %v4186_v23  ;;  %v4200_v17 = vmul.f32 0.036632847, %v803_v9  ;;  %v4203_v32 = vmul.f32 0.036632847, %v804_v42 }
  0x8b   :  { %6754 = vst [vmem:[#allocation54_spill] sm:$0xff] %v4188_v33  ;;  %6755 = vst [vmem:[#allocation57_spill] sm:$0xff] %v4190_v54  ;;  %v4205_v19 = vmul.f32 0.036632847, %v805_v16  ;;  %v4207_v0 = vmul.f32 0.036632847, %v806_v30 }
  0x8c   :  { %6756 = vst [vmem:[#allocation58_spill] sm:$0xff] %v4194_v4  ;;  %6757 = vst [vmem:[#allocation61_spill] sm:$0xff] %v4196_v8  ;;  %v822_v3 = vrot.slane %v6738_v21, 4  ;;  %v823_v15 = vrot.slane %v6741_v24, 4  ;;  %v825_v53 = vrot.slane %v6724_v49, 4  ;;  %v827_v34 = vrot.slane %v6732_v26, 4 }
  0x8d   :  { %6758 = vst [vmem:[#allocation62_spill] sm:$0xff] %v4198_v56  ;;  %6759 = vst [vmem:[#allocation64_spill] sm:$0xff] %v4200_v17  ;;  %v828_v11 = vrot.slane %v6742_v58, 4  ;;  %v830_v9 = vrot.slane %v6743_v18, 4  ;;  %v832_v31 = vrot.slane %v6744_v51, 4  ;;  %v833_v42 = vrot.slane %v3982_v39, 4 }
  0x8e   :  { %6760 = vst [vmem:[#allocation65_spill] sm:$0xff] %v4203_v32  ;;  %6761 = vst [vmem:[#allocation34_spill] sm:$0xff] %v4205_v19  ;;  %v835_v16 = vrot.slane %v3987_v59, 4  ;;  %v837_v30 = vrot.slane %v4004_v40, 4  ;;  %v838_v10 = vrot.slane %v4009_v29, 4  ;;  %v840_v6 = vrot.slane %v4027_v57, 4 }
  0x8f   :  { %6762 = vst [vmem:[#allocation2_spill] sm:$0xff] %v4207_v0  ;;  %v842_v27 = vrot.slane %v4032_v46, 4  ;;  %v843_v7 = vrot.slane %v4037_v5, 4  ;;  %v845_v62 = vrot.slane %v4046_v63, 4  ;;  %v847_v14 = vrot.slane %v4094_v60, 4 }
  0x90   :  { %v848_v47 = vrot.slane %v4112_v12, 4  ;;  %v850_v25 = vrot.slane %v4103_v52, 4  ;;  %v852_v22 = vrot.slane %v4117_v37, 4  ;;  %v853_v2 = vrot.slane %v4126_v55, 4 }
  0x91   :  { %v4229_v4 = vmul.f32 0.036632847, %v807_v61  ;;  %v824_v20 = vsel %vm218_vm1, %v822_v3, %v823_v15  ;;  %v826_v45 = vsel %vm218_vm1, %v823_v15, %v825_v53  ;;  %v855_v44 = vrot.slane %v4144_v38, 4 }
  0x92   :  { %v829_v43 = vsel %vm218_vm1, %v827_v34, %v828_v11  ;;  %v831_v41 = vsel %vm218_vm1, %v828_v11, %v830_v9  ;;  %v834_v36 = vsel %vm218_vm1, %v832_v31, %v833_v42  ;;  %v836_v48 = vsel %vm218_vm1, %v833_v42, %v835_v16 }
  0x93   :  { %6763 = vst [vmem:[#allocation51_spill] sm:$0xff] %v4229_v4  ;;  %v839_v50 = vsel %vm218_vm1, %v837_v30, %v838_v10  ;;  %v841_v0 = vsel %vm218_vm1, %v838_v10, %v840_v6  ;;  %v844_v61 = vsel %vm218_vm1, %v842_v27, %v843_v7  ;;  %v846_v3 = vsel %vm218_vm1, %v843_v7, %v845_v62 }
  0x94   :  { %v849_v15 = vsel %vm218_vm1, %v847_v14, %v848_v47  ;;  %v851_v4 = vsel %vm218_vm1, %v848_v47, %v850_v25  ;;  %v854_v34 = vsel %vm218_vm1, %v852_v22, %v853_v2  ;;  %v878_v11 = vadd.f32 %v824_v20, %v6738_v21 }
  0x95   :  { %v856_v31 = vsel %vm218_vm1, %v853_v2, %v855_v44  ;;  %v879_v42 = vadd.f32 %v826_v45, %v6741_v24  ;;  %v880_v30 = vadd.f32 %v825_v53, %v6724_v49  ;;  %v881_v10 = vadd.f32 %v829_v43, %v6732_v26 }
  0x96   :  { %v882_v27 = vadd.f32 %v831_v41, %v6742_v58  ;;  %v883_v7 = vadd.f32 %v830_v9, %v6743_v18  ;;  %v884_v14 = vadd.f32 %v834_v36, %v6744_v51  ;;  %v885_v47 = vadd.f32 %v836_v48, %v3982_v39 }
  0x97   :  { %v886_v22 = vadd.f32 %v835_v16, %v3987_v59  ;;  %v887_v20 = vadd.f32 %v839_v50, %v4004_v40  ;;  %v888_v2 = vadd.f32 %v841_v0, %v4009_v29  ;;  %v889_v45 = vadd.f32 %v840_v6, %v4027_v57 }
  0x98   :  { %v890_v53 = vadd.f32 %v844_v61, %v4032_v46  ;;  %v891_v43 = vadd.f32 %v846_v3, %v4037_v5  ;;  %v892_v41 = vadd.f32 %v845_v62, %v4046_v63  ;;  %v893_v9 = vadd.f32 %v849_v15, %v4094_v60 }
  0x99   :  { %v894_v36 = vadd.f32 %v851_v4, %v4112_v12  ;;  %v895_v48 = vadd.f32 %v850_v25, %v4103_v52  ;;  %v4264_v19 = vmul.f32 0.11128076, %v878_v11  ;;  %v4266_v16 = vmul.f32 0.11128076, %v879_v42 }
  0x9a   :  { %v896_v50 = vadd.f32 %v854_v34, %v4117_v37  ;;  %v4269_v0 = vmul.f32 0.11128076, %v880_v30  ;;  %v4271_v6 = vmul.f32 0.11128076, %v881_v10  ;;  %v4273_v61 = vmul.f32 0.11128076, %v882_v27 }
  0x9b   :  { %v897_v62 = vadd.f32 %v856_v31, %v4126_v55  ;;  %v4276_v3 = vmul.f32 0.11128076, %v883_v7  ;;  %v4278_v15 = vmul.f32 0.11128076, %v884_v14  ;;  %v4280_v4 = vmul.f32 0.11128076, %v885_v47 }
  0x9c   :  { %v898_v25 = vadd.f32 %v855_v44, %v4144_v38  ;;  %v4283_v11 = vmul.f32 0.11128076, %v886_v22  ;;  %v4285_v42 = vmul.f32 0.11128076, %v887_v20  ;;  %v4287_v34 = vmul.f32 0.11128076, %v888_v2 }
  0x9d   :  { %v4291_v30 = vmul.f32 %v4112_v12, %v4112_v12  ;;  %v4293_v10 = vmul.f32 0.11128076, %v889_v45  ;;  %v4295_v31 = vmul.f32 0.11128076, %v890_v53  ;;  %v4297_v27 = vmul.f32 0.11128076, %v891_v43 }
  0x9e   :  { %v4301_v7 = vmul.f32 %v4103_v52, %v4103_v52  ;;  %v4303_v44 = vmul.f32 0.11128076, %v892_v41  ;;  %v4305_v14 = vmul.f32 0.11128076, %v893_v9  ;;  %v4307_v47 = vmul.f32 0.11128076, %v894_v36 }
  0x9f   :  { %6764 = vst [vmem:[#allocation3_spill] sm:$0xff] %v4291_v30  ;;  %6765 = vst [vmem:[#allocation52_spill] sm:$0xff] %v4293_v10  ;;  %v3197_v22 = vld [vmem:[%s6522_s0 + $0x28] sm:$0x3f]  ;;  %v4315_v2 = vmul.f32 0.11128076, %v895_v48 }
  0xa0   :  { %6766 = vst [vmem:[#allocation47_spill] sm:$0xff] %v4295_v31  ;;  %6767 = vst [vmem:[#allocation49_spill] sm:$0xff] %v4297_v27  ;;  %v4313_v20 = vmul.f32 %v3197_v22, %v6743_v18  ;;  %v4317_v45 = vmul.f32 0.11128076, %v896_v50  ;;  %v4319_v53 = vmul.f32 0.11128076, %v897_v62 }
  0xa1   :  { %6768 = vst [vmem:[#allocation55_spill] sm:$0xff] %v4301_v7  ;;  %6769 = vst [vmem:[#allocation59_spill] sm:$0xff] %v4303_v44  ;;  %v4321_v43 = vmul.f32 0.11128076, %v898_v25  ;;  %v920_v41 = vrot.slane %v6738_v21, 2  ;;  %v921_v9 = vrot.slane %v6741_v24, 2 }
  0xa2   :  { %6770 = vst [vmem:[#allocation66_spill] sm:$0xff] %v4305_v14  ;;  %6771 = vst [vmem:[#allocation73_spill] sm:$0xff] %v4307_v47  ;;  %v923_v36 = vrot.slane %v6724_v49, 2  ;;  %v925_v7 = vrot.slane %v6732_v26, 2  ;;  %v926_v30 = vrot.slane %v6742_v58, 2  ;;  %v928_v22 = vrot.slane %v6743_v18, 2 }
  0xa3   :  { %6772 = vst [vmem:[#allocation74_spill] sm:$0xff] %v4313_v20  ;;  %6773 = vst [vmem:[#allocation75_spill] sm:$0xff] %v4315_v2  ;;  %v930_v48 = vrot.slane %v6744_v51, 2  ;;  %v931_v50 = vrot.slane %v3982_v39, 2  ;;  %v933_v62 = vrot.slane %v3987_v59, 2  ;;  %v935_v25 = vrot.slane %v4004_v40, 2 }
  0xa4   :  { %6774 = vst [vmem:[#allocation76_spill] sm:$0xff] %v4317_v45  ;;  %6775 = vst [vmem:[#allocation77_spill] sm:$0xff] %v4319_v53  ;;  %v936_v20 = vrot.slane %v4009_v29, 2  ;;  %v938_v32 = vrot.slane %v4027_v57, 2  ;;  %v940_v17 = vrot.slane %v4032_v46, 2  ;;  %v941_v56 = vrot.slane %v4037_v5, 2 }
  0xa5   :  { %6776 = vst [vmem:[#allocation78_spill] sm:$0xff] %v4321_v43  ;;  %v943_v8 = vrot.slane %v4046_v63, 2  ;;  %v922_v54 = vsel %vm317_vm2, %v920_v41, %v921_v9  ;;  %v945_v33 = vrot.slane %v4094_v60, 2  ;;  %v946_v23 = vrot.slane %v4112_v12, 2 }
  0xa6   :  { %v948_v28 = vrot.slane %v4103_v52, 2  ;;  %v924_v1 = vsel %vm317_vm2, %v921_v9, %v923_v36  ;;  %v950_v13 = vrot.slane %v4117_v37, 2  ;;  %v951_v35 = vrot.slane %v4126_v55, 2 }
  0xa7   :  { %v953_v43 = vrot.slane %v4144_v38, 2  ;;  %v927_v53 = vsel %vm317_vm2, %v925_v7, %v926_v30  ;;  %v929_v45 = vsel %vm317_vm2, %v926_v30, %v928_v22  ;;  %v932_v41 = vsel %vm317_vm2, %v930_v48, %v931_v50 }
  0xa8   :  { %v934_v2 = vsel %vm317_vm2, %v931_v50, %v933_v62  ;;  %v937_v47 = vsel %vm317_vm2, %v935_v25, %v936_v20  ;;  %v939_v14 = vsel %vm317_vm2, %v936_v20, %v938_v32  ;;  %v942_v9 = vsel %vm317_vm2, %v940_v17, %v941_v56 }
  0xa9   :  { %v944_v44 = vsel %vm317_vm2, %v941_v56, %v943_v8  ;;  %v947_v27 = vsel %vm317_vm2, %v945_v33, %v946_v23  ;;  %v949_v31 = vsel %vm317_vm2, %v946_v23, %v948_v28  ;;  %v976_v7 = vadd.f32 %v922_v54, %v6738_v21 }
  0xaa   :  { %v977_v30 = vadd.f32 %v924_v1, %v6741_v24  ;;  %v952_v48 = vsel %vm317_vm2, %v950_v13, %v951_v35  ;;  %v954_v50 = vsel %vm317_vm2, %v951_v35, %v953_v43  ;;  %v978_v25 = vadd.f32 %v923_v36, %v6724_v49 }
  0xab   :  { %v979_v20 = vadd.f32 %v927_v53, %v6732_v26  ;;  %v980_v17 = vadd.f32 %v929_v45, %v6742_v58  ;;  %v981_v56 = vadd.f32 %v928_v22, %v6743_v18  ;;  %v982_v33 = vadd.f32 %v932_v41, %v6744_v51 }
  0xac   :  { %v983_v23 = vadd.f32 %v934_v2, %v3982_v39  ;;  %v984_v54 = vadd.f32 %v933_v62, %v3987_v59  ;;  %v985_v1 = vadd.f32 %v937_v47, %v4004_v40  ;;  %v986_v13 = vadd.f32 %v939_v14, %v4009_v29 }
  0xad   :  { %v987_v35 = vadd.f32 %v938_v32, %v4027_v57  ;;  %v988_v36 = vadd.f32 %v942_v9, %v4032_v46  ;;  %v989_v53 = vadd.f32 %v944_v44, %v4037_v5  ;;  %v990_v45 = vadd.f32 %v943_v8, %v4046_v63 }
  0xae   :  { %v991_v22 = vadd.f32 %v947_v27, %v4094_v60  ;;  %v992_v41 = vadd.f32 %v949_v31, %v4112_v12  ;;  %v993_v2 = vadd.f32 %v948_v28, %v4103_v52  ;;  %v4376_v10 = vmul.f32 0.21674532, %v976_v7 }
  0xaf   :  { %v4378_v62 = vmul.f32 0.21674532, %v977_v30  ;;  %v994_v14 = vadd.f32 %v952_v48, %v4117_v37  ;;  %v4381_v47 = vmul.f32 0.21674532, %v978_v25  ;;  %v4383_v32 = vmul.f32 0.21674532, %v979_v20 }
  0xb0   :  { %v4385_v9 = vmul.f32 0.21674532, %v980_v17  ;;  %v995_v8 = vadd.f32 %v954_v50, %v4126_v55  ;;  %v4388_v44 = vmul.f32 0.21674532, %v981_v56  ;;  %v4390_v27 = vmul.f32 0.21674532, %v982_v33 }
  0xb1   :  { %v4392_v31 = vmul.f32 0.21674532, %v983_v23  ;;  %v996_v28 = vadd.f32 %v953_v43, %v4144_v38  ;;  %v4395_v7 = vmul.f32 0.21674532, %v984_v54  ;;  %v4397_v30 = vmul.f32 0.21674532, %v985_v1 }
  0xb2   :  { %v4399_v48 = vmul.f32 0.21674532, %v986_v13  ;;  %v4403_v25 = vmul.f32 %v4117_v37, %v4117_v37  ;;  %v4405_v20 = vmul.f32 0.21674532, %v987_v35  ;;  %v4407_v50 = vmul.f32 0.21674532, %v988_v36 }
  0xb3   :  { %v4409_v17 = vmul.f32 0.21674532, %v989_v53  ;;  %v4413_v56 = vmul.f32 %v4126_v55, %v4126_v55  ;;  %v4415_v43 = vmul.f32 0.21674532, %v990_v45  ;;  %v4417_v33 = vmul.f32 0.21674532, %v991_v22 }
  0xb4   :  { %6777 = vst [vmem:[#allocation79_spill] sm:$0xff] %v4403_v25  ;;  %6778 = vst [vmem:[#allocation80_spill] sm:$0xff] %v4407_v50  ;;  %v4419_v23 = vmul.f32 0.21674532, %v992_v41  ;;  %v4423_v54 = vmul.f32 %v4144_v38, %v4144_v38  ;;  %v4425_v1 = vmul.f32 0.21674532, %v993_v2 }
  0xb5   :  { %6779 = vst [vmem:[#allocation81_spill] sm:$0xff] %v4409_v17  ;;  %6780 = vst [vmem:[#allocation82_spill] sm:$0xff] %v4413_v56  ;;  %v4427_v13 = vmul.f32 0.21674532, %v994_v14  ;;  %v4429_v35 = vmul.f32 0.21674532, %v995_v8 }
  0xb6   :  { %6781 = vst [vmem:[#allocation83_spill] sm:$0xff] %v4415_v43  ;;  %6782 = vst [vmem:[#allocation84_spill] sm:$0xff] %v4417_v33  ;;  %v3198_v36 = vld [vmem:[%s6522_s0 + $0x30] sm:$0xff]  ;;  %v4437_v45 = vmul.f32 0.21674532, %v996_v28  ;;  %v3199_v2 = vld [vmem:[%s6522_s0 + $0x38] sm:$0xff] }
  0xb7   :  { %6783 = vst [vmem:[#allocation85_spill] sm:$0xff] %v4419_v23  ;;  %6784 = vst [vmem:[#allocation86_spill] sm:$0xff] %v4423_v54  ;;  %v4435_v53 = vmul.f32 %v3198_v36, %v6744_v51  ;;  %v4440_v22 = vmul.f32 0.27068216, %v6738_v21  ;;  %v4443_v41 = vmul.f32 0.27068216, %v6741_v24  ;;  %v4449_v14 = vmul.f32 %v3199_v2, %v3982_v39 }
  0xb8   :  { %6785 = vst [vmem:[#allocation87_spill] sm:$0xff] %v4425_v1  ;;  %6786 = vst [vmem:[#allocation88_spill] sm:$0xff] %v4427_v13  ;;  %v4452_v8 = vmul.f32 0.27068216, %v6724_v49  ;;  %v4455_v36 = vmul.f32 0.27068216, %v6732_v26 }
  0xb9   :  { %6787 = vst [vmem:[#allocation89_spill] sm:$0xff] %v4429_v35  ;;  %6788 = vst [vmem:[#allocation90_spill] sm:$0xff] %v4435_v53  ;;  %v4458_v28 = vmul.f32 0.27068216, %v6742_v58  ;;  %v3200_v21 = vld [vmem:[%s6522_s0 + $0x40] sm:$0x3f] }
  0xba   :  { %6789 = vst [vmem:[#allocation91_spill] sm:$0xff] %v4437_v45  ;;  %6790 = vst [vmem:[#allocation92_spill] sm:$0xff] %v4449_v14  ;;  %v4464_v24 = vmul.f32 %v3200_v21, %v3987_v59  ;;  %v4467_v53 = vmul.f32 0.27068216, %v6743_v18  ;;  %v4470_v2 = vmul.f32 0.27068216, %v6744_v51 }
  0xbb   :  { %v4473_v49 = vmul.f32 0.27068216, %v3982_v39  ;;  %v3201_v26 = vld [vmem:[%s6522_s0 + $0x48] sm:$0xff]  ;;  %v4482_v14 = vmul.f32 0.27068216, %v3987_v59  ;;  %v3202_v39 = vld [vmem:[%s6522_s0 + $0x50] sm:$0xff] }
  0xbc   :  { %6791 = vst [vmem:[#allocation93_spill] sm:$0xff] %v4464_v24  ;;  %v4479_v58 = vmul.f32 %v3201_v26, %v4004_v40  ;;  %v4485_v21 = vmul.f32 0.27068216, %v4004_v40  ;;  %v4488_v18 = vmul.f32 0.27068216, %v4009_v29  ;;  %v4494_v51 = vmul.f32 %v3202_v39, %v4009_v29  ;;  %v6796_v25 = vld [vmem:[#allocation52_spill] sm:$0xff] }
  0xbd   :  { %v4497_v24 = vmul.f32 0.27068216, %v4027_v57  ;;  %v4500_v26 = vmul.f32 0.27068216, %v4032_v46  ;;  %v4503_v59 = vmul.f32 0.27068216, %v4037_v5 }
  0xbe   :  { %6792 = vst [vmem:[#allocation94_spill] sm:$0xff] %v4479_v58  ;;  %6793 = vst [vmem:[#allocation95_spill] sm:$0xff] %v4494_v51  ;;  %v3203_v40 = vld [vmem:[%s6522_s0 + $0x58] sm:$0x3f]  ;;  %v4512_v54 = vmul.f32 0.27068216, %v4046_v63 }
  0xbf   :  { %v4509_v58 = vmul.f32 %v3203_v40, %v4027_v57  ;;  %v4515_v29 = vmul.f32 0.27068216, %v4094_v60  ;;  %v4518_v39 = vmul.f32 0.27068216, %v4112_v12  ;;  %v3204_v5 = vld [vmem:[%s6522_s0 + $0x60] sm:$0xff]  ;;  %v1060_v12 = vrot.slane %v4264_v19, 1 }
  0xc0   :  { %v4524_v51 = vmul.f32 %v3204_v5, %v4032_v46  ;;  %v4527_v56 = vmul.f32 0.27068216, %v4103_v52  ;;  %v4530_v57 = vmul.f32 0.27068216, %v4117_v37  ;;  %v4533_v63 = vmul.f32 0.27068216, %v4126_v55 }
  0xc1   :  { %6794 = vst [vmem:[#allocation96_spill] sm:$0xff] %v4509_v58  ;;  %v4536_v60 = vmul.f32 0.27068216, %v4144_v38  ;;  %v1061_v40 = vrot.slane %v4266_v16, 1  ;;  %v1063_v58 = vrot.slane %v4269_v0, 1  ;;  %v1065_v46 = vrot.slane %v4271_v6, 1 }
  0xc2   :  { %6795 = vst [vmem:[#allocation97_spill] sm:$0xff] %v4524_v51  ;;  %v1066_v52 = vrot.slane %v4273_v61, 1  ;;  %v1068_v5 = vrot.slane %v4276_v3, 1  ;;  %v1070_v37 = vrot.slane %v4278_v15, 1  ;;  %v1071_v55 = vrot.slane %v4280_v4, 1  ;;  %v6797_v45 = vld [vmem:[#allocation47_spill] sm:$0xff] }
  0xc3   :  { %v1073_v51 = vrot.slane %v4283_v11, 1  ;;  %v1075_v38 = vrot.slane %v4285_v42, 1  ;;  %v1076_v19 = vrot.slane %v4287_v34, 1  ;;  %v1078_v16 = vrot.slane %v6796_v25, 1  ;;  %v6798_v35 = vld [vmem:[#allocation49_spill] sm:$0xff]  ;;  %v6799_v13 = vld [vmem:[#allocation59_spill] sm:$0xff] }
  0xc4   :  { %v1080_v0 = vrot.slane %v6797_v45, 1  ;;  %v1081_v6 = vrot.slane %v6798_v35, 1  ;;  %v1083_v61 = vrot.slane %v6799_v13, 1  ;;  %v1062_v3 = vsel %vm458_vm3, %v1060_v12, %v1061_v40  ;;  %v6800_v1 = vld [vmem:[#allocation66_spill] sm:$0xff]  ;;  %v6801_v23 = vld [vmem:[#allocation73_spill] sm:$0xff]  ;;  %v6802_v33 = vld [vmem:[#allocation75_spill] sm:$0xff] }
  0xc5   :  { %v1085_v15 = vrot.slane %v6800_v1, 1  ;;  %v1086_v4 = vrot.slane %v6801_v23, 1  ;;  %v1088_v11 = vrot.slane %v6802_v33, 1  ;;  %v1064_v42 = vsel %vm458_vm3, %v1061_v40, %v1063_v58  ;;  %v6803_v43 = vld [vmem:[#allocation76_spill] sm:$0xff]  ;;  %v6804_v17 = vld [vmem:[#allocation77_spill] sm:$0xff]  ;;  %v6805_v50 = vld [vmem:[#allocation78_spill] sm:$0xff] }
  0xc6   :  { %v1090_v34 = vrot.slane %v6803_v43, 1  ;;  %v1091_v25 = vrot.slane %v6804_v17, 1  ;;  %v1093_v45 = vrot.slane %v6805_v50, 1  ;;  %v1067_v35 = vsel %vm458_vm3, %v1065_v46, %v1066_v52  ;;  %v6806_v40 = vld [vmem:[#allocation30_spill] sm:$0xff] }
  0xc7   :  { %v1069_v13 = vsel %vm458_vm3, %v1066_v52, %v1068_v5  ;;  %v1072_v12 = vsel %vm458_vm3, %v1070_v37, %v1071_v55  ;;  %v1074_v1 = vsel %vm458_vm3, %v1071_v55, %v1073_v51  ;;  %v1077_v23 = vsel %vm458_vm3, %v1075_v38, %v1076_v19  ;;  %v6807_v52 = vld [vmem:[#allocation31_spill] sm:$0xff]  ;;  %v6808_v55 = vld [vmem:[#allocation32_spill] sm:$0xff] }
  0xc8   :  { %v1079_v33 = vsel %vm458_vm3, %v1076_v19, %v1078_v16  ;;  %v1082_v58 = vsel %vm458_vm3, %v1080_v0, %v1081_v6  ;;  %v1084_v43 = vsel %vm458_vm3, %v1081_v6, %v1083_v61  ;;  %v1087_v17 = vsel %vm458_vm3, %v1085_v15, %v1086_v4  ;;  %v6809_v19 = vld [vmem:[#allocation33_spill] sm:$0xff]  ;;  %v6810_v0 = vld [vmem:[#allocation50_spill] sm:$0xff] }
  0xc9   :  { %v1089_v50 = vsel %vm458_vm3, %v1086_v4, %v1088_v11  ;;  %v4572_v46 = vadd.f32 %v1062_v3, %v6806_v40  ;;  %v4575_v5 = vadd.f32 %v1064_v42, %v6807_v52  ;;  %v1092_v51 = vsel %vm458_vm3, %v1090_v34, %v1091_v25  ;;  %v6811_v61 = vld [vmem:[#allocation54_spill] sm:$0xff]  ;;  %v6812_v15 = vld [vmem:[#allocation57_spill] sm:$0xff] }
  0xca   :  { %v4579_v37 = vsel %vm458_vm3, %v1091_v25, %v1093_v45  ;;  %v4582_v38 = vadd.f32 %v1067_v35, %v6808_v55  ;;  %v4585_v16 = vadd.f32 %v1069_v13, %v6809_v19  ;;  %v4588_v6 = vadd.f32 %v1072_v12, %v6810_v0  ;;  %v6813_v11 = vld [vmem:[#allocation61_spill] sm:$0xff]  ;;  %v6814_v34 = vld [vmem:[#allocation62_spill] sm:$0xff]  ;;  %v6816_v45 = vld [vmem:[#allocation64_spill] sm:$0xff] }
  0xcb   :  { %v4591_v3 = vadd.f32 %v1074_v1, %v6811_v61  ;;  %v4594_v4 = vadd.f32 %v1077_v23, %v6812_v15  ;;  %v4597_v42 = vadd.f32 %v1079_v33, %v6813_v11  ;;  %v4600_v25 = vadd.f32 %v1082_v58, %v6814_v34  ;;  %v6818_v13 = vld [vmem:[#allocation65_spill] sm:$0xff]  ;;  %v6820_v12 = vld [vmem:[#allocation34_spill] sm:$0xff] }
  0xcc   :  { %v4603_v35 = vadd.f32 %v1084_v43, %v6816_v45  ;;  %v4606_v40 = vadd.f32 %v1087_v17, %v6818_v13  ;;  %v4609_v52 = vadd.f32 %v1089_v50, %v6820_v12  ;;  %v6822_v1 = vld [vmem:[#allocation2_spill] sm:$0xff]  ;;  %v1144_v23 = vrot.slane %v4440_v22, 1 }
  0xcd   :  { %6815 = vst [vmem:[#allocation52_spill] sm:$0xff] %v4600_v25  ;;  %v4612_v55 = vadd.f32 %v1092_v51, %v6822_v1  ;;  %v1159_v33 = vrot.slane %v4485_v21, 1  ;;  %v1160_v19 = vrot.slane %v4488_v18, 1  ;;  %v1145_v58 = vrot.slane %v4443_v41, 1 }
  0xce   :  { %6817 = vst [vmem:[#allocation47_spill] sm:$0xff] %v4603_v35  ;;  %6819 = vst [vmem:[#allocation49_spill] sm:$0xff] %v4606_v40  ;;  %v1147_v43 = vrot.slane %v4452_v8, 1  ;;  %v1149_v0 = vrot.slane %v4455_v36, 1  ;;  %v1162_v17 = vrot.slane %v4497_v24, 1  ;;  %v1150_v50 = vrot.slane %v4458_v28, 1 }
  0xcf   :  { %6821 = vst [vmem:[#allocation59_spill] sm:$0xff] %v4609_v52  ;;  %6823 = vst [vmem:[#allocation66_spill] sm:$0xff] %v4612_v55  ;;  %v1152_v61 = vrot.slane %v4467_v53, 1  ;;  %v1154_v51 = vrot.slane %v4470_v2, 1  ;;  %v1155_v22 = vrot.slane %v4473_v49, 1  ;;  %v1157_v21 = vrot.slane %v4482_v14, 1 }
  0xd0   :  { %v1164_v18 = vrot.slane %v4500_v26, 1  ;;  %v1165_v41 = vrot.slane %v4503_v59, 1  ;;  %v1167_v8 = vrot.slane %v4512_v54, 1  ;;  %v1161_v36 = vsel %vm458_vm3, %v1159_v33, %v1160_v19 }
  0xd1   :  { %v1169_v24 = vrot.slane %v4515_v29, 1  ;;  %v1170_v28 = vrot.slane %v4518_v39, 1  ;;  %v1172_v53 = vrot.slane %v4527_v56, 1  ;;  %v1163_v2 = vsel %vm458_vm3, %v1160_v19, %v1162_v17 }
  0xd2   :  { %v1174_v49 = vrot.slane %v4530_v57, 1  ;;  %v1175_v14 = vrot.slane %v4533_v63, 1  ;;  %v1177_v26 = vrot.slane %v4536_v60, 1  ;;  %v1146_v59 = vsel %vm458_vm3, %v1144_v23, %v1145_v58 }
  0xd3   :  { %v1148_v54 = vsel %vm458_vm3, %v1145_v58, %v1147_v43  ;;  %v1151_v15 = vsel %vm458_vm3, %v1149_v0, %v1150_v50  ;;  %v1153_v29 = vsel %vm458_vm3, %v1150_v50, %v1152_v61  ;;  %v1156_v39 = vsel %vm458_vm3, %v1154_v51, %v1155_v22 }
  0xd4   :  { %v1158_v56 = vsel %vm458_vm3, %v1155_v22, %v1157_v21  ;;  %v1166_v11 = vsel %vm458_vm3, %v1164_v18, %v1165_v41  ;;  %v1168_v57 = vsel %vm458_vm3, %v1165_v41, %v1167_v8  ;;  %v1171_v63 = vsel %vm458_vm3, %v1169_v24, %v1170_v28  ;;  %v6824_v22 = vld [vmem:[#allocation80_spill] sm:$0xff]  ;;  %v6825_v18 = vld [vmem:[#allocation81_spill] sm:$0xff] }
  0xd5   :  { %v1173_v60 = vsel %vm458_vm3, %v1170_v28, %v1172_v53  ;;  %v1209_v34 = vadd.f32 %v1161_v36, %v4397_v30  ;;  %v1210_v45 = vadd.f32 %v1163_v2, %v4399_v48  ;;  %v1176_v13 = vsel %vm458_vm3, %v1174_v49, %v1175_v14  ;;  %v6827_v36 = vld [vmem:[#allocation84_spill] sm:$0xff]  ;;  %v6828_v24 = vld [vmem:[#allocation85_spill] sm:$0xff] }
  0xd6   :  { %v1178_v12 = vsel %vm458_vm3, %v1175_v14, %v1177_v26  ;;  %v1200_v1 = vadd.f32 %v1146_v59, %v4376_v10  ;;  %v1201_v23 = vadd.f32 %v1148_v54, %v4378_v62  ;;  %v1202_v33 = vadd.f32 %v1147_v43, %v4381_v47  ;;  %v6826_v43 = vld [vmem:[#allocation83_spill] sm:$0xff]  ;;  %v6830_v28 = vld [vmem:[#allocation88_spill] sm:$0xff] }
  0xd7   :  { %v1203_v19 = vadd.f32 %v1151_v15, %v4383_v32  ;;  %v1204_v58 = vadd.f32 %v1153_v29, %v4385_v9  ;;  %v1205_v0 = vadd.f32 %v1152_v61, %v4388_v44  ;;  %v1206_v30 = vadd.f32 %v1156_v39, %v4390_v27  ;;  %v6829_v61 = vld [vmem:[#allocation87_spill] sm:$0xff] }
  0xd8   :  { %v1207_v48 = vadd.f32 %v1158_v56, %v4392_v31  ;;  %v1208_v50 = vadd.f32 %v1157_v21, %v4395_v7  ;;  %v1211_v51 = vadd.f32 %v1162_v17, %v4405_v20  ;;  %v1212_v10 = vadd.f32 %v1166_v11, %v6824_v22  ;;  %v6831_v7 = vld [vmem:[#allocation89_spill] sm:$0xff] }
  0xd9   :  { %v1213_v62 = vadd.f32 %v1168_v57, %v6825_v18  ;;  %v1257_v41 = vrot.slane %v1209_v34, 2  ;;  %v1258_v47 = vrot.slane %v1210_v45, 2  ;;  %v1214_v32 = vadd.f32 %v1167_v8, %v6826_v43  ;;  %v6832_v57 = vld [vmem:[#allocation91_spill] sm:$0xff]  ;;  %v6860_v22 = vld [vmem:[#allocation37_spill] sm:$0xff] }
  0xda   :  { %v1215_v9 = vadd.f32 %v1171_v63, %v6827_v36  ;;  %v1216_v44 = vadd.f32 %v1173_v60, %v6828_v24  ;;  %v1217_v27 = vadd.f32 %v1172_v53, %v6829_v61  ;;  %v4668_v31 = vadd.f32 %v1176_v13, %v6830_v28  ;;  %v6833_v13 = vld [vmem:[#allocation51_spill] sm:$0xff] }
  0xdb   :  { %v4671_v21 = vadd.f32 %v1178_v12, %v6831_v7  ;;  %v1242_v20 = vrot.slane %v1200_v1, 2  ;;  %v1243_v17 = vrot.slane %v1201_v23, 2  ;;  %v1245_v2 = vrot.slane %v1202_v33, 2  ;;  %v6847_v7 = vld [vmem:[#allocation9_spill] sm:$0xff] }
  0xdc   :  { %v1247_v49 = vrot.slane %v1203_v19, 2  ;;  %v1248_v14 = vrot.slane %v1204_v58, 2  ;;  %v1250_v59 = vrot.slane %v1205_v0, 2  ;;  %v1252_v54 = vrot.slane %v1206_v30, 2 }
  0xdd   :  { %v1253_v8 = vrot.slane %v1207_v48, 2  ;;  %v1259_v15 = vsel %vm317_vm2, %v1257_v41, %v1258_v47  ;;  %v1260_v29 = vrot.slane %v1211_v51, 2  ;;  %v1255_v39 = vrot.slane %v1208_v50, 2 }
  0xde   :  { %v1262_v56 = vrot.slane %v1212_v10, 2  ;;  %v1263_v53 = vrot.slane %v1213_v62, 2  ;;  %v1265_v11 = vrot.slane %v1214_v32, 2  ;;  %v4675_v63 = vadd.f32 %v1177_v26, %v6832_v57  ;;  %v6843_v32 = vld [vmem:[#allocation5_spill] sm:$0xff]  ;;  %v6859_v10 = vld [vmem:[#allocation35_spill] sm:$0xff] }
  0xdf   :  { %v1267_v60 = vrot.slane %v1215_v9, 2  ;;  %v1268_v34 = vrot.slane %v1216_v44, 2  ;;  %v1270_v45 = vrot.slane %v1217_v27, 2  ;;  %v4679_v12 = vadd.f32 %v4579_v37, %v6833_v13  ;;  %v6844_v9 = vld [vmem:[#allocation6_spill] sm:$0xff]  ;;  %v6845_v44 = vld [vmem:[#allocation7_spill] sm:$0xff]  ;;  %v6846_v27 = vld [vmem:[#allocation8_spill] sm:$0xff] }
  0xe0   :  { %v1244_v1 = vsel %vm317_vm2, %v1242_v20, %v1243_v17  ;;  %v4683_v23 = vsel %vm317_vm2, %v1243_v17, %v1245_v2  ;;  %v1297_v33 = vadd.f32 %v1259_v15, %v4594_v4  ;;  %v4687_v19 = vsel %vm317_vm2, %v1247_v49, %v1248_v14  ;;  %v6848_v17 = vld [vmem:[#allocation10_spill] sm:$0xff] }
  0xe1   :  { %6834 = vst [vmem:[#allocation73_spill] sm:$0xff] %v4679_v12  ;;  %v4690_v26 = vsel %vm317_vm2, %v1248_v14, %v1250_v59  ;;  %v4693_v58 = vsel %vm317_vm2, %v1252_v54, %v1253_v8  ;;  %v1261_v0 = vsel %vm317_vm2, %v1258_v47, %v1260_v29  ;;  %v4697_v37 = vsel %vm317_vm2, %v1253_v8, %v1255_v39  ;;  %v6842_v47 = vld [vmem:[#allocation4_spill] sm:$0xff]  ;;  %v6851_v59 = vld [vmem:[#allocation13_spill] sm:$0xff]  ;;  %v6852_v8 = vld [vmem:[#allocation14_spill] sm:$0xff] }
  0xe2   :  { %6835 = vst [vmem:[#allocation75_spill] sm:$0xff] %v4697_v37  ;;  %v4700_v30 = vsel %vm317_vm2, %v1262_v56, %v1263_v53  ;;  %v4703_v48 = vsel %vm317_vm2, %v1263_v53, %v1265_v11  ;;  %v4707_v50 = vsel %vm317_vm2, %v1267_v60, %v1268_v34  ;;  %v4710_v51 = vsel %vm317_vm2, %v1268_v34, %v1270_v45  ;;  %v6850_v14 = vld [vmem:[#allocation12_spill] sm:$0xff]  ;;  %v6853_v29 = vld [vmem:[#allocation15_spill] sm:$0xff]  ;;  %v6855_v11 = vld [vmem:[#allocation17_spill] sm:$0xff] }
  0xe3   :  { %6836 = vst [vmem:[#allocation76_spill] sm:$0xff] %v4700_v30  ;;  %6837 = vst [vmem:[#allocation77_spill] sm:$0xff] %v4703_v48  ;;  %v4715_v18 = vadd.f32 %v1244_v1, %v4572_v46  ;;  %v1298_v62 = vadd.f32 %v1261_v0, %v4597_v42  ;;  %v4718_v41 = vmul.f32 0.27068216, %v1297_v33  ;;  %v1346_v43 = vrot.slane %v6842_v47, 6  ;;  %v6849_v46 = vld [vmem:[#allocation11_spill] sm:$0xff] }
  0xe4   :  { %6838 = vst [vmem:[#allocation78_spill] sm:$0xff] %v4707_v50  ;;  %6839 = vst [vmem:[#allocation30_spill] sm:$0xff] %v4710_v51  ;;  %v1347_v36 = vrot.slane %v6843_v32, 6  ;;  %v1349_v24 = vrot.slane %v6844_v9, 6  ;;  %v1351_v61 = vrot.slane %v6845_v44, 6  ;;  %v1352_v28 = vrot.slane %v6846_v27, 6 }
  0xe5   :  { %6840 = vst [vmem:[#allocation31_spill] sm:$0xff] %v4715_v18  ;;  %6841 = vst [vmem:[#allocation32_spill] sm:$0xff] %v4718_v41  ;;  %v1354_v20 = vrot.slane %v6847_v7, 6  ;;  %v1356_v2 = vrot.slane %v6848_v17, 6  ;;  %v1357_v49 = vrot.slane %v6849_v46, 6  ;;  %v1359_v42 = vrot.slane %v6850_v14, 6 }
  0xe6   :  { %v1361_v54 = vrot.slane %v6851_v59, 6  ;;  %v1362_v15 = vrot.slane %v6852_v8, 6  ;;  %v1364_v39 = vrot.slane %v6853_v29, 6  ;;  %v6854_v56 = vld [vmem:[#allocation16_spill] sm:$0xff]  ;;  %v1367_v57 = vrot.slane %v6855_v11, 6  ;;  %v6856_v60 = vld [vmem:[#allocation21_spill] sm:$0xff] }
  0xe7   :  { %v1366_v53 = vrot.slane %v6854_v56, 6  ;;  %v1369_v34 = vrot.slane %v6856_v60, 6  ;;  %v6857_v45 = vld [vmem:[#allocation25_spill] sm:$0xff]  ;;  %v1348_v0 = vsel %vm140_vm0, %v1346_v43, %v1347_v36  ;;  %v1374_v4 = vrot.slane %v6859_v10, 6 }
  0xe8   :  { %v1371_v13 = vrot.slane %v6857_v45, 6  ;;  %v6858_v1 = vld [vmem:[#allocation29_spill] sm:$0xff]  ;;  %v1376_v41 = vrot.slane %v6860_v22, 6  ;;  %v1350_v55 = vsel %vm140_vm0, %v1347_v36, %v1349_v24  ;;  %v1353_v51 = vsel %vm140_vm0, %v1351_v61, %v1352_v28 }
  0xe9   :  { %v1372_v33 = vrot.slane %v6858_v1, 6  ;;  %v6861_v18 = vld [vmem:[#allocation41_spill] sm:$0xff]  ;;  %v1355_v52 = vsel %vm140_vm0, %v1352_v28, %v1354_v20  ;;  %v1358_v48 = vsel %vm140_vm0, %v1356_v2, %v1357_v49  ;;  %v1360_v35 = vsel %vm140_vm0, %v1357_v49, %v1359_v42 }
  0xea   :  { %v1377_v12 = vrot.slane %v6861_v18, 6  ;;  %v6862_v50 = vld [vmem:[#allocation53_spill] sm:$0xff]  ;;  %v1363_v43 = vsel %vm140_vm0, %v1361_v54, %v1362_v15  ;;  %v1365_v30 = vsel %vm140_vm0, %v1362_v15, %v1364_v39  ;;  %v1368_v25 = vsel %vm140_vm0, %v1366_v53, %v1367_v57 }
  0xeb   :  { %v1379_v40 = vrot.slane %v6862_v50, 6  ;;  %v1370_v37 = vsel %vm140_vm0, %v1367_v57, %v1369_v34  ;;  %v1373_v36 = vsel %vm140_vm0, %v1371_v13, %v1372_v33  ;;  %v1395_v24 = vadd.f32 %v1348_v0, %v6842_v47 }
  0xec   :  { %v1375_v61 = vsel %vm140_vm0, %v1372_v33, %v1374_v4  ;;  %v1378_v28 = vsel %vm140_vm0, %v1376_v41, %v1377_v12  ;;  %v1396_v20 = vadd.f32 %v1350_v55, %v6843_v32  ;;  %v1397_v2 = vadd.f32 %v1353_v51, %v6845_v44 }
  0xed   :  { %v1380_v49 = vsel %vm140_vm0, %v1377_v12, %v1379_v40  ;;  %v1398_v42 = vadd.f32 %v1355_v52, %v6846_v27  ;;  %v1399_v54 = vadd.f32 %v1358_v48, %v6848_v17  ;;  %v1400_v15 = vadd.f32 %v1360_v35, %v6849_v46 }
  0xee   :  { %v4761_v39 = vmul.f32 0.27068216, %v1298_v62  ;;  %v1401_v53 = vadd.f32 %v1363_v43, %v6851_v59  ;;  %v1402_v4 = vadd.f32 %v1365_v30, %v6852_v8  ;;  %v1403_v41 = vadd.f32 %v1368_v25, %v6854_v56 }
  0xef   :  { %v1404_v55 = vadd.f32 %v1370_v37, %v6855_v11  ;;  %v1405_v51 = vadd.f32 %v1373_v36, %v6857_v45  ;;  %v1406_v40 = vadd.f32 %v1375_v61, %v6858_v1  ;;  %v1407_v52 = vadd.f32 %v1378_v28, %v6860_v22 }
  0xf0   :  { %6863 = vst [vmem:[#allocation33_spill] sm:$0xff] %v4761_v39  ;;  %v1408_v12 = vadd.f32 %v1380_v49, %v6861_v18  ;;  %v4771_v48 = vmul.f32 0.036632847, %v1395_v24  ;;  %v4773_v35 = vmul.f32 0.036632847, %v1396_v20  ;;  %v4779_v30 = vadd.f32 %v4683_v23, %v4575_v5 }
  0xf1   :  { %v4775_v62 = vmul.f32 0.036632847, %v1397_v2  ;;  %v4781_v25 = vmul.f32 0.036632847, %v1398_v42  ;;  %v4783_v37 = vmul.f32 0.036632847, %v1399_v54 }
  0xf2   :  { %6864 = vst [vmem:[#allocation50_spill] sm:$0xff] %v4771_v48  ;;  %6865 = vst [vmem:[#allocation54_spill] sm:$0xff] %v4773_v35  ;;  %v4785_v57 = vmul.f32 0.036632847, %v1400_v15  ;;  %v6871_v34 = vrot.slane %v4671_v21, 2  ;;  %v6872_v13 = vrot.slane %v4668_v31, 2 }
  0xf3   :  { %6866 = vst [vmem:[#allocation57_spill] sm:$0xff] %v4775_v62  ;;  %6867 = vst [vmem:[#allocation61_spill] sm:$0xff] %v4779_v30  ;;  %v4794_v0 = vmul.f32 0.036632847, %v1401_v53  ;;  %v4796_v43 = vmul.f32 0.036632847, %v1402_v4 }
  0xf4   :  { %6868 = vst [vmem:[#allocation62_spill] sm:$0xff] %v4781_v25  ;;  %6869 = vst [vmem:[#allocation64_spill] sm:$0xff] %v4783_v37  ;;  %v4792_v33 = vsel %vm317_vm2, %v6872_v13, %v6871_v34  ;;  %v4798_v36 = vmul.f32 0.036632847, %v1403_v41  ;;  %v6876_v5 = vrot.slane %v4675_v63, 2  ;;  %v6877_v23 = vmov %v6871_v34 }
  0xf5   :  { %6870 = vst [vmem:[#allocation65_spill] sm:$0xff] %v4785_v57  ;;  %6873 = vst [vmem:[#allocation34_spill] sm:$0xff] %v4794_v0  ;;  %v4807_v61 = vmul.f32 0.036632847, %v1404_v55  ;;  %v4809_v28 = vmul.f32 0.036632847, %v1405_v51 }
  0xf6   :  { %6874 = vst [vmem:[#allocation2_spill] sm:$0xff] %v4796_v43  ;;  %6875 = vst [vmem:[#allocation80_spill] sm:$0xff] %v4798_v36  ;;  %v4805_v24 = vsel %vm317_vm2, %v6877_v23, %v6876_v5  ;;  %v4811_v31 = vmul.f32 0.036632847, %v1406_v40  ;;  %v4813_v20 = vmul.f32 0.036632847, %v1407_v52 }
  0xf7   :  { %6878 = vst [vmem:[#allocation81_spill] sm:$0xff] %v4807_v61  ;;  %6879 = vst [vmem:[#allocation83_spill] sm:$0xff] %v4809_v28  ;;  %v4815_v2 = vmul.f32 0.036632847, %v1408_v12  ;;  %v1423_v49 = vrot.slane %v6842_v47, 4  ;;  %v1424_v42 = vrot.slane %v6843_v32, 4 }
  0xf8   :  { %6880 = vst [vmem:[#allocation84_spill] sm:$0xff] %v4811_v31  ;;  %6881 = vst [vmem:[#allocation85_spill] sm:$0xff] %v4813_v20  ;;  %v1426_v63 = vrot.slane %v6844_v9, 4  ;;  %v1428_v21 = vrot.slane %v6845_v44, 4  ;;  %v1429_v54 = vrot.slane %v6846_v27, 4  ;;  %v1431_v15 = vrot.slane %v6847_v7, 4 }
  0xf9   :  { %6882 = vst [vmem:[#allocation87_spill] sm:$0xff] %v4815_v2  ;;  %v1433_v53 = vrot.slane %v6848_v17, 4  ;;  %v1434_v4 = vrot.slane %v6849_v46, 4  ;;  %v1436_v41 = vrot.slane %v6850_v14, 4  ;;  %v1438_v55 = vrot.slane %v6851_v59, 4 }
  0xfa   :  { %v1439_v51 = vrot.slane %v6852_v8, 4  ;;  %v1441_v40 = vrot.slane %v6853_v29, 4  ;;  %v1443_v52 = vrot.slane %v6854_v56, 4  ;;  %v1444_v12 = vrot.slane %v6855_v11, 4 }
  0xfb   :  { %v1446_v34 = vrot.slane %v6856_v60, 4  ;;  %v1448_v13 = vrot.slane %v6857_v45, 4  ;;  %v1449_v5 = vrot.slane %v6858_v1, 4  ;;  %v1451_v23 = vrot.slane %v6859_v10, 4 }
  0xfc   :  { %v1425_v39 = vsel %vm218_vm1, %v1423_v49, %v1424_v42  ;;  %v1427_v30 = vsel %vm218_vm1, %v1424_v42, %v1426_v63  ;;  %v1453_v2 = vrot.slane %v6860_v22, 4  ;;  %v1454_v20 = vrot.slane %v6861_v18, 4 }
  0xfd   :  { %v1430_v31 = vsel %vm218_vm1, %v1428_v21, %v1429_v54  ;;  %v1432_v28 = vsel %vm218_vm1, %v1429_v54, %v1431_v15  ;;  %v1435_v61 = vsel %vm218_vm1, %v1433_v53, %v1434_v4  ;;  %v1456_v36 = vrot.slane %v6862_v50, 4 }
  0xfe   :  { %v1437_v43 = vsel %vm218_vm1, %v1434_v4, %v1436_v41  ;;  %v1440_v0 = vsel %vm218_vm1, %v1438_v55, %v1439_v51  ;;  %v1442_v49 = vsel %vm218_vm1, %v1439_v51, %v1441_v40  ;;  %v1445_v42 = vsel %vm218_vm1, %v1443_v52, %v1444_v12 }
  0xff   :  { %v1447_v57 = vsel %vm218_vm1, %v1444_v12, %v1446_v34  ;;  %v1450_v37 = vsel %vm218_vm1, %v1448_v13, %v1449_v5  ;;  %v1452_v21 = vsel %vm218_vm1, %v1449_v5, %v1451_v23  ;;  %v1479_v54 = vadd.f32 %v1425_v39, %v6842_v47 }
 0x100   :  { %v1455_v53 = vsel %vm218_vm1, %v1453_v2, %v1454_v20  ;;  %v1480_v25 = vadd.f32 %v1427_v30, %v6843_v32  ;;  %v1481_v4 = vadd.f32 %v1426_v63, %v6844_v9  ;;  %v1482_v55 = vadd.f32 %v1430_v31, %v6845_v44 }
 0x101   :  { %v1457_v51 = vsel %vm218_vm1, %v1454_v20, %v1456_v36  ;;  %v1483_v52 = vadd.f32 %v1432_v28, %v6846_v27  ;;  %v1484_v12 = vadd.f32 %v1431_v15, %v6847_v7  ;;  %v1485_v13 = vadd.f32 %v1435_v61, %v6848_v17 }
 0x102   :  { %v1486_v5 = vadd.f32 %v1437_v43, %v6849_v46  ;;  %v1487_v39 = vadd.f32 %v1436_v41, %v6850_v14  ;;  %v1488_v2 = vadd.f32 %v1440_v0, %v6851_v59  ;;  %v1489_v30 = vadd.f32 %v1442_v49, %v6852_v8 }
 0x103   :  { %v1490_v63 = vadd.f32 %v1441_v40, %v6853_v29  ;;  %v1491_v31 = vadd.f32 %v1445_v42, %v6854_v56  ;;  %v1492_v20 = vadd.f32 %v1447_v57, %v6855_v11  ;;  %v1493_v28 = vadd.f32 %v1446_v34, %v6856_v60 }
 0x104   :  { %v1494_v15 = vadd.f32 %v1450_v37, %v6857_v45  ;;  %v1495_v61 = vadd.f32 %v1452_v21, %v6858_v1  ;;  %v1496_v43 = vadd.f32 %v1451_v23, %v6859_v10  ;;  %v4870_v62 = vmul.f32 0.11128076, %v1479_v54 }
 0x105   :  { %v1497_v0 = vadd.f32 %v1455_v53, %v6860_v22  ;;  %v4873_v41 = vmul.f32 0.11128076, %v1480_v25  ;;  %v4875_v49 = vmul.f32 0.11128076, %v1481_v4  ;;  %v4877_v40 = vmul.f32 0.11128076, %v1482_v55 }
 0x106   :  { %v1498_v57 = vadd.f32 %v1457_v51, %v6861_v18  ;;  %v4880_v42 = vmul.f32 0.11128076, %v1483_v52  ;;  %v4882_v34 = vmul.f32 0.11128076, %v1484_v12  ;;  %v4884_v37 = vmul.f32 0.11128076, %v1485_v13 }
 0x107   :  { %v1499_v23 = vadd.f32 %v1456_v36, %v6862_v50  ;;  %v4887_v21 = vmul.f32 0.11128076, %v1486_v5  ;;  %v4889_v54 = vmul.f32 0.11128076, %v1487_v39  ;;  %v4891_v25 = vmul.f32 0.11128076, %v1488_v2 }
 0x108   :  { %6883 = vst [vmem:[#allocation88_spill] sm:$0xff] %v4882_v34  ;;  %6884 = vst [vmem:[#allocation89_spill] sm:$0xff] %v4884_v37  ;;  %v4895_v53 = vadd.f32 %v4687_v19, %v4582_v38  ;;  %v4897_v4 = vmul.f32 0.11128076, %v1489_v30  ;;  %v4899_v55 = vmul.f32 0.11128076, %v1490_v63  ;;  %v4905_v52 = vadd.f32 %v4690_v26, %v4585_v16 }
 0x109   :  { %6885 = vst [vmem:[#allocation91_spill] sm:$0xff] %v4887_v21  ;;  %6886 = vst [vmem:[#allocation51_spill] sm:$0xff] %v4889_v54  ;;  %v4901_v51 = vmul.f32 0.11128076, %v1491_v31  ;;  %v4907_v36 = vmul.f32 0.11128076, %v1492_v20  ;;  %v4915_v38 = vadd.f32 %v4693_v58, %v4588_v6 }
 0x10a   :  { %6887 = vst [vmem:[#allocation4_spill] sm:$0xff] %v4891_v25  ;;  %6888 = vst [vmem:[#allocation5_spill] sm:$0xff] %v4897_v4  ;;  %v4909_v12 = vmul.f32 0.11128076, %v1493_v28  ;;  %v4911_v13 = vmul.f32 0.11128076, %v1494_v15 }
 0x10b   :  { %6889 = vst [vmem:[#allocation6_spill] sm:$0xff] %v4899_v55  ;;  %6890 = vst [vmem:[#allocation7_spill] sm:$0xff] %v4901_v51  ;;  %v4917_v19 = vmul.f32 0.11128076, %v1495_v61  ;;  %v4919_v5 = vmul.f32 0.11128076, %v1496_v43 }
 0x10c   :  { %6891 = vst [vmem:[#allocation8_spill] sm:$0xff] %v4907_v36  ;;  %6892 = vst [vmem:[#allocation9_spill] sm:$0xff] %v4909_v12  ;;  %v4921_v39 = vmul.f32 0.11128076, %v1497_v0  ;;  %v4923_v2 = vmul.f32 0.11128076, %v1498_v57 }
 0x10d   :  { %6893 = vst [vmem:[#allocation10_spill] sm:$0xff] %v4911_v13  ;;  %6894 = vst [vmem:[#allocation11_spill] sm:$0xff] %v4917_v19  ;;  %v4925_v16 = vmul.f32 0.11128076, %v1499_v23  ;;  %v1521_v26 = vrot.slane %v6842_v47, 2  ;;  %v1522_v30 = vrot.slane %v6843_v32, 2 }
 0x10e   :  { %6895 = vst [vmem:[#allocation12_spill] sm:$0xff] %v4919_v5  ;;  %6896 = vst [vmem:[#allocation13_spill] sm:$0xff] %v4921_v39  ;;  %v1524_v63 = vrot.slane %v6844_v9, 2  ;;  %v1526_v31 = vrot.slane %v6845_v44, 2  ;;  %v1527_v6 = vrot.slane %v6846_v27, 2  ;;  %v1529_v58 = vrot.slane %v6847_v7, 2 }
 0x10f   :  { %6897 = vst [vmem:[#allocation14_spill] sm:$0xff] %v4923_v2  ;;  %6898 = vst [vmem:[#allocation15_spill] sm:$0xff] %v4925_v16  ;;  %v1531_v20 = vrot.slane %v6848_v17, 2  ;;  %v1532_v28 = vrot.slane %v6849_v46, 2  ;;  %v1534_v15 = vrot.slane %v6850_v14, 2  ;;  %v1536_v61 = vrot.slane %v6851_v59, 2 }
 0x110   :  { %v1537_v43 = vrot.slane %v6852_v8, 2  ;;  %v1539_v0 = vrot.slane %v6853_v29, 2  ;;  %v1541_v57 = vrot.slane %v6854_v56, 2  ;;  %v1542_v23 = vrot.slane %v6855_v11, 2 }
 0x111   :  { %v1544_v35 = vrot.slane %v6856_v60, 2  ;;  %v1546_v48 = vrot.slane %v6857_v45, 2  ;;  %v1547_v16 = vrot.slane %v6858_v1, 2  ;;  %v1549_v2 = vrot.slane %v6859_v10, 2 }
 0x112   :  { %v1523_v39 = vsel %vm317_vm2, %v1521_v26, %v1522_v30  ;;  %v1551_v5 = vrot.slane %v6860_v22, 2  ;;  %v1552_v19 = vrot.slane %v6861_v18, 2  ;;  %v1554_v13 = vrot.slane %v6862_v50, 2 }
 0x113   :  { %v1525_v12 = vsel %vm317_vm2, %v1522_v30, %v1524_v63  ;;  %v1528_v36 = vsel %vm317_vm2, %v1526_v31, %v1527_v6  ;;  %v1530_v51 = vsel %vm317_vm2, %v1527_v6, %v1529_v58  ;;  %v1533_v55 = vsel %vm317_vm2, %v1531_v20, %v1532_v28 }
 0x114   :  { %v1535_v4 = vsel %vm317_vm2, %v1532_v28, %v1534_v15  ;;  %v1538_v25 = vsel %vm317_vm2, %v1536_v61, %v1537_v43  ;;  %v1540_v26 = vsel %vm317_vm2, %v1537_v43, %v1539_v0  ;;  %v1543_v54 = vsel %vm317_vm2, %v1541_v57, %v1542_v23 }
 0x115   :  { %v1545_v21 = vsel %vm317_vm2, %v1542_v23, %v1544_v35  ;;  %v1548_v37 = vsel %vm317_vm2, %v1546_v48, %v1547_v16  ;;  %v1550_v30 = vsel %vm317_vm2, %v1547_v16, %v1549_v2  ;;  %v1577_v31 = vadd.f32 %v1523_v39, %v6842_v47 }
 0x116   :  { %v1553_v6 = vsel %vm317_vm2, %v1551_v5, %v1552_v19  ;;  %v1555_v20 = vsel %vm317_vm2, %v1552_v19, %v1554_v13  ;;  %v1578_v28 = vadd.f32 %v1525_v12, %v6843_v32  ;;  %v1579_v61 = vadd.f32 %v1524_v63, %v6844_v9 }
 0x117   :  { %v1580_v43 = vadd.f32 %v1528_v36, %v6845_v44  ;;  %v1581_v57 = vadd.f32 %v1530_v51, %v6846_v27  ;;  %v1582_v23 = vadd.f32 %v1529_v58, %v6847_v7  ;;  %v1583_v48 = vadd.f32 %v1533_v55, %v6848_v17 }
 0x118   :  { %v1584_v16 = vadd.f32 %v1535_v4, %v6849_v46  ;;  %v1585_v39 = vadd.f32 %v1534_v15, %v6850_v14  ;;  %v1586_v5 = vadd.f32 %v1538_v25, %v6851_v59  ;;  %v1587_v19 = vadd.f32 %v1540_v26, %v6852_v8 }
 0x119   :  { %v1588_v12 = vadd.f32 %v1539_v0, %v6853_v29  ;;  %v1589_v63 = vadd.f32 %v1543_v54, %v6854_v56  ;;  %v1590_v36 = vadd.f32 %v1545_v21, %v6855_v11  ;;  %v1591_v51 = vadd.f32 %v1544_v35, %v6856_v60 }
 0x11a   :  { %v1592_v58 = vadd.f32 %v1548_v37, %v6857_v45  ;;  %v1593_v55 = vadd.f32 %v1550_v30, %v6858_v1  ;;  %v1594_v4 = vadd.f32 %v1549_v2, %v6859_v10  ;;  %v4980_v34 = vmul.f32 0.21674532, %v1577_v31 }
 0x11b   :  { %v1595_v25 = vadd.f32 %v1553_v6, %v6860_v22  ;;  %v4983_v15 = vmul.f32 0.21674532, %v1578_v28  ;;  %v4985_v26 = vmul.f32 0.21674532, %v1579_v61  ;;  %v4987_v0 = vmul.f32 0.21674532, %v1580_v43 }
 0x11c   :  { %v1596_v21 = vadd.f32 %v1555_v20, %v6861_v18  ;;  %v4990_v54 = vmul.f32 0.21674532, %v1581_v57  ;;  %v4992_v35 = vmul.f32 0.21674532, %v1582_v23  ;;  %v4994_v37 = vmul.f32 0.21674532, %v1583_v48 }
 0x11d   :  { %v1597_v2 = vadd.f32 %v1554_v13, %v6862_v50  ;;  %v4997_v30 = vmul.f32 0.21674532, %v1584_v16  ;;  %v4999_v31 = vmul.f32 0.21674532, %v1585_v39  ;;  %v5001_v6 = vmul.f32 0.21674532, %v1586_v5 }
 0x11e   :  { %6899 = vst [vmem:[#allocation16_spill] sm:$0xff] %v4994_v37  ;;  %v6902_v28 = vld [vmem:[#allocation75_spill] sm:$0xff]  ;;  %v5007_v43 = vmul.f32 0.21674532, %v1587_v19  ;;  %v5009_v20 = vmul.f32 0.21674532, %v1588_v12 }
 0x11f   :  { %6900 = vst [vmem:[#allocation17_spill] sm:$0xff] %v4999_v31  ;;  %6901 = vst [vmem:[#allocation21_spill] sm:$0xff] %v5001_v6  ;;  %v5005_v61 = vadd.f32 %v6902_v28, %v4591_v3  ;;  %v5011_v57 = vmul.f32 0.21674532, %v1589_v63  ;;  %v6904_v23 = vld [vmem:[#allocation52_spill] sm:$0xff]  ;;  %v6907_v5 = vld [vmem:[#allocation47_spill] sm:$0xff] }
 0x120   :  { %v6905_v48 = vld [vmem:[#allocation76_spill] sm:$0xff]  ;;  %v5015_v13 = vmul.f32 0.21674532, %v1590_v36  ;;  %v5017_v16 = vmul.f32 0.21674532, %v1591_v51  ;;  %v6908_v6 = vld [vmem:[#allocation77_spill] sm:$0xff] }
 0x121   :  { %6903 = vst [vmem:[#allocation25_spill] sm:$0xff] %v5005_v61  ;;  %v1299_v37 = vadd.f32 %v6905_v48, %v6904_v23  ;;  %v5019_v39 = vmul.f32 0.21674532, %v1592_v58  ;;  %v5023_v31 = vadd.f32 %v6908_v6, %v6907_v5  ;;  %v5025_v3 = vmul.f32 0.21674532, %v1593_v55  ;;  %v6913_v63 = vld [vmem:[#allocation49_spill] sm:$0xff] }
 0x122   :  { %v5027_v19 = vmul.f32 0.21674532, %v1594_v4  ;;  %v5029_v12 = vmul.f32 0.21674532, %v1595_v25  ;;  %v6914_v28 = vld [vmem:[#allocation78_spill] sm:$0xff]  ;;  %v6917_v58 = vld [vmem:[#allocation59_spill] sm:$0xff] }
 0x123   :  { %6906 = vst [vmem:[#allocation29_spill] sm:$0xff] %v5019_v39  ;;  %6909 = vst [vmem:[#allocation35_spill] sm:$0xff] %v5023_v31  ;;  %v1301_v61 = vadd.f32 %v6914_v28, %v6913_v63  ;;  %v5033_v23 = vmul.f32 0.21674532, %v1596_v21  ;;  %v5035_v36 = vmul.f32 0.21674532, %v1597_v2 }
 0x124   :  { %6910 = vst [vmem:[#allocation37_spill] sm:$0xff] %v5025_v3  ;;  %6911 = vst [vmem:[#allocation41_spill] sm:$0xff] %v5027_v19  ;;  %v5038_v51 = vmul.f32 0.27068216, %v6842_v47  ;;  %v6918_v48 = vld [vmem:[#allocation30_spill] sm:$0xff]  ;;  %v6933_v31 = vld [vmem:[#allocation7_spill] sm:$0xff] }
 0x125   :  { %6912 = vst [vmem:[#allocation53_spill] sm:$0xff] %v5029_v12  ;;  %6915 = vst [vmem:[#allocation75_spill] sm:$0xff] %v5033_v23  ;;  %v1302_v6 = vadd.f32 %v6918_v48, %v6917_v58  ;;  %v5043_v55 = vmul.f32 0.27068216, %v6843_v32  ;;  %v5046_v4 = vmul.f32 0.27068216, %v6844_v9 }
 0x126   :  { %6916 = vst [vmem:[#allocation52_spill] sm:$0xff] %v5035_v36  ;;  %v5049_v25 = vmul.f32 0.27068216, %v6845_v44  ;;  %v6919_v5 = vld [vmem:[#allocation66_spill] sm:$0xff]  ;;  %v5056_v2 = vmul.f32 0.27068216, %v6846_v27  ;;  %v5078_v27 = vadd.f32 %v1301_v61, %v4895_v53 }
 0x127   :  { %v5053_v21 = vadd.f32 %v4792_v33, %v6919_v5  ;;  %v5059_v47 = vmul.f32 0.27068216, %v6847_v7  ;;  %v5062_v63 = vmul.f32 0.27068216, %v6848_v17  ;;  %v6921_v32 = vld [vmem:[#allocation73_spill] sm:$0xff]  ;;  %v6926_v61 = vld [vmem:[#allocation88_spill] sm:$0xff] }
 0x128   :  { %v5066_v9 = vadd.f32 %v4805_v24, %v6921_v32  ;;  %v5069_v44 = vmul.f32 0.27068216, %v6849_v46  ;;  %v5072_v28 = vmul.f32 0.27068216, %v6850_v14  ;;  %v5075_v33 = vmul.f32 0.27068216, %v6851_v59 }
 0x129   :  { %6920 = vst [vmem:[#allocation76_spill] sm:$0xff] %v5053_v21  ;;  %6923 = vst [vmem:[#allocation77_spill] sm:$0xff] %v5078_v27  ;;  %v5081_v7 = vmul.f32 0.27068216, %v6852_v8  ;;  %v5084_v17 = vmul.f32 0.27068216, %v6853_v29  ;;  %v5090_v46 = vadd.f32 %v1302_v6, %v4905_v52  ;;  %v5102_v8 = vadd.f32 %v1299_v37, %v4915_v38 }
 0x12a   :  { %6922 = vst [vmem:[#allocation47_spill] sm:$0xff] %v5066_v9  ;;  %v5087_v24 = vmul.f32 0.27068216, %v6854_v56  ;;  %v5093_v14 = vmul.f32 0.27068216, %v6855_v11  ;;  %v1662_v38 = vrot.slane %v4873_v41, 1 }
 0x12b   :  { %6924 = vst [vmem:[#allocation49_spill] sm:$0xff] %v5090_v46  ;;  %v5096_v59 = vmul.f32 0.27068216, %v6856_v60  ;;  %v5099_v53 = vmul.f32 0.27068216, %v6857_v45  ;;  %6925 = vst [vmem:[#allocation78_spill] sm:$0xff] %v5102_v8 }
 0x12c   :  { %v5105_v29 = vmul.f32 0.27068216, %v6858_v1  ;;  %v5108_v56 = vmul.f32 0.27068216, %v6859_v10  ;;  %v5111_v52 = vmul.f32 0.27068216, %v6860_v22 }
 0x12d   :  { %v5114_v11 = vmul.f32 0.27068216, %v6861_v18  ;;  %v5117_v60 = vmul.f32 0.27068216, %v6862_v50  ;;  %v1661_v45 = vrot.slane %v4870_v62, 1  ;;  %v1664_v37 = vrot.slane %v4875_v49, 1 }
 0x12e   :  { %v1666_v1 = vrot.slane %v4877_v40, 1  ;;  %v1667_v10 = vrot.slane %v4880_v42, 1  ;;  %v1669_v58 = vrot.slane %v6926_v61, 1  ;;  %v6927_v22 = vld [vmem:[#allocation89_spill] sm:$0xff]  ;;  %v6928_v6 = vld [vmem:[#allocation91_spill] sm:$0xff]  ;;  %v6930_v50 = vld [vmem:[#allocation4_spill] sm:$0xff] }
 0x12f   :  { %v1671_v48 = vrot.slane %v6927_v22, 1  ;;  %v1672_v18 = vrot.slane %v6928_v6, 1  ;;  %v6929_v5 = vld [vmem:[#allocation51_spill] sm:$0xff]  ;;  %v1676_v8 = vrot.slane %v6930_v50, 1  ;;  %v6931_v46 = vld [vmem:[#allocation5_spill] sm:$0xff]  ;;  %v6932_v27 = vld [vmem:[#allocation6_spill] sm:$0xff] }
 0x130   :  { %v1674_v32 = vrot.slane %v6929_v5, 1  ;;  %v1677_v62 = vrot.slane %v6931_v46, 1  ;;  %v1679_v41 = vrot.slane %v6932_v27, 1  ;;  %v1681_v49 = vrot.slane %v6933_v31, 1  ;;  %v6934_v9 = vld [vmem:[#allocation8_spill] sm:$0xff]  ;;  %v6935_v21 = vld [vmem:[#allocation9_spill] sm:$0xff] }
 0x131   :  { %v1682_v40 = vrot.slane %v6934_v9, 1  ;;  %v1684_v42 = vrot.slane %v6935_v21, 1  ;;  %v6936_v36 = vld [vmem:[#allocation10_spill] sm:$0xff]  ;;  %v6937_v23 = vld [vmem:[#allocation11_spill] sm:$0xff]  ;;  %v6938_v12 = vld [vmem:[#allocation12_spill] sm:$0xff]  ;;  %v1663_v5 = vsel %vm458_vm3, %v1661_v45, %v1662_v38  ;;  %v1665_v31 = vsel %vm458_vm3, %v1662_v38, %v1664_v37 }
 0x132   :  { %v1686_v61 = vrot.slane %v6936_v36, 1  ;;  %v1687_v22 = vrot.slane %v6937_v23, 1  ;;  %v1689_v6 = vrot.slane %v6938_v12, 1  ;;  %v6939_v19 = vld [vmem:[#allocation13_spill] sm:$0xff]  ;;  %v6940_v3 = vld [vmem:[#allocation14_spill] sm:$0xff]  ;;  %v6941_v39 = vld [vmem:[#allocation15_spill] sm:$0xff]  ;;  %v1668_v9 = vsel %vm458_vm3, %v1666_v1, %v1667_v10 }
 0x133   :  { %v1691_v50 = vrot.slane %v6939_v19, 1  ;;  %v1692_v46 = vrot.slane %v6940_v3, 1  ;;  %v1694_v27 = vrot.slane %v6941_v39, 1  ;;  %v1670_v21 = vsel %vm458_vm3, %v1667_v10, %v1669_v58  ;;  %v6942_v37 = vld [vmem:[#allocation50_spill] sm:$0xff] }
 0x134   :  { %v1673_v36 = vsel %vm458_vm3, %v1671_v48, %v1672_v18  ;;  %v1675_v23 = vsel %vm458_vm3, %v1672_v18, %v1674_v32  ;;  %v1678_v12 = vsel %vm458_vm3, %v1676_v8, %v1677_v62  ;;  %v1680_v45 = vsel %vm458_vm3, %v1677_v62, %v1679_v41  ;;  %v6943_v48 = vld [vmem:[#allocation54_spill] sm:$0xff]  ;;  %v6944_v18 = vld [vmem:[#allocation57_spill] sm:$0xff] }
 0x135   :  { %v1683_v19 = vsel %vm458_vm3, %v1681_v49, %v1682_v40  ;;  %v1685_v3 = vsel %vm458_vm3, %v1682_v40, %v1684_v42  ;;  %v1688_v39 = vsel %vm458_vm3, %v1686_v61, %v1687_v22  ;;  %v1690_v38 = vsel %vm458_vm3, %v1687_v22, %v1689_v6  ;;  %v6945_v62 = vld [vmem:[#allocation62_spill] sm:$0xff]  ;;  %v6946_v49 = vld [vmem:[#allocation64_spill] sm:$0xff]  ;;  %v6947_v42 = vld [vmem:[#allocation65_spill] sm:$0xff] }
 0x136   :  { %v5153_v1 = vadd.f32 %v1663_v5, %v6942_v37  ;;  %v1693_v10 = vsel %vm458_vm3, %v1691_v50, %v1692_v46  ;;  %v5157_v58 = vsel %vm458_vm3, %v1692_v46, %v1694_v27  ;;  %v5160_v8 = vadd.f32 %v1665_v31, %v6943_v48  ;;  %v6948_v22 = vld [vmem:[#allocation34_spill] sm:$0xff]  ;;  %v6950_v46 = vld [vmem:[#allocation80_spill] sm:$0xff]  ;;  %v6951_v31 = vld [vmem:[#allocation81_spill] sm:$0xff] }
 0x137   :  { %v5163_v32 = vadd.f32 %v1668_v9, %v6944_v18  ;;  %v5166_v41 = vadd.f32 %v1670_v21, %v6945_v62  ;;  %v5169_v40 = vadd.f32 %v1673_v36, %v6946_v49  ;;  %v5172_v61 = vadd.f32 %v1675_v23, %v6947_v42  ;;  %v6949_v5 = vld [vmem:[#allocation2_spill] sm:$0xff]  ;;  %v6952_v21 = vld [vmem:[#allocation83_spill] sm:$0xff]  ;;  %v6953_v36 = vld [vmem:[#allocation84_spill] sm:$0xff] }
 0x138   :  { %v5175_v6 = vadd.f32 %v1678_v12, %v6948_v22  ;;  %v5178_v50 = vadd.f32 %v1680_v45, %v6949_v5  ;;  %v5181_v27 = vadd.f32 %v1683_v19, %v6950_v46  ;;  %v5184_v9 = vadd.f32 %v1685_v3, %v6951_v31  ;;  %v6954_v23 = vld [vmem:[#allocation85_spill] sm:$0xff] }
 0x139   :  { %v5187_v37 = vadd.f32 %v1688_v39, %v6952_v21  ;;  %v5190_v48 = vadd.f32 %v1690_v38, %v6953_v36  ;;  %v5193_v18 = vadd.f32 %v1693_v10, %v6954_v23  ;;  %v1745_v12 = vrot.slane %v5038_v51, 1 }
 0x13a   :  { %v1746_v45 = vrot.slane %v5043_v55, 1  ;;  %v1748_v62 = vrot.slane %v5046_v4, 1  ;;  %v1750_v19 = vrot.slane %v5049_v25, 1  ;;  %v1751_v3 = vrot.slane %v5056_v2, 1 }
 0x13b   :  { %v1753_v49 = vrot.slane %v5059_v47, 1  ;;  %v1755_v39 = vrot.slane %v5062_v63, 1  ;;  %v1756_v38 = vrot.slane %v5069_v44, 1  ;;  %v1758_v42 = vrot.slane %v5072_v28, 1 }
 0x13c   :  { %v1760_v10 = vrot.slane %v5075_v33, 1  ;;  %v1761_v51 = vrot.slane %v5081_v7, 1  ;;  %v1763_v55 = vrot.slane %v5084_v17, 1  ;;  %v1765_v4 = vrot.slane %v5087_v24, 1 }
 0x13d   :  { %v1766_v25 = vrot.slane %v5093_v14, 1  ;;  %v1768_v2 = vrot.slane %v5096_v59, 1  ;;  %v1770_v47 = vrot.slane %v5099_v53, 1  ;;  %v1771_v63 = vrot.slane %v5105_v29, 1 }
 0x13e   :  { %v1773_v44 = vrot.slane %v5108_v56, 1  ;;  %v1747_v28 = vsel %vm458_vm3, %v1745_v12, %v1746_v45  ;;  %v1775_v33 = vrot.slane %v5111_v52, 1  ;;  %v1776_v7 = vrot.slane %v5114_v11, 1 }
 0x13f   :  { %v1778_v17 = vrot.slane %v5117_v60, 1  ;;  %v1749_v24 = vsel %vm458_vm3, %v1746_v45, %v1748_v62  ;;  %v1752_v14 = vsel %vm458_vm3, %v1750_v19, %v1751_v3  ;;  %v1754_v59 = vsel %vm458_vm3, %v1751_v3, %v1753_v49  ;;  %v6955_v3 = vld [vmem:[#allocation16_spill] sm:$0xff] }
 0x140   :  { %v1757_v53 = vsel %vm458_vm3, %v1755_v39, %v1756_v38  ;;  %v1759_v29 = vsel %vm458_vm3, %v1756_v38, %v1758_v42  ;;  %v1762_v56 = vsel %vm458_vm3, %v1760_v10, %v1761_v51  ;;  %v1764_v22 = vsel %vm458_vm3, %v1761_v51, %v1763_v55  ;;  %v6956_v10 = vld [vmem:[#allocation17_spill] sm:$0xff] }
 0x141   :  { %v1767_v52 = vsel %vm458_vm3, %v1765_v4, %v1766_v25  ;;  %v1769_v11 = vsel %vm458_vm3, %v1766_v25, %v1768_v2  ;;  %v1772_v60 = vsel %vm458_vm3, %v1770_v47, %v1771_v63  ;;  %v1774_v5 = vsel %vm458_vm3, %v1771_v63, %v1773_v44  ;;  %v6957_v51 = vld [vmem:[#allocation21_spill] sm:$0xff] }
 0x142   :  { %v1801_v46 = vadd.f32 %v1747_v28, %v4980_v34  ;;  %v1777_v31 = vsel %vm458_vm3, %v1775_v33, %v1776_v7  ;;  %v1779_v21 = vsel %vm458_vm3, %v1776_v7, %v1778_v17  ;;  %v1802_v36 = vadd.f32 %v1749_v24, %v4983_v15  ;;  %v6960_v63 = vld [vmem:[#allocation41_spill] sm:$0xff]  ;;  %v6962_v33 = vld [vmem:[#allocation75_spill] sm:$0xff]  ;;  %v6963_v24 = vld [vmem:[#allocation52_spill] sm:$0xff] }
 0x143   :  { %v1803_v23 = vadd.f32 %v1748_v62, %v4985_v26  ;;  %v1804_v12 = vadd.f32 %v1752_v14, %v4987_v0  ;;  %v1805_v45 = vadd.f32 %v1754_v59, %v4990_v54  ;;  %v1806_v19 = vadd.f32 %v1753_v49, %v4992_v35  ;;  %v6958_v62 = vld [vmem:[#allocation29_spill] sm:$0xff] }
 0x144   :  { %v1807_v39 = vadd.f32 %v1757_v53, %v6955_v3  ;;  %v1808_v38 = vadd.f32 %v1759_v29, %v4997_v30  ;;  %v1809_v34 = vadd.f32 %v1758_v42, %v6956_v10  ;;  %v1810_v4 = vadd.f32 %v1762_v56, %v6957_v51  ;;  %v6959_v49 = vld [vmem:[#allocation37_spill] sm:$0xff] }
 0x145   :  { %v1811_v25 = vadd.f32 %v1764_v22, %v5007_v43  ;;  %v1812_v15 = vadd.f32 %v1763_v55, %v5009_v20  ;;  %v1813_v26 = vadd.f32 %v1767_v52, %v5011_v57  ;;  %v1814_v0 = vadd.f32 %v1769_v11, %v5015_v13  ;;  %v6961_v28 = vld [vmem:[#allocation53_spill] sm:$0xff] }
 0x146   :  { %v1815_v54 = vadd.f32 %v1768_v2, %v5017_v16  ;;  %v1816_v35 = vadd.f32 %v1772_v60, %v6958_v62  ;;  %v1817_v47 = vadd.f32 %v1774_v5, %v6959_v49  ;;  %v1818_v30 = vadd.f32 %v1773_v44, %v6960_v63  ;;  %v6965_v63 = vld [vmem:[#allocation31_spill] sm:$0xff] }
 0x147   :  { %v1819_v42 = vadd.f32 %v1777_v31, %v6961_v28  ;;  %v1820_v7 = vadd.f32 %v1779_v21, %v6962_v33  ;;  %v1821_v43 = vadd.f32 %v1778_v17, %v6963_v24  ;;  %v1843_v14 = vrot.slane %v1801_v46, 2  ;;  %v6964_v21 = vld [vmem:[#allocation87_spill] sm:$0xff]  ;;  %v6969_v24 = vld [vmem:[#allocation25_spill] sm:$0xff] }
 0x148   :  { %v1844_v20 = vrot.slane %v1802_v36, 2  ;;  %v1846_v55 = vrot.slane %v1803_v23, 2  ;;  %v1848_v57 = vrot.slane %v1804_v12, 2  ;;  %v1849_v59 = vrot.slane %v1805_v45, 2  ;;  %v6968_v33 = vld [vmem:[#allocation47_spill] sm:$0xff] }
 0x149   :  { %v1851_v13 = vrot.slane %v1806_v19, 2  ;;  %v1853_v53 = vrot.slane %v1807_v39, 2  ;;  %v1854_v16 = vrot.slane %v1808_v38, 2  ;;  %v1856_v2 = vrot.slane %v1809_v34, 2 }
 0x14a   :  { %v1858_v29 = vrot.slane %v1810_v4, 2  ;;  %v1859_v56 = vrot.slane %v1811_v25, 2  ;;  %v1863_v22 = vrot.slane %v1813_v26, 2  ;;  %v1864_v52 = vrot.slane %v1814_v0, 2 }
 0x14b   :  { %v1868_v44 = vrot.slane %v1816_v35, 2  ;;  %v1861_v11 = vrot.slane %v1812_v15, 2  ;;  %v1866_v60 = vrot.slane %v1815_v54, 2  ;;  %v1869_v5 = vrot.slane %v1817_v47, 2 }
 0x14c   :  { %v1871_v31 = vrot.slane %v1818_v30, 2  ;;  %v1723_v17 = vadd.f32 %v5157_v58, %v6964_v21  ;;  %v1873_v46 = vrot.slane %v1819_v42, 2  ;;  %v1874_v36 = vrot.slane %v1820_v7, 2  ;;  %v6966_v30 = vld [vmem:[#allocation76_spill] sm:$0xff]  ;;  %v6967_v42 = vld [vmem:[#allocation61_spill] sm:$0xff] }
 0x14d   :  { %v1876_v23 = vrot.slane %v1821_v43, 2  ;;  %v1845_v12 = vsel %vm317_vm2, %v1843_v14, %v1844_v20  ;;  %v1847_v45 = vsel %vm317_vm2, %v1844_v20, %v1846_v55  ;;  %v1850_v19 = vsel %vm317_vm2, %v1848_v57, %v1849_v59  ;;  %v6970_v43 = vld [vmem:[#allocation35_spill] sm:$0xff] }
 0x14e   :  { %v1870_v3 = vsel %vm317_vm2, %v1868_v44, %v1869_v5  ;;  %v1852_v39 = vsel %vm317_vm2, %v1849_v59, %v1851_v13  ;;  %v1855_v38 = vsel %vm317_vm2, %v1853_v53, %v1854_v16  ;;  %v1865_v10 = vsel %vm317_vm2, %v1863_v22, %v1864_v52  ;;  %v6971_v59 = vld [vmem:[#allocation77_spill] sm:$0xff] }
 0x14f   :  { %v1872_v34 = vsel %vm317_vm2, %v1869_v5, %v1871_v31  ;;  %v1857_v58 = vsel %vm317_vm2, %v1854_v16, %v1856_v2  ;;  %v1860_v51 = vsel %vm317_vm2, %v1858_v29, %v1859_v56  ;;  %v1862_v4 = vsel %vm317_vm2, %v1859_v56, %v1861_v11  ;;  %v6972_v53 = vld [vmem:[#allocation49_spill] sm:$0xff]  ;;  %v6974_v2 = vld [vmem:[#allocation78_spill] sm:$0xff]  ;;  %v6977_v31 = vld [vmem:[#allocation56_spill] sm:$0xff] }
 0x150   :  { %v1867_v25 = vsel %vm317_vm2, %v1864_v52, %v1866_v60  ;;  %v1875_v15 = vsel %vm317_vm2, %v1873_v46, %v1874_v36  ;;  %v1877_v26 = vsel %vm317_vm2, %v1874_v36, %v1876_v23  ;;  %v1894_v0 = vadd.f32 %v1850_v19, %v5163_v32  ;;  %v6979_v36 = vld [vmem:[#allocation60_spill] sm:$0xff] }
 0x151   :  { %v1902_v54 = vadd.f32 %v1870_v3, %v5187_v37  ;;  %v1895_v62 = vadd.f32 %v1852_v39, %v5166_v41  ;;  %v1896_v35 = vadd.f32 %v1855_v38, %v5169_v40  ;;  %v1900_v49 = vadd.f32 %v1865_v10, %v5181_v27  ;;  %v6981_v19 = vld [vmem:[#allocation68_spill] sm:$0xff]  ;;  %v6982_v39 = vld [vmem:[#allocation69_spill] sm:$0xff]  ;;  %v6983_v10 = vld [vmem:[#allocation70_spill] sm:$0xff] }
 0x152   :  { %v1903_v47 = vadd.f32 %v1872_v34, %v5190_v48  ;;  %v1305_v28 = vadd.f32 %v6966_v30, %v6965_v63  ;;  %v1306_v7 = vadd.f32 %v6968_v33, %v6967_v42  ;;  %v1314_v14 = vadd.f32 %v6970_v43, %v6969_v24  ;;  %v6990_v63 = vld [vmem:[#allocation44_spill] sm:$0xff]  ;;  %v6992_v33 = vld [vmem:[#allocation18_spill] sm:$0xff] }
 0x153   :  { %v1892_v32 = vadd.f32 %v1845_v12, %v5153_v1  ;;  %v1897_v37 = vadd.f32 %v1857_v58, %v5172_v61  ;;  %v1898_v41 = vadd.f32 %v1860_v51, %v5175_v6  ;;  %v1899_v40 = vadd.f32 %v1862_v4, %v5178_v50  ;;  %v3205_v6 = vld [vmem:[%s6522_s0 + $0x68] sm:$0xff]  ;;  %v6984_v58 = vld [vmem:[#allocation72_spill] sm:$0xff]  ;;  %v6994_v43 = vld [vmem:[#allocation58_spill] sm:$0xff] }
 0x154   :  { %v1901_v27 = vadd.f32 %v1867_v25, %v5184_v9  ;;  %v1893_v48 = vadd.f32 %v1847_v45, %v5160_v8  ;;  %v1904_v20 = vadd.f32 %v1875_v15, %v5193_v18  ;;  %v1905_v55 = vadd.f32 %v1877_v26, %v1723_v17  ;;  %v3206_v8 = vld [vmem:[%s6523_s1 + $0x68] sm:$0xff]  ;;  %v6985_v4 = vld [vmem:[#allocation36_spill] sm:$0xff]  ;;  %v6986_v15 = vld [vmem:[#allocation38_spill] sm:$0xff] }
 0x155   :  { %v1910_v57 = vadd.f32 %v1902_v54, %v1894_v0  ;;  %v5287_v13 = vmul.f32 0.11128076, %v6971_v59  ;;  %v5290_v16 = vmul.f32 0.11128076, %v6972_v53  ;;  %v1911_v1 = vadd.f32 %v1903_v47, %v1895_v62  ;;  %v6980_v12 = vld [vmem:[#allocation63_spill] sm:$0xff]  ;;  %v6987_v0 = vld [vmem:[#allocation40_spill] sm:$0xff] }
 0x156   :  { %v1914_v61 = vadd.f32 %v1900_v49, %v1896_v35  ;;  %v5298_v50 = vmul.f32 %v3206_v8, %v3205_v6  ;;  %v5300_v9 = vmul.f32 0.036632847, %v1305_v28  ;;  %v5302_v18 = vmul.f32 0.036632847, %v1306_v7  ;;  %v6988_v62 = vld [vmem:[#allocation42_spill] sm:$0xff]  ;;  %v6989_v49 = vld [vmem:[#allocation43_spill] sm:$0xff] }
 0x157   :  { %v5305_v29 = vmul.f32 0.21674532, %v6974_v2  ;;  %v5307_v56 = vmul.f32 0.21674532, %v1314_v14  ;;  %v1915_v22 = vadd.f32 %v1901_v27, %v1897_v37  ;;  %v5309_v52 = vmul.f32 0.27068216, %v1898_v41 }
 0x158   :  { %6973 = vst [vmem:[#allocation59_spill] sm:$0xff] %v5298_v50  ;;  %v5311_v44 = vmul.f32 0.27068216, %v1899_v40  ;;  %v1906_v11 = vadd.f32 %v1904_v20, %v1892_v32  ;;  %v1907_v60 = vadd.f32 %v1905_v55, %v1893_v48  ;;  %v5313_v5 = vmul.f32 0.11128076, %v1910_v57  ;;  %v6991_v28 = vld [vmem:[#allocation45_spill] sm:$0xff] }
 0x159   :  { %v1947_v21 = vrot.slane %v6977_v31, 6  ;;  %v5316_v17 = vmul.f32 0.11128076, %v1911_v1  ;;  %v5318_v46 = vmul.f32 0.21674532, %v1914_v61  ;;  %v1948_v23 = vrot.slane %v6979_v36, 6 }
 0x15a   :  { %6975 = vst [vmem:[#allocation30_spill] sm:$0xff] %v5311_v44  ;;  %6976 = vst [vmem:[#allocation66_spill] sm:$0xff] %v5313_v5  ;;  %v1950_v45 = vrot.slane %v6980_v12, 6  ;;  %v1952_v3 = vrot.slane %v6981_v19, 6  ;;  %v1953_v38 = vrot.slane %v6982_v39, 6  ;;  %v1955_v34 = vrot.slane %v6983_v10, 6 }
 0x15b   :  { %6978 = vst [vmem:[#allocation73_spill] sm:$0xff] %v5316_v17  ;;  %v1957_v51 = vrot.slane %v6984_v58, 6  ;;  %v1958_v25 = vrot.slane %v6985_v4, 6  ;;  %v1960_v26 = vrot.slane %v6986_v15, 6  ;;  %v1962_v54 = vrot.slane %v6987_v0, 6  ;;  %v6995_v32 = vld [vmem:[#allocation3_spill] sm:$0xff] }
 0x15c   :  { %v1963_v35 = vrot.slane %v6988_v62, 6  ;;  %v1965_v47 = vrot.slane %v6989_v49, 6  ;;  %v1967_v30 = vrot.slane %v6990_v63, 6  ;;  %v1968_v42 = vrot.slane %v6991_v28, 6  ;;  %v6996_v41 = vld [vmem:[#allocation55_spill] sm:$0xff]  ;;  %v6998_v57 = vld [vmem:[#allocation82_spill] sm:$0xff] }
 0x15d   :  { %v1970_v7 = vrot.slane %v6992_v33, 6  ;;  %v5334_v24 = vmul.f32 0.036632847, %v1906_v11  ;;  %v1972_v14 = vrot.slane %v6994_v43, 6  ;;  %v1973_v37 = vrot.slane %v6995_v32, 6  ;;  %v6997_v20 = vld [vmem:[#allocation79_spill] sm:$0xff] }
 0x15e   :  { %v1975_v40 = vrot.slane %v6996_v41, 6  ;;  %v1949_v27 = vsel %vm140_vm0, %v1947_v21, %v1948_v23  ;;  %v1951_v48 = vsel %vm140_vm0, %v1948_v23, %v1950_v45  ;;  %v1977_v55 = vrot.slane %v6997_v20, 6  ;;  %v6999_v50 = vld [vmem:[#allocation86_spill] sm:$0xff] }
 0x15f   :  { %6993 = vst [vmem:[#allocation88_spill] sm:$0xff] %v5334_v24  ;;  %v1978_v59 = vrot.slane %v6998_v57, 6  ;;  %v1954_v53 = vsel %vm140_vm0, %v1952_v3, %v1953_v38  ;;  %v1956_v1 = vsel %vm140_vm0, %v1953_v38, %v1955_v34  ;;  %v1959_v61 = vsel %vm140_vm0, %v1957_v51, %v1958_v25 }
 0x160   :  { %v1961_v6 = vsel %vm140_vm0, %v1958_v25, %v1960_v26  ;;  %v1964_v8 = vsel %vm140_vm0, %v1962_v54, %v1963_v35  ;;  %v1966_v2 = vsel %vm140_vm0, %v1963_v35, %v1965_v47  ;;  %v1969_v11 = vsel %vm140_vm0, %v1967_v30, %v1968_v42 }
 0x161   :  { %v1971_v21 = vsel %vm140_vm0, %v1968_v42, %v1970_v7  ;;  %v1974_v23 = vsel %vm140_vm0, %v1972_v14, %v1973_v37  ;;  %v1976_v45 = vsel %vm140_vm0, %v1973_v37, %v1975_v40  ;;  %v1980_v3 = vrot.slane %v6999_v50, 6 }
 0x162   :  { %v1996_v38 = vadd.f32 %v1949_v27, %v6977_v31  ;;  %v1979_v34 = vsel %vm140_vm0, %v1977_v55, %v1978_v59  ;;  %v1997_v51 = vadd.f32 %v1951_v48, %v6979_v36  ;;  %v1998_v25 = vadd.f32 %v1954_v53, %v6981_v19 }
 0x163   :  { %v1999_v26 = vadd.f32 %v1956_v1, %v6982_v39  ;;  %v5359_v54 = vmul.f32 0.036632847, %v1907_v60  ;;  %v2000_v35 = vadd.f32 %v1959_v61, %v6984_v58  ;;  %v2001_v47 = vadd.f32 %v1961_v6, %v6985_v4  ;;  %v3207_v61 = vld [vmem:[%s6522_s0 + $0x70] sm:$0x3f] }
 0x164   :  { %v2002_v30 = vadd.f32 %v1964_v8, %v6987_v0  ;;  %v5364_v42 = vmul.f32 0.21674532, %v1915_v22  ;;  %v2003_v7 = vadd.f32 %v1966_v2, %v6988_v62  ;;  %v2004_v14 = vadd.f32 %v1969_v11, %v6990_v63  ;;  %v3208_v6 = vld [vmem:[%s6523_s1 + $0x70] sm:$0x3f] }
 0x165   :  { %7000 = vst [vmem:[#allocation89_spill] sm:$0xff] %v5359_v54  ;;  %v2005_v37 = vadd.f32 %v1971_v21, %v6991_v28  ;;  %v2006_v40 = vadd.f32 %v1974_v23, %v6994_v43  ;;  %v2007_v27 = vadd.f32 %v1976_v45, %v6995_v32  ;;  %v2008_v60 = vadd.f32 %v1979_v34, %v6997_v20  ;;  %v3209_v21 = vld [vmem:[%s6522_s0 + $0x78] sm:$0xff] }
 0x166   :  { %7001 = vst [vmem:[#allocation91_spill] sm:$0xff] %v5364_v42  ;;  %v5372_v48 = vmul.f32 0.036632847, %v1996_v38  ;;  %v1981_v55 = vsel %vm140_vm0, %v1978_v59, %v1980_v3  ;;  %v5375_v53 = vmul.f32 0.036632847, %v1997_v51  ;;  %v5387_v8 = vmul.f32 %v3208_v6, %v3207_v61  ;;  %v3210_v23 = vld [vmem:[%s6523_s1 + $0x78] sm:$0xff] }
 0x167   :  { %v5377_v22 = vmul.f32 0.036632847, %v1998_v25  ;;  %v5379_v1 = vmul.f32 0.036632847, %v1999_v26  ;;  %v5389_v2 = vmul.f32 0.036632847, %v2000_v35  ;;  %v5401_v45 = vmul.f32 %v3210_v23, %v3209_v21 }
 0x168   :  { %7002 = vst [vmem:[#allocation51_spill] sm:$0xff] %v5372_v48  ;;  %7003 = vst [vmem:[#allocation4_spill] sm:$0xff] %v5375_v53  ;;  %v5391_v11 = vmul.f32 0.036632847, %v2001_v47  ;;  %v5393_v59 = vmul.f32 0.036632847, %v2002_v30  ;;  %v2009_v51 = vadd.f32 %v1981_v55, %v6998_v57 }
 0x169   :  { %7004 = vst [vmem:[#allocation5_spill] sm:$0xff] %v5377_v22  ;;  %7005 = vst [vmem:[#allocation6_spill] sm:$0xff] %v5379_v1  ;;  %v5403_v3 = vmul.f32 0.036632847, %v2003_v7  ;;  %v5405_v38 = vmul.f32 0.036632847, %v2004_v14 }
 0x16a   :  { %7006 = vst [vmem:[#allocation7_spill] sm:$0xff] %v5387_v8  ;;  %7007 = vst [vmem:[#allocation8_spill] sm:$0xff] %v5389_v2  ;;  %v5407_v34 = vmul.f32 0.036632847, %v2005_v37  ;;  %v5410_v25 = vmul.f32 0.036632847, %v2006_v40 }
 0x16b   :  { %7008 = vst [vmem:[#allocation9_spill] sm:$0xff] %v5391_v11  ;;  %7009 = vst [vmem:[#allocation10_spill] sm:$0xff] %v5393_v59  ;;  %v5412_v26 = vmul.f32 0.036632847, %v2007_v27  ;;  %v5414_v35 = vmul.f32 0.036632847, %v2008_v60 }
 0x16c   :  { %7010 = vst [vmem:[#allocation11_spill] sm:$0xff] %v5401_v45  ;;  %7011 = vst [vmem:[#allocation12_spill] sm:$0xff] %v5403_v3  ;;  %v2024_v47 = vrot.slane %v6977_v31, 4  ;;  %v2025_v30 = vrot.slane %v6979_v36, 4  ;;  %v2027_v61 = vrot.slane %v6980_v12, 4  ;;  %v2029_v7 = vrot.slane %v6981_v19, 4 }
 0x16d   :  { %7012 = vst [vmem:[#allocation13_spill] sm:$0xff] %v5405_v38  ;;  %7013 = vst [vmem:[#allocation14_spill] sm:$0xff] %v5407_v34  ;;  %v2030_v14 = vrot.slane %v6982_v39, 4  ;;  %v2032_v37 = vrot.slane %v6983_v10, 4  ;;  %v2034_v55 = vrot.slane %v6984_v58, 4  ;;  %v2035_v40 = vrot.slane %v6985_v4, 4 }
 0x16e   :  { %7014 = vst [vmem:[#allocation15_spill] sm:$0xff] %v5410_v25  ;;  %7015 = vst [vmem:[#allocation50_spill] sm:$0xff] %v5412_v26  ;;  %v2037_v27 = vrot.slane %v6986_v15, 4  ;;  %v2039_v60 = vrot.slane %v6987_v0, 4  ;;  %v2040_v6 = vrot.slane %v6988_v62, 4  ;;  %v2042_v21 = vrot.slane %v6989_v49, 4 }
 0x16f   :  { %7016 = vst [vmem:[#allocation54_spill] sm:$0xff] %v5414_v35  ;;  %v2044_v23 = vrot.slane %v6990_v63, 4  ;;  %v2045_v45 = vrot.slane %v6991_v28, 4  ;;  %v2047_v8 = vrot.slane %v6992_v33, 4  ;;  %v2049_v44 = vrot.slane %v6994_v43, 4 }
 0x170   :  { %v2050_v42 = vrot.slane %v6995_v32, 4  ;;  %v2052_v17 = vrot.slane %v6996_v41, 4  ;;  %v2054_v54 = vrot.slane %v6997_v20, 4  ;;  %v2055_v5 = vrot.slane %v6998_v57, 4 }
 0x171   :  { %v5436_v24 = vmul.f32 0.036632847, %v2009_v51  ;;  %v2026_v35 = vsel %vm218_vm1, %v2024_v47, %v2025_v30  ;;  %v2028_v26 = vsel %vm218_vm1, %v2025_v30, %v2027_v61  ;;  %v2057_v25 = vrot.slane %v6999_v50, 4 }
 0x172   :  { %v2031_v34 = vsel %vm218_vm1, %v2029_v7, %v2030_v14  ;;  %v2033_v38 = vsel %vm218_vm1, %v2030_v14, %v2032_v37  ;;  %v2036_v3 = vsel %vm218_vm1, %v2034_v55, %v2035_v40  ;;  %v2038_v59 = vsel %vm218_vm1, %v2035_v40, %v2037_v27 }
 0x173   :  { %7017 = vst [vmem:[#allocation57_spill] sm:$0xff] %v5436_v24  ;;  %v2041_v11 = vsel %vm218_vm1, %v2039_v60, %v2040_v6  ;;  %v2043_v2 = vsel %vm218_vm1, %v2040_v6, %v2042_v21  ;;  %v2046_v51 = vsel %vm218_vm1, %v2044_v23, %v2045_v45  ;;  %v2048_v47 = vsel %vm218_vm1, %v2045_v45, %v2047_v8 }
 0x174   :  { %v2051_v30 = vsel %vm218_vm1, %v2049_v44, %v2050_v42  ;;  %v2053_v24 = vsel %vm218_vm1, %v2050_v42, %v2052_v17  ;;  %v2056_v7 = vsel %vm218_vm1, %v2054_v54, %v2055_v5  ;;  %v2080_v14 = vadd.f32 %v2026_v35, %v6977_v31 }
 0x175   :  { %v2058_v55 = vsel %vm218_vm1, %v2055_v5, %v2057_v25  ;;  %v2081_v40 = vadd.f32 %v2028_v26, %v6979_v36  ;;  %v2082_v60 = vadd.f32 %v2027_v61, %v6980_v12  ;;  %v2083_v6 = vadd.f32 %v2031_v34, %v6981_v19 }
 0x176   :  { %v2084_v23 = vadd.f32 %v2033_v38, %v6982_v39  ;;  %v2085_v45 = vadd.f32 %v2032_v37, %v6983_v10  ;;  %v2086_v44 = vadd.f32 %v2036_v3, %v6984_v58  ;;  %v2087_v42 = vadd.f32 %v2038_v59, %v6985_v4 }
 0x177   :  { %v2088_v54 = vadd.f32 %v2037_v27, %v6986_v15  ;;  %v2089_v35 = vadd.f32 %v2041_v11, %v6987_v0  ;;  %v2090_v5 = vadd.f32 %v2043_v2, %v6988_v62  ;;  %v2091_v26 = vadd.f32 %v2042_v21, %v6989_v49 }
 0x178   :  { %v2092_v61 = vadd.f32 %v2046_v51, %v6990_v63  ;;  %v2093_v34 = vadd.f32 %v2048_v47, %v6991_v28  ;;  %v2094_v38 = vadd.f32 %v2047_v8, %v6992_v33  ;;  %v2095_v37 = vadd.f32 %v2051_v30, %v6994_v43 }
 0x179   :  { %v2096_v3 = vadd.f32 %v2053_v24, %v6995_v32  ;;  %v2097_v59 = vadd.f32 %v2052_v17, %v6996_v41  ;;  %v5471_v1 = vmul.f32 0.11128076, %v2080_v14  ;;  %v5473_v27 = vmul.f32 0.11128076, %v2081_v40 }
 0x17a   :  { %v2098_v2 = vadd.f32 %v2056_v7, %v6997_v20  ;;  %v5476_v11 = vmul.f32 0.11128076, %v2082_v60  ;;  %v5478_v21 = vmul.f32 0.11128076, %v2083_v6  ;;  %v5480_v51 = vmul.f32 0.11128076, %v2084_v23 }
 0x17b   :  { %v2099_v8 = vadd.f32 %v2058_v55, %v6998_v57  ;;  %v5483_v47 = vmul.f32 0.11128076, %v2085_v45  ;;  %v5485_v30 = vmul.f32 0.11128076, %v2086_v44  ;;  %v5487_v24 = vmul.f32 0.11128076, %v2087_v42 }
 0x17c   :  { %7018 = vst [vmem:[#allocation62_spill] sm:$0xff] %v5478_v21  ;;  %7019 = vst [vmem:[#allocation64_spill] sm:$0xff] %v5480_v51  ;;  %v2100_v17 = vadd.f32 %v2057_v25, %v6999_v50  ;;  %v5490_v14 = vmul.f32 0.11128076, %v2088_v54  ;;  %v5492_v40 = vmul.f32 0.11128076, %v2089_v35 }
 0x17d   :  { %7020 = vst [vmem:[#allocation65_spill] sm:$0xff] %v5483_v47  ;;  %7021 = vst [vmem:[#allocation34_spill] sm:$0xff] %v5485_v30  ;;  %v5494_v7 = vmul.f32 0.11128076, %v2090_v5  ;;  %v3211_v60 = vld [vmem:[%s6522_s0 + $0x80] sm:$0xff]  ;;  %v2128_v22 = vrot.slane %v6982_v39, 2 }
 0x17e   :  { %7022 = vst [vmem:[#allocation2_spill] sm:$0xff] %v5487_v24  ;;  %7023 = vst [vmem:[#allocation80_spill] sm:$0xff] %v5490_v14  ;;  %v3212_v55 = vld [vmem:[%s6523_s1 + $0x80] sm:$0xff]  ;;  %v5504_v23 = vmul.f32 0.11128076, %v2091_v26  ;;  %v2142_v53 = vrot.slane %v6990_v63, 2 }
 0x17f   :  { %7024 = vst [vmem:[#allocation81_spill] sm:$0xff] %v5492_v40  ;;  %7025 = vst [vmem:[#allocation83_spill] sm:$0xff] %v5494_v7  ;;  %v5502_v6 = vmul.f32 %v3212_v55, %v3211_v60  ;;  %v5506_v45 = vmul.f32 0.11128076, %v2092_v61  ;;  %v5508_v25 = vmul.f32 0.11128076, %v2093_v34 }
 0x180   :  { %7027 = vst [vmem:[#allocation85_spill] sm:$0xff] %v5504_v23  ;;  %v3213_v44 = vld [vmem:[%s6522_s0 + $0x88] sm:$0x3f]  ;;  %v5518_v35 = vmul.f32 0.11128076, %v2094_v38  ;;  %v3215_v61 = vld [vmem:[%s6522_s0 + $0x90] sm:$0xff] }
 0x181   :  { %7026 = vst [vmem:[#allocation84_spill] sm:$0xff] %v5502_v6  ;;  %7028 = vst [vmem:[#allocation16_spill] sm:$0xff] %v5506_v45  ;;  %v3214_v42 = vld [vmem:[%s6523_s1 + $0x88] sm:$0x3f]  ;;  %v5520_v5 = vmul.f32 0.11128076, %v2095_v37 }
 0x182   :  { %7029 = vst [vmem:[#allocation17_spill] sm:$0xff] %v5508_v25  ;;  %v5516_v54 = vmul.f32 %v3214_v42, %v3213_v44  ;;  %7031 = vst [vmem:[#allocation29_spill] sm:$0xff] %v5518_v35  ;;  %v5522_v26 = vmul.f32 0.11128076, %v2096_v3  ;;  %v3216_v34 = vld [vmem:[%s6523_s1 + $0x90] sm:$0xff]  ;;  %v2122_v3 = vrot.slane %v6977_v31, 2 }
 0x183   :  { %7032 = vst [vmem:[#allocation37_spill] sm:$0xff] %v5520_v5  ;;  %v5530_v60 = vmul.f32 %v3216_v34, %v3215_v61  ;;  %v5532_v55 = vmul.f32 0.11128076, %v2097_v59  ;;  %v5534_v44 = vmul.f32 0.11128076, %v2098_v2  ;;  %v2123_v42 = vrot.slane %v6979_v36, 2 }
 0x184   :  { %7030 = vst [vmem:[#allocation21_spill] sm:$0xff] %v5516_v54  ;;  %7033 = vst [vmem:[#allocation41_spill] sm:$0xff] %v5522_v26  ;;  %v5536_v38 = vmul.f32 0.11128076, %v2099_v8  ;;  %v5538_v37 = vmul.f32 0.11128076, %v2100_v17 }
 0x185   :  { %7034 = vst [vmem:[#allocation53_spill] sm:$0xff] %v5530_v60  ;;  %7035 = vst [vmem:[#allocation75_spill] sm:$0xff] %v5532_v55  ;;  %v2125_v54 = vrot.slane %v6980_v12, 2  ;;  %v2127_v6 = vrot.slane %v6981_v19, 2  ;;  %v2130_v61 = vrot.slane %v6983_v10, 2  ;;  %v2132_v59 = vrot.slane %v6984_v58, 2 }
 0x186   :  { %7036 = vst [vmem:[#allocation52_spill] sm:$0xff] %v5534_v44  ;;  %7037 = vst [vmem:[#allocation87_spill] sm:$0xff] %v5536_v38  ;;  %v2133_v2 = vrot.slane %v6985_v4, 2  ;;  %v2135_v8 = vrot.slane %v6986_v15, 2  ;;  %v2137_v17 = vrot.slane %v6987_v0, 2  ;;  %v2138_v34 = vrot.slane %v6988_v62, 2 }
 0x187   :  { %7038 = vst [vmem:[#allocation31_spill] sm:$0xff] %v5538_v37  ;;  %v2140_v60 = vrot.slane %v6989_v49, 2  ;;  %v2143_v48 = vrot.slane %v6991_v28, 2  ;;  %v2145_v37 = vrot.slane %v6992_v33, 2  ;;  %v2124_v38 = vsel %vm317_vm2, %v2122_v3, %v2123_v42 }
 0x188   :  { %v2147_v44 = vrot.slane %v6994_v43, 2  ;;  %v2148_v55 = vrot.slane %v6995_v32, 2  ;;  %v2150_v26 = vrot.slane %v6996_v41, 2  ;;  %v2126_v5 = vsel %vm317_vm2, %v2123_v42, %v2125_v54 }
 0x189   :  { %v2152_v35 = vrot.slane %v6997_v20, 2  ;;  %v2153_v25 = vrot.slane %v6998_v57, 2  ;;  %v2155_v45 = vrot.slane %v6999_v50, 2  ;;  %v2129_v23 = vsel %vm317_vm2, %v2127_v6, %v2128_v22 }
 0x18a   :  { %v2131_v7 = vsel %vm317_vm2, %v2128_v22, %v2130_v61  ;;  %v2134_v3 = vsel %vm317_vm2, %v2132_v59, %v2133_v2  ;;  %v2136_v40 = vsel %vm317_vm2, %v2133_v2, %v2135_v8  ;;  %v2139_v14 = vsel %vm317_vm2, %v2137_v17, %v2138_v34 }
 0x18b   :  { %v2141_v24 = vsel %vm317_vm2, %v2138_v34, %v2140_v60  ;;  %v2144_v42 = vsel %vm317_vm2, %v2142_v53, %v2143_v48  ;;  %v2146_v30 = vsel %vm317_vm2, %v2143_v48, %v2145_v37  ;;  %v2149_v47 = vsel %vm317_vm2, %v2147_v44, %v2148_v55 }
 0x18c   :  { %v2151_v51 = vsel %vm317_vm2, %v2148_v55, %v2150_v26  ;;  %v2178_v6 = vadd.f32 %v2124_v38, %v6977_v31  ;;  %v2179_v22 = vadd.f32 %v2126_v5, %v6979_v36  ;;  %v2154_v59 = vsel %vm317_vm2, %v2152_v35, %v2153_v25 }
 0x18d   :  { %v2156_v2 = vsel %vm317_vm2, %v2153_v25, %v2155_v45  ;;  %v2180_v17 = vadd.f32 %v2125_v54, %v6980_v12  ;;  %v2181_v34 = vadd.f32 %v2129_v23, %v6981_v19  ;;  %v2182_v53 = vadd.f32 %v2131_v7, %v6982_v39 }
 0x18e   :  { %v2183_v48 = vadd.f32 %v2130_v61, %v6983_v10  ;;  %v2184_v44 = vadd.f32 %v2134_v3, %v6984_v58  ;;  %v2185_v55 = vadd.f32 %v2136_v40, %v6985_v4  ;;  %v2186_v38 = vadd.f32 %v2135_v8, %v6986_v15 }
 0x18f   :  { %v2187_v5 = vadd.f32 %v2139_v14, %v6987_v0  ;;  %v2188_v35 = vadd.f32 %v2141_v24, %v6988_v62  ;;  %v2189_v25 = vadd.f32 %v2140_v60, %v6989_v49  ;;  %v2190_v54 = vadd.f32 %v2144_v42, %v6990_v63 }
 0x190   :  { %v2191_v23 = vadd.f32 %v2146_v30, %v6991_v28  ;;  %v2192_v7 = vadd.f32 %v2145_v37, %v6992_v33  ;;  %v2193_v61 = vadd.f32 %v2149_v47, %v6994_v43  ;;  %v2194_v3 = vadd.f32 %v2151_v51, %v6995_v32 }
 0x191   :  { %v2195_v40 = vadd.f32 %v2150_v26, %v6996_v41  ;;  %v5593_v21 = vmul.f32 0.21674532, %v2178_v6  ;;  %v5595_v8 = vmul.f32 0.21674532, %v2179_v22  ;;  %v2196_v24 = vadd.f32 %v2154_v59, %v6997_v20 }
 0x192   :  { %v5598_v14 = vmul.f32 0.21674532, %v2180_v17  ;;  %v5600_v60 = vmul.f32 0.21674532, %v2181_v34  ;;  %v5602_v42 = vmul.f32 0.21674532, %v2182_v53  ;;  %v2197_v30 = vadd.f32 %v2156_v2, %v6998_v57 }
 0x193   :  { %v5605_v37 = vmul.f32 0.21674532, %v2183_v48  ;;  %v5607_v47 = vmul.f32 0.21674532, %v2184_v44  ;;  %v5609_v51 = vmul.f32 0.21674532, %v2185_v55  ;;  %v2198_v26 = vadd.f32 %v2155_v45, %v6999_v50 }
 0x194   :  { %v5612_v6 = vmul.f32 0.21674532, %v2186_v38  ;;  %v5614_v22 = vmul.f32 0.21674532, %v2187_v5  ;;  %v5616_v59 = vmul.f32 0.21674532, %v2188_v35 }
 0x195   :  { %v3217_v17 = vld [vmem:[%s6522_s0 + $0x98] sm:$0xff]  ;;  %v5626_v53 = vmul.f32 0.21674532, %v2189_v25  ;;  %v5628_v48 = vmul.f32 0.21674532, %v2190_v54  ;;  %v7043_v44 = vld [vmem:[#allocation24_spill] sm:$0xff] }
 0x196   :  { %7039 = vst [vmem:[#allocation76_spill] sm:$0xff] %v5612_v6  ;;  %7040 = vst [vmem:[#allocation61_spill] sm:$0xff] %v5614_v22  ;;  %v3218_v2 = vld [vmem:[%s6523_s1 + $0x98] sm:$0xff]  ;;  %v5630_v45 = vmul.f32 0.21674532, %v2191_v23  ;;  %v7044_v55 = vld [vmem:[#allocation19_spill] sm:$0xff] }
 0x197   :  { %7041 = vst [vmem:[#allocation47_spill] sm:$0xff] %v5616_v59  ;;  %v5624_v34 = vmul.f32 %v3218_v2, %v3217_v17  ;;  %v5634_v38 = vadd.f32 %v7044_v55, %v7043_v44  ;;  %v5636_v5 = vmul.f32 0.21674532, %v2192_v7  ;;  %v5638_v35 = vmul.f32 0.21674532, %v2193_v61  ;;  %v7047_v22 = vld [vmem:[#allocation26_spill] sm:$0xff] }
 0x198   :  { %v5640_v59 = vmul.f32 0.21674532, %v2194_v3  ;;  %v7048_v6 = vld [vmem:[#allocation22_spill] sm:$0xff]  ;;  %v5646_v25 = vmul.f32 0.21674532, %v2195_v40  ;;  %v7053_v2 = vld [vmem:[#allocation27_spill] sm:$0xff] }
 0x199   :  { %7042 = vst [vmem:[#allocation25_spill] sm:$0xff] %v5624_v34  ;;  %7045 = vst [vmem:[#allocation35_spill] sm:$0xff] %v5634_v38  ;;  %v5644_v17 = vadd.f32 %v7048_v6, %v7047_v22  ;;  %v5648_v54 = vmul.f32 0.21674532, %v2196_v24  ;;  %v5650_v23 = vmul.f32 0.21674532, %v2197_v30 }
 0x19a   :  { %7046 = vst [vmem:[#allocation77_spill] sm:$0xff] %v5640_v59  ;;  %7050 = vst [vmem:[#allocation78_spill] sm:$0xff] %v5646_v25  ;;  %v7054_v34 = vld [vmem:[#allocation23_spill] sm:$0xff]  ;;  %v5656_v7 = vmul.f32 0.21674532, %v2198_v26  ;;  %v7057_v6 = vld [vmem:[#allocation28_spill] sm:$0xff] }
 0x19b   :  { %7049 = vst [vmem:[#allocation49_spill] sm:$0xff] %v5644_v17  ;;  %7051 = vst [vmem:[#allocation56_spill] sm:$0xff] %v5648_v54  ;;  %v5654_v44 = vadd.f32 %v7054_v34, %v7053_v2  ;;  %v5659_v61 = vmul.f32 0.27068216, %v6977_v31  ;;  %v5662_v3 = vmul.f32 0.27068216, %v6979_v36 }
 0x19c   :  { %7052 = vst [vmem:[#allocation60_spill] sm:$0xff] %v5650_v23  ;;  %7056 = vst [vmem:[#allocation68_spill] sm:$0xff] %v5656_v7  ;;  %v7058_v22 = vld [vmem:[#allocation20_spill] sm:$0xff]  ;;  %v5669_v24 = vmul.f32 0.27068216, %v6980_v12  ;;  %v5692_v12 = vadd.f32 %v5287_v13, %v5300_v9  ;;  %v7064_v9 = vld [vmem:[#allocation33_spill] sm:$0xff] }
 0x19d   :  { %7055 = vst [vmem:[#allocation63_spill] sm:$0xff] %v5654_v44  ;;  %v5666_v40 = vadd.f32 %v7058_v22, %v7057_v6  ;;  %v5672_v30 = vmul.f32 0.27068216, %v6981_v19  ;;  %v5675_v34 = vmul.f32 0.27068216, %v6982_v39  ;;  %v7060_v26 = vld [vmem:[#allocation32_spill] sm:$0xff] }
 0x19e   :  { %v5679_v31 = vadd.f32 %v7060_v26, %v5305_v29  ;;  %v5682_v36 = vmul.f32 0.27068216, %v6983_v10  ;;  %v5685_v55 = vmul.f32 0.27068216, %v6984_v58  ;;  %v5688_v2 = vmul.f32 0.27068216, %v6985_v4 }
 0x19f   :  { %7059 = vst [vmem:[#allocation69_spill] sm:$0xff] %v5666_v40  ;;  %7062 = vst [vmem:[#allocation72_spill] sm:$0xff] %v5692_v12  ;;  %v5695_v19 = vmul.f32 0.27068216, %v6986_v15  ;;  %v5698_v39 = vmul.f32 0.27068216, %v6987_v0  ;;  %v5705_v10 = vadd.f32 %v5290_v16, %v5302_v18  ;;  %v5718_v15 = vadd.f32 %v7064_v9, %v5307_v56 }
 0x1a0   :  { %7061 = vst [vmem:[#allocation70_spill] sm:$0xff] %v5679_v31  ;;  %v5701_v29 = vmul.f32 0.27068216, %v6988_v62  ;;  %v5708_v58 = vmul.f32 0.27068216, %v6989_v49  ;;  %v2263_v56 = vrot.slane %v5473_v27, 1 }
 0x1a1   :  { %7063 = vst [vmem:[#allocation36_spill] sm:$0xff] %v5705_v10  ;;  %v5711_v4 = vmul.f32 0.27068216, %v6990_v63  ;;  %v5714_v13 = vmul.f32 0.27068216, %v6991_v28  ;;  %7065 = vst [vmem:[#allocation38_spill] sm:$0xff] %v5718_v15  ;;  %v5739_v28 = vadd.f32 %v5309_v52, %v5318_v46 }
 0x1a2   :  { %v5721_v0 = vmul.f32 0.27068216, %v6992_v33  ;;  %v5724_v62 = vmul.f32 0.27068216, %v6994_v43  ;;  %v5727_v16 = vmul.f32 0.27068216, %v6995_v32 }
 0x1a3   :  { %v5730_v18 = vmul.f32 0.27068216, %v6996_v41  ;;  %v5733_v49 = vmul.f32 0.27068216, %v6997_v20  ;;  %v2262_v63 = vrot.slane %v5471_v1, 1  ;;  %7066 = vst [vmem:[#allocation40_spill] sm:$0xff] %v5739_v28 }
 0x1a4   :  { %v5742_v33 = vmul.f32 0.27068216, %v6998_v57  ;;  %v5745_v43 = vmul.f32 0.27068216, %v6999_v50  ;;  %v2265_v32 = vrot.slane %v5476_v11, 1  ;;  %v7067_v41 = vld [vmem:[#allocation62_spill] sm:$0xff] }
 0x1a5   :  { %v2267_v6 = vrot.slane %v7067_v41, 1  ;;  %v7068_v20 = vld [vmem:[#allocation64_spill] sm:$0xff]  ;;  %v7069_v26 = vld [vmem:[#allocation65_spill] sm:$0xff]  ;;  %v7070_v9 = vld [vmem:[#allocation34_spill] sm:$0xff]  ;;  %v2264_v15 = vsel %vm458_vm3, %v2262_v63, %v2263_v56 }
 0x1a6   :  { %v2268_v22 = vrot.slane %v7068_v20, 1  ;;  %v2270_v1 = vrot.slane %v7069_v26, 1  ;;  %v2272_v27 = vrot.slane %v7070_v9, 1  ;;  %v7071_v52 = vld [vmem:[#allocation2_spill] sm:$0xff]  ;;  %v7072_v28 = vld [vmem:[#allocation80_spill] sm:$0xff]  ;;  %v7073_v10 = vld [vmem:[#allocation81_spill] sm:$0xff]  ;;  %v2266_v26 = vsel %vm458_vm3, %v2263_v56, %v2265_v32 }
 0x1a7   :  { %v2273_v46 = vrot.slane %v7071_v52, 1  ;;  %v2275_v57 = vrot.slane %v7072_v28, 1  ;;  %v2277_v31 = vrot.slane %v7073_v10, 1  ;;  %v7074_v50 = vld [vmem:[#allocation83_spill] sm:$0xff]  ;;  %v7075_v40 = vld [vmem:[#allocation85_spill] sm:$0xff]  ;;  %v7076_v44 = vld [vmem:[#allocation16_spill] sm:$0xff] }
 0x1a8   :  { %v2278_v12 = vrot.slane %v7074_v50, 1  ;;  %v2280_v11 = vrot.slane %v7075_v40, 1  ;;  %v2282_v41 = vrot.slane %v7076_v44, 1  ;;  %v7077_v38 = vld [vmem:[#allocation17_spill] sm:$0xff]  ;;  %v2269_v28 = vsel %vm458_vm3, %v2267_v6, %v2268_v22  ;;  %v7081_v54 = vld [vmem:[#allocation75_spill] sm:$0xff]  ;;  %v7082_v25 = vld [vmem:[#allocation52_spill] sm:$0xff] }
 0x1a9   :  { %v2283_v20 = vrot.slane %v7077_v38, 1  ;;  %v7078_v17 = vld [vmem:[#allocation29_spill] sm:$0xff]  ;;  %v2271_v10 = vsel %vm458_vm3, %v2268_v22, %v2270_v1  ;;  %v2290_v50 = vrot.slane %v7081_v54, 1  ;;  %v2292_v40 = vrot.slane %v7082_v25, 1  ;;  %v7083_v59 = vld [vmem:[#allocation87_spill] sm:$0xff] }
 0x1aa   :  { %v2285_v9 = vrot.slane %v7078_v17, 1  ;;  %v7079_v7 = vld [vmem:[#allocation37_spill] sm:$0xff]  ;;  %v2274_v44 = vsel %vm458_vm3, %v2272_v27, %v2273_v46  ;;  %v2276_v38 = vsel %vm458_vm3, %v2273_v46, %v2275_v57  ;;  %v2293_v56 = vrot.slane %v7083_v59, 1  ;;  %v7084_v32 = vld [vmem:[#allocation31_spill] sm:$0xff]  ;;  %v7086_v46 = vld [vmem:[#allocation4_spill] sm:$0xff] }
 0x1ab   :  { %v2287_v63 = vrot.slane %v7079_v7, 1  ;;  %v7080_v23 = vld [vmem:[#allocation41_spill] sm:$0xff]  ;;  %v2295_v17 = vrot.slane %v7084_v32, 1  ;;  %v2279_v7 = vsel %vm458_vm3, %v2277_v31, %v2278_v12  ;;  %v2284_v6 = vsel %vm458_vm3, %v2282_v41, %v2283_v20  ;;  %v7085_v1 = vld [vmem:[#allocation51_spill] sm:$0xff] }
 0x1ac   :  { %v2288_v52 = vrot.slane %v7080_v23, 1  ;;  %v2281_v23 = vsel %vm458_vm3, %v2278_v12, %v2280_v11  ;;  %v2286_v22 = vsel %vm458_vm3, %v2283_v20, %v2285_v9  ;;  %v5779_v27 = vadd.f32 %v2264_v15, %v7085_v1  ;;  %v7087_v32 = vld [vmem:[#allocation5_spill] sm:$0xff]  ;;  %v7088_v11 = vld [vmem:[#allocation6_spill] sm:$0xff]  ;;  %v7089_v20 = vld [vmem:[#allocation8_spill] sm:$0xff] }
 0x1ad   :  { %v5782_v57 = vadd.f32 %v2266_v26, %v7086_v46  ;;  %v2294_v59 = vsel %vm458_vm3, %v2292_v40, %v2293_v56  ;;  %v2296_v31 = vsel %vm458_vm3, %v2293_v56, %v2295_v17  ;;  %v5787_v12 = vadd.f32 %v2269_v28, %v7087_v32  ;;  %v7091_v15 = vld [vmem:[#allocation10_spill] sm:$0xff]  ;;  %v7092_v26 = vld [vmem:[#allocation12_spill] sm:$0xff]  ;;  %v7093_v40 = vld [vmem:[#allocation13_spill] sm:$0xff] }
 0x1ae   :  { %v2289_v54 = vsel %vm458_vm3, %v2287_v63, %v2288_v52  ;;  %v2291_v25 = vsel %vm458_vm3, %v2288_v52, %v2290_v50  ;;  %v5790_v41 = vadd.f32 %v2271_v10, %v7088_v11  ;;  %v5793_v9 = vadd.f32 %v2274_v44, %v7089_v20  ;;  %v7090_v63 = vld [vmem:[#allocation9_spill] sm:$0xff]  ;;  %v7094_v28 = vld [vmem:[#allocation14_spill] sm:$0xff]  ;;  %v7095_v46 = vld [vmem:[#allocation15_spill] sm:$0xff] }
 0x1af   :  { %v5796_v52 = vadd.f32 %v2276_v38, %v7090_v63  ;;  %v5799_v50 = vadd.f32 %v2279_v7, %v7091_v15  ;;  %v5802_v1 = vadd.f32 %v2281_v23, %v7092_v26  ;;  %v5805_v56 = vadd.f32 %v2284_v6, %v7093_v40  ;;  %v7096_v38 = vld [vmem:[#allocation50_spill] sm:$0xff]  ;;  %v7098_v6 = vld [vmem:[#allocation57_spill] sm:$0xff] }
 0x1b0   :  { %v5808_v17 = vadd.f32 %v2286_v22, %v7094_v28  ;;  %v2346_v10 = vrot.slane %v5659_v61, 1  ;;  %v2347_v44 = vrot.slane %v5662_v3, 1  ;;  %v5813_v32 = vadd.f32 %v2289_v54, %v7095_v46  ;;  %v7097_v7 = vld [vmem:[#allocation54_spill] sm:$0xff] }
 0x1b1   :  { %v5816_v11 = vadd.f32 %v2291_v25, %v7096_v38  ;;  %v5819_v20 = vadd.f32 %v2294_v59, %v7097_v7  ;;  %v2349_v23 = vrot.slane %v5669_v24, 1  ;;  %v5823_v63 = vadd.f32 %v2296_v31, %v7098_v6 }
 0x1b2   :  { %v2351_v22 = vrot.slane %v5672_v30, 1  ;;  %v2352_v61 = vrot.slane %v5675_v34, 1  ;;  %v2354_v3 = vrot.slane %v5682_v36, 1  ;;  %v2348_v54 = vsel %vm458_vm3, %v2346_v10, %v2347_v44 }
 0x1b3   :  { %v2356_v15 = vrot.slane %v5685_v55, 1  ;;  %v2357_v25 = vrot.slane %v5688_v2, 1  ;;  %v2359_v59 = vrot.slane %v5695_v19, 1  ;;  %v2361_v26 = vrot.slane %v5698_v39, 1 }
 0x1b4   :  { %v2362_v24 = vrot.slane %v5701_v29, 1  ;;  %v2364_v31 = vrot.slane %v5708_v58, 1  ;;  %v2366_v30 = vrot.slane %v5711_v4, 1  ;;  %v2350_v34 = vsel %vm458_vm3, %v2347_v44, %v2349_v23 }
 0x1b5   :  { %v2367_v36 = vrot.slane %v5714_v13, 1  ;;  %v2369_v40 = vrot.slane %v5721_v0, 1  ;;  %v2371_v55 = vrot.slane %v5724_v62, 1  ;;  %v2353_v2 = vsel %vm458_vm3, %v2351_v22, %v2352_v61 }
 0x1b6   :  { %v2372_v19 = vrot.slane %v5727_v16, 1  ;;  %v2374_v39 = vrot.slane %v5730_v18, 1  ;;  %v2376_v29 = vrot.slane %v5733_v49, 1  ;;  %v2355_v58 = vsel %vm458_vm3, %v2352_v61, %v2354_v3 }
 0x1b7   :  { %v2358_v4 = vsel %vm458_vm3, %v2356_v15, %v2357_v25  ;;  %v2377_v28 = vrot.slane %v5742_v33, 1  ;;  %v2379_v13 = vrot.slane %v5745_v43, 1  ;;  %v2360_v0 = vsel %vm458_vm3, %v2357_v25, %v2359_v59 }
 0x1b8   :  { %v2363_v62 = vsel %vm458_vm3, %v2361_v26, %v2362_v24  ;;  %v2365_v10 = vsel %vm458_vm3, %v2362_v24, %v2364_v31  ;;  %v2368_v16 = vsel %vm458_vm3, %v2366_v30, %v2367_v36  ;;  %v2370_v18 = vsel %vm458_vm3, %v2367_v36, %v2369_v40  ;;  %v7099_v26 = vld [vmem:[#allocation76_spill] sm:$0xff]  ;;  %v7101_v30 = vld [vmem:[#allocation47_spill] sm:$0xff] }
 0x1b9   :  { %v2373_v49 = vsel %vm458_vm3, %v2371_v55, %v2372_v19  ;;  %v2375_v44 = vsel %vm458_vm3, %v2372_v19, %v2374_v39  ;;  %v2402_v46 = vadd.f32 %v2348_v54, %v5593_v21  ;;  %v2378_v33 = vsel %vm458_vm3, %v2376_v29, %v2377_v28  ;;  %v7100_v54 = vld [vmem:[#allocation61_spill] sm:$0xff]  ;;  %v7104_v29 = vld [vmem:[#allocation56_spill] sm:$0xff] }
 0x1ba   :  { %v2380_v43 = vsel %vm458_vm3, %v2377_v28, %v2379_v13  ;;  %v2403_v38 = vadd.f32 %v2350_v34, %v5595_v8  ;;  %v2404_v7 = vadd.f32 %v2349_v23, %v5598_v14  ;;  %v2405_v6 = vadd.f32 %v2353_v2, %v5600_v60 }
 0x1bb   :  { %v2406_v22 = vadd.f32 %v2355_v58, %v5602_v42  ;;  %v2407_v61 = vadd.f32 %v2354_v3, %v5605_v37  ;;  %v2408_v15 = vadd.f32 %v2358_v4, %v5607_v47  ;;  %v2409_v25 = vadd.f32 %v2360_v0, %v5609_v51  ;;  %v7102_v51 = vld [vmem:[#allocation77_spill] sm:$0xff] }
 0x1bc   :  { %v2410_v21 = vadd.f32 %v2359_v59, %v7099_v26  ;;  %v2411_v24 = vadd.f32 %v2363_v62, %v7100_v54  ;;  %v2412_v36 = vadd.f32 %v2365_v10, %v7101_v30  ;;  %v2413_v8 = vadd.f32 %v2364_v31, %v5626_v53  ;;  %v7103_v59 = vld [vmem:[#allocation78_spill] sm:$0xff]  ;;  %v7105_v53 = vld [vmem:[#allocation60_spill] sm:$0xff] }
 0x1bd   :  { %v2414_v14 = vadd.f32 %v2368_v16, %v5628_v48  ;;  %v2415_v60 = vadd.f32 %v2370_v18, %v5630_v45  ;;  %v2416_v42 = vadd.f32 %v2369_v40, %v5636_v5  ;;  %v2417_v37 = vadd.f32 %v2373_v49, %v5638_v35  ;;  %v7106_v48 = vld [vmem:[#allocation68_spill] sm:$0xff] }
 0x1be   :  { %v2444_v23 = vrot.slane %v2402_v46, 2  ;;  %v2445_v47 = vrot.slane %v2403_v38, 2  ;;  %v2447_v3 = vrot.slane %v2404_v7, 2  ;;  %v2418_v34 = vadd.f32 %v2375_v44, %v7102_v51  ;;  %v7108_v51 = vld [vmem:[#allocation66_spill] sm:$0xff] }
 0x1bf   :  { %v2419_v55 = vadd.f32 %v2374_v39, %v7103_v59  ;;  %v2449_v2 = vrot.slane %v2405_v6, 2  ;;  %v2450_v19 = vrot.slane %v2406_v22, 2  ;;  %v2420_v58 = vadd.f32 %v2378_v33, %v7104_v29 }
 0x1c0   :  { %v2421_v31 = vadd.f32 %v2380_v43, %v7105_v53  ;;  %v2422_v4 = vadd.f32 %v2379_v13, %v7106_v48  ;;  %v2452_v45 = vrot.slane %v2407_v61, 2  ;;  %v2446_v5 = vsel %vm317_vm2, %v2444_v23, %v2445_v47 }
 0x1c1   :  { %v2454_v40 = vrot.slane %v2408_v15, 2  ;;  %v2455_v35 = vrot.slane %v2409_v25, 2  ;;  %v2457_v28 = vrot.slane %v2410_v21, 2  ;;  %v2448_v0 = vsel %vm317_vm2, %v2445_v47, %v2447_v3  ;;  %v7107_v3 = vld [vmem:[#allocation88_spill] sm:$0xff] }
 0x1c2   :  { %v2451_v62 = vsel %vm317_vm2, %v2449_v2, %v2450_v19  ;;  %v2459_v10 = vrot.slane %v2411_v24, 2  ;;  %v2464_v39 = vrot.slane %v2414_v14, 2  ;;  %v2460_v16 = vrot.slane %v2412_v36, 2  ;;  %v7111_v2 = vld [vmem:[#allocation91_spill] sm:$0xff] }
 0x1c3   :  { %v2462_v18 = vrot.slane %v2413_v8, 2  ;;  %v2465_v49 = vrot.slane %v2415_v60, 2  ;;  %v2469_v44 = vrot.slane %v2417_v37, 2  ;;  %v2453_v46 = vsel %vm317_vm2, %v2450_v19, %v2452_v45  ;;  %v7114_v45 = vld [vmem:[#allocation35_spill] sm:$0xff] }
 0x1c4   :  { %v2470_v33 = vrot.slane %v2418_v34, 2  ;;  %v2472_v13 = vrot.slane %v2419_v55, 2  ;;  %v2474_v43 = vrot.slane %v2420_v58, 2  ;;  %v2456_v38 = vsel %vm317_vm2, %v2454_v40, %v2455_v35  ;;  %v7110_v55 = vld [vmem:[#allocation73_spill] sm:$0xff]  ;;  %v7116_v40 = vld [vmem:[#allocation63_spill] sm:$0xff] }
 0x1c5   :  { %v2458_v7 = vsel %vm317_vm2, %v2455_v35, %v2457_v28  ;;  %v2475_v6 = vrot.slane %v2421_v31, 2  ;;  %v2477_v22 = vrot.slane %v2422_v4, 2  ;;  %v2466_v61 = vsel %vm317_vm2, %v2464_v39, %v2465_v49  ;;  %v7117_v35 = vld [vmem:[#allocation69_spill] sm:$0xff]  ;;  %v7123_v39 = vld [vmem:[#allocation38_spill] sm:$0xff] }
 0x1c6   :  { %v2467_v15 = vrot.slane %v2416_v42, 2  ;;  %v2471_v25 = vsel %vm317_vm2, %v2469_v44, %v2470_v33  ;;  %v2473_v26 = vsel %vm317_vm2, %v2470_v33, %v2472_v13  ;;  %v2461_v21 = vsel %vm317_vm2, %v2459_v10, %v2460_v16 }
 0x1c7   :  { %v2463_v54 = vsel %vm317_vm2, %v2460_v16, %v2462_v18  ;;  %v2476_v24 = vsel %vm317_vm2, %v2474_v43, %v2475_v6  ;;  %v2478_v30 = vsel %vm317_vm2, %v2475_v6, %v2477_v22  ;;  %v2493_v36 = vadd.f32 %v2446_v5, %v5779_v27  ;;  %v7128_v43 = vld [vmem:[#allocation67_spill] sm:$0xff] }
 0x1c8   :  { %v2494_v8 = vadd.f32 %v2448_v0, %v5782_v57  ;;  %v2495_v14 = vadd.f32 %v2451_v62, %v5787_v12  ;;  %v2496_v60 = vadd.f32 %v2453_v46, %v5790_v41  ;;  %v2497_v42 = vadd.f32 %v2456_v38, %v5793_v9  ;;  %v7109_v12 = vld [vmem:[#allocation89_spill] sm:$0xff]  ;;  %v7112_v9 = vld [vmem:[#allocation30_spill] sm:$0xff]  ;;  %v7119_v0 = vld [vmem:[#allocation72_spill] sm:$0xff] }
 0x1c9   :  { %v2501_v37 = vadd.f32 %v2466_v61, %v5805_v56  ;;  %v2503_v23 = vadd.f32 %v2471_v25, %v5813_v32  ;;  %v2504_v47 = vadd.f32 %v2473_v26, %v5816_v11  ;;  %v1920_v34 = vadd.f32 %v7108_v51, %v7107_v3  ;;  %v3219_v11 = vld [vmem:[%s6522_s0 + $0xa0] sm:$0x3f]  ;;  %v7130_v26 = vld [vmem:[#allocation39_spill] sm:$0xff] }
 0x1ca   :  { %v2468_v59 = vsel %vm317_vm2, %v2465_v49, %v2467_v15  ;;  %v2505_v27 = vadd.f32 %v2476_v24, %v5819_v20  ;;  %v2506_v57 = vadd.f32 %v2478_v30, %v5823_v63  ;;  %v1921_v41 = vadd.f32 %v7110_v55, %v7109_v12  ;;  %v3220_v20 = vld [vmem:[%s6523_s1 + $0xa0] sm:$0x3f]  ;;  %v7132_v30 = vld [vmem:[#allocation48_spill] sm:$0xff]  ;;  %v7140_v55 = vld [vmem:[#allocation97_spill] sm:$0xff] }
 0x1cb   :  { %v1923_v19 = vadd.f32 %v7112_v9, %v7111_v2  ;;  %v2499_v56 = vadd.f32 %v2461_v21, %v5799_v50  ;;  %v2500_v32 = vadd.f32 %v2463_v54, %v5802_v1  ;;  %v5916_v29 = vmul.f32 %v3220_v20, %v3219_v11  ;;  %v7113_v1 = vld [vmem:[#allocation49_spill] sm:$0xff]  ;;  %v7120_v62 = vld [vmem:[#allocation70_spill] sm:$0xff]  ;;  %v7141_v2 = vld [vmem:[#allocation59_spill] sm:$0xff] }
 0x1cc   :  { %v2498_v63 = vadd.f32 %v2458_v7, %v5796_v52  ;;  %v2511_v58 = vadd.f32 %v2503_v23, %v2495_v14  ;;  %v2512_v53 = vadd.f32 %v2504_v47, %v2496_v60  ;;  %v2502_v31 = vadd.f32 %v2468_v59, %v5808_v17  ;;  %v7122_v52 = vld [vmem:[#allocation36_spill] sm:$0xff]  ;;  %v7129_v7 = vld [vmem:[#allocation71_spill] sm:$0xff]  ;;  %v7131_v54 = vld [vmem:[#allocation46_spill] sm:$0xff] }
 0x1cd   :  { %v2507_v48 = vadd.f32 %v2505_v27, %v2493_v36  ;;  %v2508_v50 = vadd.f32 %v2506_v57, %v2494_v8  ;;  %v2515_v4 = vadd.f32 %v2501_v37, %v2497_v42  ;;  %v5922_v5 = vadd.f32 %v7114_v45, %v7113_v1  ;;  %v7125_v17 = vld [vmem:[#allocation40_spill] sm:$0xff]  ;;  %v7133_v8 = vld [vmem:[#allocation74_spill] sm:$0xff]  ;;  %v7136_v47 = vld [vmem:[#allocation93_spill] sm:$0xff] }
 0x1ce   :  { %v5926_v28 = vadd.f32 %v7117_v35, %v7116_v40  ;;  %v5930_v10 = vadd.f32 %v7120_v62, %v7119_v0  ;;  %v5934_v16 = vadd.f32 %v7123_v39, %v7122_v52  ;;  %v5937_v18 = vadd.f32 %v7125_v17, %v1920_v34  ;;  %v7134_v60 = vld [vmem:[#allocation90_spill] sm:$0xff]  ;;  %v7135_v37 = vld [vmem:[#allocation92_spill] sm:$0xff]  ;;  %v7138_v59 = vld [vmem:[#allocation95_spill] sm:$0xff] }
 0x1cf   :  { %7115 = vst [vmem:[#allocation42_spill] sm:$0xff] %v5922_v5  ;;  %v5939_v49 = vadd.f32 %v1923_v19, %v1921_v41  ;;  %v2519_v44 = vmul.f32 0.27068216, %v2499_v56  ;;  %v5941_v46 = vmul.f32 0.27068216, %v2500_v32  ;;  %v2548_v38 = vrot.slane %v7128_v43, 6 }
 0x1d0   :  { %7118 = vst [vmem:[#allocation43_spill] sm:$0xff] %v5926_v28  ;;  %7121 = vst [vmem:[#allocation44_spill] sm:$0xff] %v5930_v10  ;;  %v5943_v33 = vmul.f32 0.11128076, %v2511_v58  ;;  %v5945_v13 = vmul.f32 0.11128076, %v2512_v53  ;;  %v2516_v15 = vadd.f32 %v2502_v31, %v2498_v63 }
 0x1d1   :  { %7124 = vst [vmem:[#allocation45_spill] sm:$0xff] %v5934_v16  ;;  %7126 = vst [vmem:[#allocation18_spill] sm:$0xff] %v5937_v18  ;;  %v2549_v6 = vrot.slane %v7129_v7, 6  ;;  %v2509_v22 = vmul.f32 0.036632847, %v2507_v48  ;;  %v2551_v21 = vrot.slane %v7130_v26, 6 }
 0x1d2   :  { %7127 = vst [vmem:[#allocation58_spill] sm:$0xff] %v5939_v49  ;;  %v5949_v61 = vmul.f32 0.036632847, %v2508_v50  ;;  %v2517_v25 = vmul.f32 0.21674532, %v2515_v4  ;;  %v2553_v24 = vrot.slane %v7131_v54, 6 }
 0x1d3   :  { %v2554_v36 = vrot.slane %v7132_v30, 6  ;;  %v2556_v14 = vrot.slane %v7133_v8, 6  ;;  %v2558_v42 = vrot.slane %v7134_v60, 6  ;;  %v2559_v23 = vrot.slane %v7135_v37, 6  ;;  %v7137_v51 = vld [vmem:[#allocation94_spill] sm:$0xff]  ;;  %v7139_v57 = vld [vmem:[#allocation96_spill] sm:$0xff] }
 0x1d4   :  { %v2561_v3 = vrot.slane %v7136_v47, 6  ;;  %v2563_v34 = vrot.slane %v7137_v51, 6  ;;  %v2564_v27 = vrot.slane %v7138_v59, 6  ;;  %v2566_v12 = vrot.slane %v7139_v57, 6  ;;  %v7142_v56 = vld [vmem:[#allocation7_spill] sm:$0xff]  ;;  %v7144_v63 = vld [vmem:[#allocation84_spill] sm:$0xff] }
 0x1d5   :  { %v2568_v41 = vrot.slane %v7140_v55, 6  ;;  %v2569_v9 = vrot.slane %v7141_v2, 6  ;;  %v2550_v19 = vsel %vm140_vm0, %v2548_v38, %v2549_v6  ;;  %v2571_v32 = vrot.slane %v7142_v56, 6  ;;  %v7143_v11 = vld [vmem:[#allocation11_spill] sm:$0xff]  ;;  %v7145_v48 = vld [vmem:[#allocation21_spill] sm:$0xff] }
 0x1d6   :  { %v2573_v20 = vrot.slane %v7143_v11, 6  ;;  %v2574_v58 = vrot.slane %v7144_v63, 6  ;;  %v2552_v53 = vsel %vm140_vm0, %v2549_v6, %v2551_v21  ;;  %v2555_v31 = vsel %vm140_vm0, %v2553_v24, %v2554_v36  ;;  %v7146_v4 = vld [vmem:[#allocation53_spill] sm:$0xff] }
 0x1d7   :  { %v2576_v50 = vrot.slane %v7145_v48, 6  ;;  %v2578_v1 = vrot.slane %v7146_v4, 6  ;;  %v2557_v45 = vsel %vm140_vm0, %v2554_v36, %v2556_v14  ;;  %v2560_v40 = vsel %vm140_vm0, %v2558_v42, %v2559_v23  ;;  %v7147_v35 = vld [vmem:[#allocation25_spill] sm:$0xff] }
 0x1d8   :  { %v2579_v0 = vrot.slane %v7147_v35, 6  ;;  %v2581_v62 = vrot.slane %v5916_v29, 6  ;;  %v2562_v52 = vsel %vm140_vm0, %v2559_v23, %v2561_v3  ;;  %v2565_v39 = vsel %vm140_vm0, %v2563_v34, %v2564_v27 }
 0x1d9   :  { %v2567_v17 = vsel %vm140_vm0, %v2564_v27, %v2566_v12  ;;  %v2570_v38 = vsel %vm140_vm0, %v2568_v41, %v2569_v9  ;;  %v2572_v6 = vsel %vm140_vm0, %v2569_v9, %v2571_v32  ;;  %v2575_v21 = vsel %vm140_vm0, %v2573_v20, %v2574_v58 }
 0x1da   :  { %v2577_v24 = vsel %vm140_vm0, %v2574_v58, %v2576_v50  ;;  %v2597_v36 = vadd.f32 %v2550_v19, %v7128_v43  ;;  %v2580_v14 = vsel %vm140_vm0, %v2578_v1, %v2579_v0  ;;  %v2598_v42 = vadd.f32 %v2552_v53, %v7129_v7 }
 0x1db   :  { %v2599_v23 = vadd.f32 %v2555_v31, %v7131_v54  ;;  %v2600_v3 = vadd.f32 %v2557_v45, %v7132_v30  ;;  %v2582_v34 = vsel %vm140_vm0, %v2579_v0, %v2581_v62  ;;  %v2601_v27 = vadd.f32 %v2560_v40, %v7134_v60 }
 0x1dc   :  { %v2602_v12 = vadd.f32 %v2562_v52, %v7135_v37  ;;  %v2603_v41 = vadd.f32 %v2565_v39, %v7137_v51  ;;  %v5991_v9 = vmul.f32 0.21674532, %v2516_v15  ;;  %v2604_v19 = vadd.f32 %v2567_v17, %v7138_v59 }
 0x1dd   :  { %v2605_v32 = vadd.f32 %v2570_v38, %v7140_v55  ;;  %v2606_v20 = vadd.f32 %v2572_v6, %v7141_v2  ;;  %v2607_v58 = vadd.f32 %v2575_v21, %v7143_v11  ;;  %v2608_v53 = vadd.f32 %v2577_v24, %v7144_v63 }
 0x1de   :  { %v2609_v31 = vadd.f32 %v2580_v14, %v7146_v4  ;;  %v5999_v50 = vmul.f32 0.036632847, %v2597_v36  ;;  %v2610_v1 = vadd.f32 %v2582_v34, %v7147_v35  ;;  %v6002_v45 = vmul.f32 0.036632847, %v2598_v42 }
 0x1df   :  { %v6004_v15 = vmul.f32 0.036632847, %v2599_v23  ;;  %v6006_v40 = vmul.f32 0.036632847, %v2600_v3  ;;  %v6008_v0 = vadd.f32 %v2519_v44, %v2517_v25  ;;  %v6010_v62 = vmul.f32 0.036632847, %v2601_v27 }
 0x1e0   :  { %7148 = vst [vmem:[#allocation3_spill] sm:$0xff] %v5999_v50  ;;  %7149 = vst [vmem:[#allocation55_spill] sm:$0xff] %v6002_v45  ;;  %v6012_v52 = vmul.f32 0.036632847, %v2602_v12  ;;  %v6014_v39 = vmul.f32 0.036632847, %v2603_v41  ;;  %v6017_v17 = vadd.f32 %v5943_v33, %v2509_v22  ;;  %v6027_v24 = vadd.f32 %v5945_v13, %v5949_v61 }
 0x1e1   :  { %7150 = vst [vmem:[#allocation79_spill] sm:$0xff] %v6004_v15  ;;  %7151 = vst [vmem:[#allocation82_spill] sm:$0xff] %v6006_v40  ;;  %v6019_v38 = vmul.f32 0.036632847, %v2604_v19  ;;  %v6021_v6 = vmul.f32 0.036632847, %v2605_v32 }
 0x1e2   :  { %7152 = vst [vmem:[#allocation86_spill] sm:$0xff] %v6010_v62  ;;  %7153 = vst [vmem:[#allocation24_spill] sm:$0xff] %v6012_v52  ;;  %v6023_v21 = vmul.f32 0.036632847, %v2606_v20  ;;  %v6029_v44 = vmul.f32 0.036632847, %v2607_v58 }
 0x1e3   :  { %7154 = vst [vmem:[#allocation19_spill] sm:$0xff] %v6014_v39  ;;  %7155 = vst [vmem:[#allocation26_spill] sm:$0xff] %v6019_v38  ;;  %v6031_v25 = vmul.f32 0.036632847, %v2608_v53  ;;  %v6033_v36 = vmul.f32 0.036632847, %v2609_v31 }
 0x1e4   :  { %7156 = vst [vmem:[#allocation22_spill] sm:$0xff] %v6021_v6  ;;  %7157 = vst [vmem:[#allocation27_spill] sm:$0xff] %v6023_v21  ;;  %v6035_v14 = vmul.f32 0.036632847, %v2610_v1  ;;  %v2625_v33 = vrot.slane %v7128_v43, 4  ;;  %v2626_v22 = vrot.slane %v7129_v7, 4 }
 0x1e5   :  { %7158 = vst [vmem:[#allocation23_spill] sm:$0xff] %v6029_v44  ;;  %7159 = vst [vmem:[#allocation28_spill] sm:$0xff] %v6031_v25  ;;  %v2628_v42 = vrot.slane %v7130_v26, 4  ;;  %v2630_v23 = vrot.slane %v7131_v54, 4  ;;  %v2631_v3 = vrot.slane %v7132_v30, 4  ;;  %v2633_v13 = vrot.slane %v7133_v8, 4 }
 0x1e6   :  { %7160 = vst [vmem:[#allocation20_spill] sm:$0xff] %v6033_v36  ;;  %7161 = vst [vmem:[#allocation32_spill] sm:$0xff] %v6035_v14  ;;  %v2635_v61 = vrot.slane %v7134_v60, 4  ;;  %v2636_v34 = vrot.slane %v7135_v37, 4  ;;  %v2638_v27 = vrot.slane %v7136_v47, 4  ;;  %v2640_v12 = vrot.slane %v7137_v51, 4 }
 0x1e7   :  { %v2641_v41 = vrot.slane %v7138_v59, 4  ;;  %v2643_v19 = vrot.slane %v7139_v57, 4  ;;  %v2645_v32 = vrot.slane %v7140_v55, 4  ;;  %v2646_v20 = vrot.slane %v7141_v2, 4 }
 0x1e8   :  { %v2648_v58 = vrot.slane %v7142_v56, 4  ;;  %v2627_v53 = vsel %vm218_vm1, %v2625_v33, %v2626_v22  ;;  %v2650_v31 = vrot.slane %v7143_v11, 4  ;;  %v2651_v1 = vrot.slane %v7144_v63, 4 }
 0x1e9   :  { %v2653_v14 = vrot.slane %v7145_v48, 4  ;;  %v2629_v36 = vsel %vm218_vm1, %v2626_v22, %v2628_v42  ;;  %v2632_v25 = vsel %vm218_vm1, %v2630_v23, %v2631_v3  ;;  %v2655_v44 = vrot.slane %v7146_v4, 4 }
 0x1ea   :  { %v2656_v21 = vrot.slane %v7147_v35, 4  ;;  %v2634_v6 = vsel %vm218_vm1, %v2631_v3, %v2633_v13  ;;  %v2637_v38 = vsel %vm218_vm1, %v2635_v61, %v2636_v34  ;;  %v2639_v33 = vsel %vm218_vm1, %v2636_v34, %v2638_v27 }
 0x1eb   :  { %v2658_v39 = vrot.slane %v5916_v29, 4  ;;  %v2642_v52 = vsel %vm218_vm1, %v2640_v12, %v2641_v41  ;;  %v2644_v62 = vsel %vm218_vm1, %v2641_v41, %v2643_v19  ;;  %v2647_v22 = vsel %vm218_vm1, %v2645_v32, %v2646_v20 }
 0x1ec   :  { %v2649_v23 = vsel %vm218_vm1, %v2646_v20, %v2648_v58  ;;  %v2652_v40 = vsel %vm218_vm1, %v2650_v31, %v2651_v1  ;;  %v2654_v15 = vsel %vm218_vm1, %v2651_v1, %v2653_v14  ;;  %v2657_v3 = vsel %vm218_vm1, %v2655_v44, %v2656_v21 }
 0x1ed   :  { %v2681_v61 = vadd.f32 %v2627_v53, %v7128_v43  ;;  %v2659_v34 = vsel %vm218_vm1, %v2656_v21, %v2658_v39  ;;  %v2682_v45 = vadd.f32 %v2629_v36, %v7129_v7  ;;  %v2683_v12 = vadd.f32 %v2628_v42, %v7130_v26 }
 0x1ee   :  { %v2684_v41 = vadd.f32 %v2632_v25, %v7131_v54  ;;  %v2685_v32 = vadd.f32 %v2634_v6, %v7132_v30  ;;  %v2686_v20 = vadd.f32 %v2633_v13, %v7133_v8  ;;  %v2687_v31 = vadd.f32 %v2637_v38, %v7134_v60 }
 0x1ef   :  { %v2688_v1 = vadd.f32 %v2639_v33, %v7135_v37  ;;  %v2689_v44 = vadd.f32 %v2638_v27, %v7136_v47  ;;  %v2690_v53 = vadd.f32 %v2642_v52, %v7137_v51  ;;  %v2691_v21 = vadd.f32 %v2644_v62, %v7138_v59 }
 0x1f0   :  { %v2692_v36 = vadd.f32 %v2643_v19, %v7139_v57  ;;  %v2693_v42 = vadd.f32 %v2647_v22, %v7140_v55  ;;  %v2694_v25 = vadd.f32 %v2649_v23, %v7141_v2  ;;  %v2695_v6 = vadd.f32 %v2648_v58, %v7142_v56 }
 0x1f1   :  { %v2696_v13 = vadd.f32 %v2652_v40, %v7143_v11  ;;  %v2697_v38 = vadd.f32 %v2654_v15, %v7144_v63  ;;  %v6089_v50 = vmul.f32 0.11128076, %v2681_v61  ;;  %v6091_v33 = vmul.f32 0.11128076, %v2682_v45 }
 0x1f2   :  { %v6093_v27 = vmul.f32 0.11128076, %v2683_v12  ;;  %v2698_v62 = vadd.f32 %v2653_v14, %v7145_v48  ;;  %v6096_v52 = vmul.f32 0.11128076, %v2684_v41  ;;  %v6098_v19 = vmul.f32 0.11128076, %v2685_v32 }
 0x1f3   :  { %7162 = vst [vmem:[#allocation33_spill] sm:$0xff] %v6091_v33  ;;  %v6100_v22 = vmul.f32 0.11128076, %v2686_v20  ;;  %v2699_v58 = vadd.f32 %v2657_v3, %v7146_v4  ;;  %v6103_v23 = vmul.f32 0.11128076, %v2687_v31  ;;  %v2700_v45 = vadd.f32 %v2659_v34, %v7147_v35 }
 0x1f4   :  { %7163 = vst [vmem:[#allocation62_spill] sm:$0xff] %v6093_v27  ;;  %7164 = vst [vmem:[#allocation64_spill] sm:$0xff] %v6096_v52  ;;  %v6105_v40 = vmul.f32 0.11128076, %v2688_v1  ;;  %v6107_v15 = vmul.f32 0.11128076, %v2689_v44  ;;  %v2701_v41 = vadd.f32 %v2658_v39, %v5916_v29  ;;  %v6125_v31 = vadd.f32 %v5941_v46, %v5991_v9 }
 0x1f5   :  { %7165 = vst [vmem:[#allocation65_spill] sm:$0xff] %v6098_v19  ;;  %7166 = vst [vmem:[#allocation34_spill] sm:$0xff] %v6100_v22  ;;  %v6110_v61 = vmul.f32 0.11128076, %v2690_v53  ;;  %v6112_v12 = vmul.f32 0.11128076, %v2691_v21 }
 0x1f6   :  { %7167 = vst [vmem:[#allocation2_spill] sm:$0xff] %v6103_v23  ;;  %7168 = vst [vmem:[#allocation80_spill] sm:$0xff] %v6105_v40  ;;  %v6114_v14 = vmul.f32 0.11128076, %v2692_v36  ;;  %v6117_v32 = vmul.f32 0.11128076, %v2693_v42 }
 0x1f7   :  { %7169 = vst [vmem:[#allocation81_spill] sm:$0xff] %v6107_v15  ;;  %7170 = vst [vmem:[#allocation83_spill] sm:$0xff] %v6110_v61  ;;  %v6119_v20 = vmul.f32 0.11128076, %v2694_v25  ;;  %v6121_v3 = vmul.f32 0.11128076, %v2695_v6 }
 0x1f8   :  { %7171 = vst [vmem:[#allocation85_spill] sm:$0xff] %v6112_v12  ;;  %7172 = vst [vmem:[#allocation16_spill] sm:$0xff] %v6114_v14  ;;  %v6127_v1 = vmul.f32 0.11128076, %v2696_v13  ;;  %v6129_v34 = vmul.f32 0.11128076, %v2697_v38 }
 0x1f9   :  { %7173 = vst [vmem:[#allocation17_spill] sm:$0xff] %v6117_v32  ;;  %7174 = vst [vmem:[#allocation29_spill] sm:$0xff] %v6119_v20  ;;  %v6131_v44 = vmul.f32 0.11128076, %v2698_v62  ;;  %v6133_v53 = vmul.f32 0.11128076, %v2699_v58 }
 0x1fa   :  { %7175 = vst [vmem:[#allocation37_spill] sm:$0xff] %v6121_v3  ;;  %7176 = vst [vmem:[#allocation41_spill] sm:$0xff] %v6127_v1  ;;  %v2723_v39 = vrot.slane %v7128_v43, 2  ;;  %v2724_v21 = vrot.slane %v7129_v7, 2  ;;  %v2726_v36 = vrot.slane %v7130_v26, 2  ;;  %v2728_v42 = vrot.slane %v7131_v54, 2 }
 0x1fb   :  { %7177 = vst [vmem:[#allocation75_spill] sm:$0xff] %v6129_v34  ;;  %7178 = vst [vmem:[#allocation52_spill] sm:$0xff] %v6131_v44  ;;  %v2729_v25 = vrot.slane %v7132_v30, 2  ;;  %v2731_v46 = vrot.slane %v7133_v8, 2  ;;  %v2733_v9 = vrot.slane %v7134_v60, 2  ;;  %v2734_v38 = vrot.slane %v7135_v37, 2 }
 0x1fc   :  { %7179 = vst [vmem:[#allocation87_spill] sm:$0xff] %v6133_v53  ;;  %v6142_v6 = vmul.f32 0.11128076, %v2700_v45  ;;  %v6144_v13 = vmul.f32 0.11128076, %v2701_v41  ;;  %v2736_v62 = vrot.slane %v7136_v47, 2  ;;  %v2725_v58 = vsel %vm317_vm2, %v2723_v39, %v2724_v21 }
 0x1fd   :  { %v2727_v53 = vsel %vm317_vm2, %v2724_v21, %v2726_v36  ;;  %v2738_v44 = vrot.slane %v7137_v51, 2  ;;  %v2739_v34 = vrot.slane %v7138_v59, 2  ;;  %v2730_v1 = vsel %vm317_vm2, %v2728_v42, %v2729_v25 }
 0x1fe   :  { %7180 = vst [vmem:[#allocation31_spill] sm:$0xff] %v6142_v6  ;;  %7181 = vst [vmem:[#allocation51_spill] sm:$0xff] %v6144_v13  ;;  %v2732_v3 = vsel %vm317_vm2, %v2729_v25, %v2731_v46  ;;  %v2741_v45 = vrot.slane %v7139_v57, 2  ;;  %v2743_v41 = vrot.slane %v7140_v55, 2  ;;  %v2735_v13 = vsel %vm317_vm2, %v2733_v9, %v2734_v38 }
 0x1ff   :  { %v2744_v6 = vrot.slane %v7141_v2, 2  ;;  %v2746_v39 = vrot.slane %v7142_v56, 2  ;;  %v2748_v21 = vrot.slane %v7143_v11, 2  ;;  %v2737_v20 = vsel %vm317_vm2, %v2734_v38, %v2736_v62 }
 0x200   :  { %v2749_v32 = vrot.slane %v7144_v63, 2  ;;  %v2751_v42 = vrot.slane %v7145_v48, 2  ;;  %v2753_v25 = vrot.slane %v7146_v4, 2  ;;  %v2740_v14 = vsel %vm317_vm2, %v2738_v44, %v2739_v34 }
 0x201   :  { %v2742_v12 = vsel %vm317_vm2, %v2739_v34, %v2741_v45  ;;  %v2754_v9 = vrot.slane %v7147_v35, 2  ;;  %v2756_v61 = vrot.slane %v5916_v29, 2  ;;  %v2745_v15 = vsel %vm317_vm2, %v2743_v41, %v2744_v6 }
 0x202   :  { %v2747_v40 = vsel %vm317_vm2, %v2744_v6, %v2746_v39  ;;  %v2750_v38 = vsel %vm317_vm2, %v2748_v21, %v2749_v32  ;;  %v2752_v23 = vsel %vm317_vm2, %v2749_v32, %v2751_v42  ;;  %v2779_v44 = vadd.f32 %v2725_v58, %v7128_v43 }
 0x203   :  { %v2755_v22 = vsel %vm317_vm2, %v2753_v25, %v2754_v9  ;;  %v2757_v19 = vsel %vm317_vm2, %v2754_v9, %v2756_v61  ;;  %v2780_v34 = vadd.f32 %v2727_v53, %v7129_v7  ;;  %v2781_v52 = vadd.f32 %v2726_v36, %v7130_v26 }
 0x204   :  { %v2782_v27 = vadd.f32 %v2730_v1, %v7131_v54  ;;  %v2783_v41 = vadd.f32 %v2732_v3, %v7132_v30  ;;  %v2784_v6 = vadd.f32 %v2731_v46, %v7133_v8  ;;  %v2785_v21 = vadd.f32 %v2735_v13, %v7134_v60 }
 0x205   :  { %v2786_v32 = vadd.f32 %v2737_v20, %v7135_v37  ;;  %v2787_v25 = vadd.f32 %v2736_v62, %v7136_v47  ;;  %v2788_v9 = vadd.f32 %v2740_v14, %v7137_v51  ;;  %v2789_v58 = vadd.f32 %v2742_v12, %v7138_v59 }
 0x206   :  { %v2790_v53 = vadd.f32 %v2741_v45, %v7139_v57  ;;  %v2791_v36 = vadd.f32 %v2745_v15, %v7140_v55  ;;  %v2792_v1 = vadd.f32 %v2747_v40, %v7141_v2  ;;  %v2793_v3 = vadd.f32 %v2746_v39, %v7142_v56 }
 0x207   :  { %v2794_v46 = vadd.f32 %v2750_v38, %v7143_v11  ;;  %v2795_v13 = vadd.f32 %v2752_v23, %v7144_v63  ;;  %v2796_v20 = vadd.f32 %v2751_v42, %v7145_v48  ;;  %v2797_v62 = vadd.f32 %v2755_v22, %v7146_v4 }
 0x208   :  { %v6193_v33 = vmul.f32 0.21674532, %v2779_v44  ;;  %v6195_v14 = vmul.f32 0.21674532, %v2780_v34  ;;  %v6197_v12 = vmul.f32 0.21674532, %v2781_v52  ;;  %v2798_v15 = vadd.f32 %v2757_v19, %v7147_v35 }
 0x209   :  { %v6200_v45 = vmul.f32 0.21674532, %v2782_v27  ;;  %v6202_v40 = vmul.f32 0.21674532, %v2783_v41  ;;  %v6204_v39 = vmul.f32 0.21674532, %v2784_v6  ;;  %v2799_v23 = vadd.f32 %v2756_v61, %v5916_v29 }
 0x20a   :  { %v6207_v38 = vmul.f32 0.21674532, %v2785_v21  ;;  %v6209_v42 = vmul.f32 0.21674532, %v2786_v32  ;;  %v6211_v22 = vmul.f32 0.21674532, %v2787_v25  ;;  %v6221_v27 = vmul.f32 %v5922_v5, %v5922_v5 }
 0x20b   :  { %v6213_v44 = vmul.f32 0.21674532, %v2788_v9  ;;  %v6215_v52 = vmul.f32 0.21674532, %v2789_v58  ;;  %v6217_v34 = vmul.f32 0.21674532, %v2790_v53  ;;  %v6225_v19 = vadd.f32 %v6008_v0, %v6017_v17 }
 0x20c   :  { %7182 = vst [vmem:[#allocation4_spill] sm:$0xff] %v6221_v27  ;;  %v6227_v61 = vmul.f32 0.21674532, %v2791_v36  ;;  %v6229_v41 = vmul.f32 0.21674532, %v2792_v1  ;;  %v6235_v21 = vadd.f32 %v6125_v31, %v6027_v24  ;;  %v6251_v53 = vmul.f32 %v5926_v28, %v5926_v28  ;;  %v7200_v5 = vld [vmem:[#allocation34_spill] sm:$0xff] }
 0x20d   :  { %7183 = vst [vmem:[#allocation5_spill] sm:$0xff] %v6225_v19  ;;  %v6231_v6 = vmul.f32 0.21674532, %v2793_v3  ;;  %v6237_v32 = vmul.f32 0.21674532, %v2794_v46  ;;  %v6264_v1 = vmul.f32 %v5930_v10, %v5930_v10 }
 0x20e   :  { %7185 = vst [vmem:[#allocation8_spill] sm:$0xff] %v6235_v21  ;;  %v6239_v25 = vmul.f32 0.21674532, %v2795_v13  ;;  %v6241_v9 = vmul.f32 0.21674532, %v2796_v20  ;;  %7192 = vst [vmem:[#allocation50_spill] sm:$0xff] %v6251_v53 }
 0x20f   :  { %7184 = vst [vmem:[#allocation6_spill] sm:$0xff] %v6231_v6  ;;  %7186 = vst [vmem:[#allocation9_spill] sm:$0xff] %v6237_v32  ;;  %v6243_v58 = vmul.f32 0.21674532, %v2797_v62  ;;  %v6245_v0 = vmul.f32 0.21674532, %v2798_v15 }
 0x210   :  { %7187 = vst [vmem:[#allocation10_spill] sm:$0xff] %v6239_v25  ;;  %7188 = vst [vmem:[#allocation12_spill] sm:$0xff] %v6241_v9  ;;  %v6247_v17 = vmul.f32 0.21674532, %v2799_v23  ;;  %v6254_v36 = vmul.f32 0.27068216, %v7128_v43  ;;  %v6277_v43 = vmul.f32 %v5934_v16, %v5934_v16 }
 0x211   :  { %7189 = vst [vmem:[#allocation13_spill] sm:$0xff] %v6243_v58  ;;  %7190 = vst [vmem:[#allocation14_spill] sm:$0xff] %v6245_v0  ;;  %v6257_v24 = vmul.f32 0.27068216, %v7129_v7  ;;  %v6260_v31 = vmul.f32 0.27068216, %v7130_v26 }
 0x212   :  { %7191 = vst [vmem:[#allocation15_spill] sm:$0xff] %v6247_v17  ;;  %7193 = vst [vmem:[#allocation54_spill] sm:$0xff] %v6264_v1  ;;  %v6267_v3 = vmul.f32 0.27068216, %v7131_v54  ;;  %v6270_v46 = vmul.f32 0.27068216, %v7132_v30 }
 0x213   :  { %v6273_v13 = vmul.f32 0.27068216, %v7133_v8  ;;  %7194 = vst [vmem:[#allocation57_spill] sm:$0xff] %v6277_v43  ;;  %v6280_v7 = vmul.f32 0.27068216, %v7134_v60  ;;  %v7197_v54 = vld [vmem:[#allocation62_spill] sm:$0xff] }
 0x214   :  { %v6283_v26 = vmul.f32 0.27068216, %v7135_v37  ;;  %v6286_v20 = vmul.f32 0.27068216, %v7136_v47  ;;  %v6291_v30 = vmul.f32 0.27068216, %v7137_v51 }
 0x215   :  { %v6294_v8 = vmul.f32 0.27068216, %v7138_v59  ;;  %v6297_v62 = vmul.f32 0.27068216, %v7139_v57  ;;  %v6302_v37 = vmul.f32 0.27068216, %v7140_v55 }
 0x216   :  { %v6305_v47 = vmul.f32 0.27068216, %v7141_v2  ;;  %v6308_v15 = vmul.f32 0.27068216, %v7142_v56  ;;  %v6313_v59 = vmul.f32 0.27068216, %v7143_v11  ;;  %v6334_v11 = vadd.f32 %v6264_v1, %v6221_v27 }
 0x217   :  { %v6316_v57 = vmul.f32 0.27068216, %v7144_v63  ;;  %v6319_v23 = vmul.f32 0.27068216, %v7145_v48  ;;  %v6324_v2 = vmul.f32 0.27068216, %v7146_v4 }
 0x218   :  { %v6327_v56 = vmul.f32 0.27068216, %v7147_v35  ;;  %v6330_v60 = vmul.f32 0.27068216, %v5916_v29  ;;  %7195 = vst [vmem:[#allocation76_spill] sm:$0xff] %v6334_v11  ;;  %v2863_v63 = vrot.slane %v6089_v50, 1 }
 0x219   :  { %v7196_v48 = vld [vmem:[#allocation33_spill] sm:$0xff]  ;;  %v2866_v16 = vrot.slane %v7197_v54, 1  ;;  %v7198_v55 = vld [vmem:[#allocation64_spill] sm:$0xff]  ;;  %v2871_v35 = vrot.slane %v7200_v5, 1  ;;  %v7201_v21 = vld [vmem:[#allocation2_spill] sm:$0xff] }
 0x21a   :  { %v2864_v51 = vrot.slane %v7196_v48, 1  ;;  %v2868_v28 = vrot.slane %v7198_v55, 1  ;;  %v7199_v4 = vld [vmem:[#allocation65_spill] sm:$0xff]  ;;  %v2873_v49 = vrot.slane %v7201_v21, 1  ;;  %v7202_v29 = vld [vmem:[#allocation80_spill] sm:$0xff]  ;;  %v7204_v27 = vld [vmem:[#allocation83_spill] sm:$0xff] }
 0x21b   :  { %v2869_v10 = vrot.slane %v7199_v4, 1  ;;  %v2874_v19 = vrot.slane %v7202_v29, 1  ;;  %v7203_v1 = vld [vmem:[#allocation81_spill] sm:$0xff]  ;;  %v2878_v48 = vrot.slane %v7204_v27, 1  ;;  %v7206_v53 = vld [vmem:[#allocation16_spill] sm:$0xff]  ;;  %v7211_v9 = vld [vmem:[#allocation75_spill] sm:$0xff] }
 0x21c   :  { %v2865_v18 = vsel %vm458_vm3, %v2863_v63, %v2864_v51  ;;  %v2867_v11 = vsel %vm458_vm3, %v2864_v51, %v2866_v16  ;;  %v2876_v50 = vrot.slane %v7203_v1, 1  ;;  %v7205_v43 = vld [vmem:[#allocation85_spill] sm:$0xff]  ;;  %v2881_v29 = vrot.slane %v7206_v53, 1  ;;  %v7214_v25 = vld [vmem:[#allocation31_spill] sm:$0xff] }
 0x21d   :  { %v2870_v54 = vsel %vm458_vm3, %v2868_v28, %v2869_v10  ;;  %v2872_v55 = vsel %vm458_vm3, %v2869_v10, %v2871_v35  ;;  %v2875_v4 = vsel %vm458_vm3, %v2873_v49, %v2874_v19  ;;  %v2879_v5 = vrot.slane %v7205_v43, 1  ;;  %v7207_v17 = vld [vmem:[#allocation17_spill] sm:$0xff]  ;;  %v7212_v35 = vld [vmem:[#allocation52_spill] sm:$0xff]  ;;  %v7215_v32 = vld [vmem:[#allocation51_spill] sm:$0xff] }
 0x21e   :  { %v2877_v21 = vsel %vm458_vm3, %v2874_v19, %v2876_v50  ;;  %v2883_v63 = vrot.slane %v7207_v17, 1  ;;  %v7208_v0 = vld [vmem:[#allocation29_spill] sm:$0xff]  ;;  %v2889_v10 = vrot.slane %v7211_v9, 1  ;;  %v2891_v19 = vrot.slane %v7212_v35, 1  ;;  %v7213_v50 = vld [vmem:[#allocation87_spill] sm:$0xff] }
 0x21f   :  { %v2884_v16 = vrot.slane %v7208_v0, 1  ;;  %v2880_v1 = vsel %vm458_vm3, %v2878_v48, %v2879_v5  ;;  %v7209_v51 = vld [vmem:[#allocation37_spill] sm:$0xff]  ;;  %v2882_v49 = vsel %vm458_vm3, %v2879_v5, %v2881_v29  ;;  %v2893_v53 = vrot.slane %v7213_v50, 1  ;;  %v7216_v6 = vld [vmem:[#allocation3_spill] sm:$0xff] }
 0x220   :  { %v2886_v27 = vrot.slane %v7209_v51, 1  ;;  %v7210_v58 = vld [vmem:[#allocation41_spill] sm:$0xff]  ;;  %v2894_v48 = vrot.slane %v7214_v25, 1  ;;  %v2896_v51 = vrot.slane %v7215_v32, 1  ;;  %v6370_v9 = vadd.f32 %v2865_v18, %v7216_v6  ;;  %v7217_v5 = vld [vmem:[#allocation55_spill] sm:$0xff]  ;;  %v7220_v25 = vld [vmem:[#allocation86_spill] sm:$0xff] }
 0x221   :  { %v2888_v28 = vrot.slane %v7210_v58, 1  ;;  %v2885_v43 = vsel %vm458_vm3, %v2883_v63, %v2884_v16  ;;  %v2892_v58 = vsel %vm458_vm3, %v2889_v10, %v2891_v19  ;;  %v6373_v29 = vadd.f32 %v2867_v11, %v7217_v5  ;;  %v7218_v63 = vld [vmem:[#allocation79_spill] sm:$0xff]  ;;  %v7223_v11 = vld [vmem:[#allocation26_spill] sm:$0xff] }
 0x222   :  { %v2887_v17 = vsel %vm458_vm3, %v2884_v16, %v2886_v27  ;;  %v6376_v35 = vadd.f32 %v2870_v54, %v7218_v63  ;;  %v2895_v50 = vsel %vm458_vm3, %v2893_v53, %v2894_v48  ;;  %v2897_v16 = vsel %vm458_vm3, %v2894_v48, %v2896_v51  ;;  %v7219_v27 = vld [vmem:[#allocation82_spill] sm:$0xff]  ;;  %v7222_v18 = vld [vmem:[#allocation19_spill] sm:$0xff] }
 0x223   :  { %v2890_v0 = vsel %vm458_vm3, %v2888_v28, %v2889_v10  ;;  %v6381_v28 = vadd.f32 %v2872_v55, %v7219_v27  ;;  %v6384_v32 = vadd.f32 %v2875_v4, %v7220_v25  ;;  %v7221_v10 = vld [vmem:[#allocation24_spill] sm:$0xff]  ;;  %v6390_v6 = vadd.f32 %v2880_v1, %v7222_v18  ;;  %v7224_v54 = vld [vmem:[#allocation22_spill] sm:$0xff]  ;;  %v7225_v53 = vld [vmem:[#allocation27_spill] sm:$0xff] }
 0x224   :  { %v6387_v19 = vadd.f32 %v2877_v21, %v7221_v10  ;;  %v6393_v5 = vadd.f32 %v2882_v49, %v7223_v11  ;;  %v6396_v63 = vadd.f32 %v2885_v43, %v7224_v54  ;;  %v6399_v48 = vadd.f32 %v2887_v17, %v7225_v53  ;;  %v7226_v55 = vld [vmem:[#allocation23_spill] sm:$0xff]  ;;  %v7227_v4 = vld [vmem:[#allocation28_spill] sm:$0xff] }
 0x225   :  { %v6402_v51 = vadd.f32 %v2890_v0, %v7226_v55  ;;  %v6405_v27 = vadd.f32 %v2892_v58, %v7227_v4  ;;  %v7228_v21 = vld [vmem:[#allocation20_spill] sm:$0xff]  ;;  %v2947_v49 = vrot.slane %v6254_v36, 1  ;;  %v2948_v43 = vrot.slane %v6257_v24, 1 }
 0x226   :  { %v6408_v25 = vadd.f32 %v2895_v50, %v7228_v21  ;;  %v7229_v1 = vld [vmem:[#allocation32_spill] sm:$0xff]  ;;  %v2950_v18 = vrot.slane %v6260_v31, 1  ;;  %v2952_v17 = vrot.slane %v6267_v3, 1  ;;  %v2953_v0 = vrot.slane %v6270_v46, 1 }
 0x227   :  { %v6411_v10 = vadd.f32 %v2897_v16, %v7229_v1  ;;  %v2955_v11 = vrot.slane %v6273_v13, 1  ;;  %v2957_v58 = vrot.slane %v6280_v7, 1  ;;  %v2949_v50 = vsel %vm458_vm3, %v2947_v49, %v2948_v43 }
 0x228   :  { %v2951_v54 = vsel %vm458_vm3, %v2948_v43, %v2950_v18  ;;  %v2958_v16 = vrot.slane %v6283_v26, 1  ;;  %v2960_v36 = vrot.slane %v6286_v20, 1  ;;  %v2954_v24 = vsel %vm458_vm3, %v2952_v17, %v2953_v0 }
 0x229   :  { %v2956_v31 = vsel %vm458_vm3, %v2953_v0, %v2955_v11  ;;  %v2962_v3 = vrot.slane %v6291_v30, 1  ;;  %v2963_v46 = vrot.slane %v6294_v8, 1  ;;  %v2965_v53 = vrot.slane %v6297_v62, 1 }
 0x22a   :  { %v2959_v13 = vsel %vm458_vm3, %v2957_v58, %v2958_v16  ;;  %v2961_v7 = vsel %vm458_vm3, %v2958_v16, %v2960_v36  ;;  %v2967_v55 = vrot.slane %v6302_v37, 1  ;;  %v2968_v20 = vrot.slane %v6305_v47, 1 }
 0x22b   :  { %v2964_v26 = vsel %vm458_vm3, %v2962_v3, %v2963_v46  ;;  %v2970_v4 = vrot.slane %v6308_v15, 1  ;;  %v2972_v21 = vrot.slane %v6313_v59, 1  ;;  %v2966_v30 = vsel %vm458_vm3, %v2963_v46, %v2965_v53  ;;  %v7234_v46 = vld [vmem:[#allocation13_spill] sm:$0xff] }
 0x22c   :  { %v2973_v8 = vrot.slane %v6316_v57, 1  ;;  %v2975_v1 = vrot.slane %v6319_v23, 1  ;;  %v2977_v49 = vrot.slane %v6324_v2, 1  ;;  %v2969_v62 = vsel %vm458_vm3, %v2967_v55, %v2968_v20 }
 0x22d   :  { %v2971_v37 = vsel %vm458_vm3, %v2968_v20, %v2970_v4  ;;  %v2978_v43 = vrot.slane %v6327_v56, 1  ;;  %v2980_v47 = vrot.slane %v6330_v60, 1  ;;  %v3003_v17 = vadd.f32 %v2949_v50, %v6193_v33 }
 0x22e   :  { %v2974_v15 = vsel %vm458_vm3, %v2972_v21, %v2973_v8  ;;  %v2976_v59 = vsel %vm458_vm3, %v2973_v8, %v2975_v1  ;;  %v3004_v57 = vadd.f32 %v2951_v54, %v6195_v14  ;;  %v3005_v0 = vadd.f32 %v2950_v18, %v6197_v12  ;;  %v7230_v18 = vld [vmem:[#allocation6_spill] sm:$0xff] }
 0x22f   :  { %v2979_v23 = vsel %vm458_vm3, %v2977_v49, %v2978_v43  ;;  %v2981_v2 = vsel %vm458_vm3, %v2978_v43, %v2980_v47  ;;  %v3006_v58 = vadd.f32 %v2954_v24, %v6200_v45  ;;  %v3007_v56 = vadd.f32 %v2956_v31, %v6202_v40  ;;  %v7231_v24 = vld [vmem:[#allocation9_spill] sm:$0xff]  ;;  %v7233_v31 = vld [vmem:[#allocation12_spill] sm:$0xff] }
 0x230   :  { %v3008_v60 = vadd.f32 %v2955_v11, %v6204_v39  ;;  %v3009_v16 = vadd.f32 %v2959_v13, %v6207_v38  ;;  %v3010_v3 = vadd.f32 %v2961_v7, %v6209_v42  ;;  %v3011_v33 = vadd.f32 %v2960_v36, %v6211_v22  ;;  %v7232_v11 = vld [vmem:[#allocation10_spill] sm:$0xff]  ;;  %v7236_v13 = vld [vmem:[#allocation15_spill] sm:$0xff] }
 0x231   :  { %v3012_v14 = vadd.f32 %v2964_v26, %v6213_v44  ;;  %v3013_v50 = vadd.f32 %v2966_v30, %v6215_v52  ;;  %v3014_v54 = vadd.f32 %v2965_v53, %v6217_v34  ;;  %v3015_v12 = vadd.f32 %v2969_v62, %v6227_v61  ;;  %v7235_v36 = vld [vmem:[#allocation14_spill] sm:$0xff] }
 0x232   :  { %v3016_v45 = vadd.f32 %v2971_v37, %v6229_v41  ;;  %v3017_v40 = vadd.f32 %v2970_v4, %v7230_v18  ;;  %v3018_v39 = vadd.f32 %v2974_v15, %v7231_v24  ;;  %v3019_v38 = vadd.f32 %v2976_v59, %v7232_v11 }
 0x233   :  { %v3020_v42 = vadd.f32 %v2975_v1, %v7233_v31  ;;  %v3021_v22 = vadd.f32 %v2979_v23, %v7234_v46  ;;  %v3022_v44 = vadd.f32 %v2981_v2, %v7235_v36  ;;  %v3023_v52 = vadd.f32 %v2980_v47, %v7236_v13  ;;  %v7242_v13 = vld [vmem:[#allocation5_spill] sm:$0xff] }
 0x234   :  { %v3045_v7 = vrot.slane %v3003_v17, 2  ;;  %v3046_v34 = vrot.slane %v3004_v57, 2  ;;  %v3048_v53 = vrot.slane %v3005_v0, 2  ;;  %v3050_v61 = vrot.slane %v3006_v58, 2 }
 0x235   :  { %v3051_v55 = vrot.slane %v3007_v56, 2  ;;  %v3053_v41 = vrot.slane %v3008_v60, 2  ;;  %v3055_v26 = vrot.slane %v3009_v16, 2  ;;  %v3056_v21 = vrot.slane %v3010_v3, 2 }
 0x236   :  { %v3047_v20 = vsel %vm317_vm2, %v3045_v7, %v3046_v34  ;;  %v3049_v4 = vsel %vm317_vm2, %v3046_v34, %v3048_v53  ;;  %v3058_v30 = vrot.slane %v3011_v33, 2  ;;  %v3060_v49 = vrot.slane %v3012_v14, 2 }
 0x237   :  { %v3052_v8 = vsel %vm317_vm2, %v3050_v61, %v3051_v55  ;;  %v3054_v1 = vsel %vm317_vm2, %v3051_v55, %v3053_v41  ;;  %v3061_v62 = vrot.slane %v3013_v50, 2  ;;  %v3057_v37 = vsel %vm317_vm2, %v3055_v26, %v3056_v21  ;;  %v7245_v26 = vld [vmem:[#allocation58_spill] sm:$0xff] }
 0x238   :  { %v3059_v43 = vsel %vm317_vm2, %v3056_v21, %v3058_v30  ;;  %v3063_v47 = vrot.slane %v3014_v54, 2  ;;  %v3065_v15 = vrot.slane %v3015_v12, 2  ;;  %v3066_v17 = vrot.slane %v3016_v45, 2 }
 0x239   :  { %v3062_v59 = vsel %vm317_vm2, %v3060_v49, %v3061_v62  ;;  %v3068_v57 = vrot.slane %v3017_v40, 2  ;;  %v3070_v23 = vrot.slane %v3018_v39, 2  ;;  %v3071_v0 = vrot.slane %v3019_v38, 2 }
 0x23a   :  { %v3064_v2 = vsel %vm317_vm2, %v3061_v62, %v3063_v47  ;;  %v3073_v58 = vrot.slane %v3020_v42, 2  ;;  %v3075_v56 = vrot.slane %v3021_v22, 2  ;;  %v3067_v60 = vsel %vm317_vm2, %v3065_v15, %v3066_v17  ;;  %v7237_v22 = vld [vmem:[#allocation50_spill] sm:$0xff]  ;;  %v7249_v62 = vld [vmem:[#allocation76_spill] sm:$0xff] }
 0x23b   :  { %v3069_v16 = vsel %vm317_vm2, %v3066_v17, %v3068_v57  ;;  %v3076_v3 = vrot.slane %v3022_v44, 2  ;;  %v3078_v33 = vrot.slane %v3023_v52, 2  ;;  %v3072_v14 = vsel %vm317_vm2, %v3070_v23, %v3071_v0  ;;  %v7240_v44 = vld [vmem:[#allocation4_spill] sm:$0xff] }
 0x23c   :  { %v3074_v50 = vsel %vm317_vm2, %v3071_v0, %v3073_v58  ;;  %v3094_v54 = vadd.f32 %v3047_v20, %v6370_v9  ;;  %v3095_v12 = vadd.f32 %v3049_v4, %v6373_v29  ;;  %v3096_v40 = vadd.f32 %v3052_v8, %v6376_v35  ;;  %v7247_v4 = vld [vmem:[#allocation8_spill] sm:$0xff] }
 0x23d   :  { %v3077_v45 = vsel %vm317_vm2, %v3075_v56, %v3076_v3  ;;  %v3079_v18 = vsel %vm317_vm2, %v3076_v3, %v3078_v33  ;;  %v3097_v24 = vadd.f32 %v3054_v1, %v6381_v28  ;;  %v3098_v39 = vadd.f32 %v3057_v37, %v6384_v32  ;;  %v7238_v32 = vld [vmem:[#allocation57_spill] sm:$0xff]  ;;  %v7250_v56 = vld [vmem:[#allocation42_spill] sm:$0xff]  ;;  %v7252_v33 = vld [vmem:[#allocation43_spill] sm:$0xff] }
 0x23e   :  { %v3099_v11 = vadd.f32 %v3059_v43, %v6387_v19  ;;  %v3100_v38 = vadd.f32 %v3062_v59, %v6390_v6  ;;  %v3101_v31 = vadd.f32 %v3064_v2, %v6393_v5  ;;  %v3102_v9 = vadd.f32 %v3067_v60, %v6396_v63  ;;  %v7239_v19 = vld [vmem:[#allocation18_spill] sm:$0xff]  ;;  %v7251_v60 = vld [vmem:[#allocation44_spill] sm:$0xff] }
 0x23f   :  { %v3103_v29 = vadd.f32 %v3069_v16, %v6399_v48  ;;  %v3104_v42 = vadd.f32 %v3072_v14, %v6402_v51  ;;  %v3105_v46 = vadd.f32 %v3074_v50, %v6405_v27  ;;  %v3106_v35 = vadd.f32 %v3077_v45, %v6408_v25  ;;  %v7243_v5 = vld [vmem:[#allocation54_spill] sm:$0xff]  ;;  %v7253_v14 = vld [vmem:[#allocation45_spill] sm:$0xff] }
 0x240   :  { %v3107_v28 = vadd.f32 %v3079_v18, %v6411_v10  ;;  %v3151_v36 = vadd.f32 %v7238_v32, %v7237_v22  ;;  %v7241_v6 = vsub.f32 %v7239_v19, %v7240_v44  ;;  %v7244_v52 = vsub.f32 %v7242_v13, %v7243_v5  ;;  %v3191_v44 = vld [vmem:[%s6524_s2] ss:$0 sm:$0xff] }
 0x241   :  { %v3112_v7 = vadd.f32 %v3104_v42, %v3096_v40  ;;  %v3113_v48 = vadd.f32 %v3105_v46, %v3097_v24  ;;  %v3116_v34 = vadd.f32 %v3102_v9, %v3098_v39  ;;  %v3117_v51 = vadd.f32 %v3103_v29, %v3099_v11 }
 0x242   :  { %v3154_v63 = vadd.f32 %v7244_v52, %v7241_v6  ;;  %v3108_v53 = vadd.f32 %v3106_v35, %v3094_v54  ;;  %v3109_v27 = vadd.f32 %v3107_v28, %v3095_v12  ;;  %v3120_v61 = vmul.f32 0.27068216, %v3100_v38 }
 0x243   :  { %v3121_v25 = vmul.f32 0.27068216, %v3101_v31  ;;  %v3114_v55 = vmul.f32 0.11128076, %v3112_v7  ;;  %v3115_v10 = vmul.f32 0.11128076, %v3113_v48  ;;  %v7246_v20 = vsub.f32 %v7245_v26, %v7237_v22 }
 0x244   :  { %v3118_v41 = vmul.f32 0.21674532, %v3116_v34  ;;  %v7248_v21 = vsub.f32 %v7247_v4, %v7238_v32  ;;  %v3110_v8 = vmul.f32 0.036632847, %v3108_v53  ;;  %v3111_v1 = vmul.f32 0.036632847, %v3109_v27 }
 0x245   :  { %v3119_v49 = vmul.f32 0.21674532, %v3117_v51  ;;  %v3152_v37 = vadd.f32 0.0001, %v7249_v62  ;;  %v3153_v43 = vadd.f32 0.0001, %v3151_v36  ;;  %v3132_v16 = vmul.f32 %v7251_v60, %v7250_v56 }
 0x246   :  { %v3155_v30 = vadd.f32 %v7248_v21, %v7246_v20  ;;  %v3122_v47 = vadd.f32 %v3114_v55, %v3110_v8  ;;  %v3124_v15 = vadd.f32 %v3120_v61, %v3118_v41  ;;  %v3156_v59 = vadd.f32 0.0009, %v3154_v63 }
 0x247   :  { %v3123_v57 = vadd.f32 %v3115_v10, %v3111_v1  ;;  %v3125_v23 = vadd.f32 %v3121_v25, %v3119_v49  ;;  %v3133_v50 = vmul.f32 %v7253_v14, %v7252_v33  ;;  %v3140_v45 = vmul.f32 2.0, %v3132_v16 }
 0x248   :  { %v3157_v17 = vadd.f32 0.0009, %v3155_v30  ;;  %v3158_v2 = vmul.f32 %v3156_v59, %v3152_v37  ;;  %v3126_v58 = vadd.f32 %v3124_v15, %v3122_v47 }
 0x249   :  { %v3127_v3 = vadd.f32 %v3125_v23, %v3123_v57  ;;  %v3141_v40 = vmul.f32 2.0, %v3133_v50  ;;  %v3142_v39 = vadd.f32 0.0001, %v3140_v45 }
 0x24a   :  { %v3159_v0 = vmul.f32 %v3157_v17, %v3153_v43  ;;  %3192 = vrcp.f32 %v3158_v2  ;;  %v3138_v54 = vsub.f32 %v3126_v58, %v3132_v16 }
 0x24b   :  { %v3139_v12 = vsub.f32 %v3127_v3, %v3133_v50  ;;  %v3143_v31 = vadd.f32 0.0001, %v3141_v40 }
 0x24c   :  { %3194 = vrcp.f32 %v3159_v0  ;;  %v3144_v18 = vmul.f32 2.0, %v3138_v54 }
 0x24d   :  { %v3145_v24 = vmul.f32 2.0, %v3139_v12 }
 0x24e   :  { %v3146_v11 = vadd.f32 0.0009, %v3144_v18 }
 0x24f   :  { %v3147_v9 = vadd.f32 0.0009, %v3145_v24 }
 0x250   :  { %v3148_v35 = vmul.f32 %v3146_v11, %v3142_v39 }
 0x251   :  { %v3149_v22 = vmul.f32 %v3147_v9, %v3143_v31 }
 0x257   :  { %v3193_v38 = vpop.eup %3192 }
 0x258   :  { %v3162_v42 = vmul.f32 %v3193_v38, %v3158_v2 }
 0x259   :  { %v3195_v29 = vpop.eup %3194 }
 0x25a   :  { %v3163_v46 = vmul.f32 %v3195_v29, %v3159_v0  ;;  %v3164_v28 = vsub.f32 2.0, %v3162_v42 }
 0x25c   :  { %v3165_v32 = vsub.f32 2.0, %v3163_v46  ;;  %v3166_v36 = vmul.f32 %v3193_v38, %v3164_v28 }
 0x25e   :  { %v3167_v19 = vmul.f32 %v3195_v29, %v3165_v32  ;;  %v3168_v6 = vmul.f32 %v3166_v36, %v3148_v35 }
 0x260   :  { %v3169_v13 = vmul.f32 %v3167_v19, %v3149_v22  ;;  %v3177_v5 = vmul.f32 %v3191_v44, %v3168_v6 }
 0x262   :  { %v3178_v52 = vmul.f32 %v3191_v44, %v3169_v13 }
 0x264   :  { %v3179_v63 = vadd.f32 %v3178_v52, %v3177_v5 }
 0x266   :  { %v3180_v7 = vrot.slane %v3179_v63, 4 }
 0x268   :  { %v3181_v48 = vadd.f32 %v3180_v7, %v3179_v63 }
 0x26a   :  { %v3182_v34 = vrot.slane %v3181_v48, 2 }
 0x26c   :  { %v3183_v51 = vadd.f32 %v3182_v34, %v3181_v48 }
 0x26e   :  { %v3184_v53 = vrot.slane %v3183_v51, 1 }
 0x270   :  { %v3185_v27 = vadd.f32 %v3184_v53, %v3183_v51 }
 0x272   :  { %3186 = vst [vmem:[%s6525_s3] sm:$0xff] %v3185_v27 }

</bundles_post_ra>
